<compile_context>
chip_gen: v5e
topology: v5e:2x2
jax: 0.10.0
libtpu: 0.0.40
codegen_flags: <defaults>
</compile_context>

<pallas_src>
import numpy as np
import jax
import jax.numpy as jnp
from jax.experimental import pallas as pl
from jax.experimental.pallas import tpu as pltpu

NEG_SLOPE = 0.01  # nn.LeakyReLU() default negative_slope


def _leaky(v):
    return jnp.where(v > 0, v, NEG_SLOPE * v)


# ----------------------------- fused Pallas kernel -----------------------------
#
# Grid step l = one 1024x1024 linear layer:
#   l 0,1 : res_common.l1 / .l2    (step 0 also runs the folded graph_conv+upscale head)
#   l 2,3 : res_pose1              (step 2 stashes the common-trunk activation)
#   l 4,5 : res_pose2              (step 5 also runs the depth head)
#   l 6,7 : res_angle1             (step 6 restores the common-trunk activation)
#   l 8,9 : res_angle2             (step 9 also runs the angles head)

def _fused_kernel(x_ref, head_w_ref, head_b_ref, w_ref, b_ref,
                  depth_w_ref, depth_b_ref, angles_w_ref, angles_b_ref,
                  xd_ref, xa_ref,
                  act_ref, resid_ref, common_ref):
    l = pl.program_id(0)

    # Step 0: fused graph_conv + flatten + upscale (pre-folded into head_w).
    @pl.when(l == 0)
    def _():
        act_ref[...] = (
            jnp.dot(x_ref[...], head_w_ref[...],
                    preferred_element_type=jnp.float32)
            + head_b_ref[...])

    # Pose branch starts at layer 2: stash the common-trunk activation.
    @pl.when(l == 2)
    def _():
        common_ref[...] = act_ref[...]

    # Angle branch starts at layer 6: restore the common-trunk activation.
    @pl.when(l == 6)
    def _():
        act_ref[...] = common_ref[...]

    first_of_block = (l % 2) == 0

    @pl.when(first_of_block)
    def _():
        resid_ref[...] = act_ref[...]

    # The streamed 1024x1024 layer: bf16 x bf16 matmul, f32 accumulate.
    w = w_ref[0]                      # (H, H) bf16
    b = b_ref[0]                      # (1, H) f32
    h = jnp.dot(act_ref[...].astype(w.dtype), w,
                preferred_element_type=jnp.float32) + b
    h = _leaky(h)

    @pl.when(first_of_block)
    def _():
        act_ref[...] = h

    @pl.when(jnp.logical_not(first_of_block))
    def _():
        # res_block residual add + the estimator's outer LeakyReLU.
        act_ref[...] = _leaky(h + resid_ref[...])

    # Depth head right after res_pose2's second layer.
    @pl.when(l == 5)
    def _():
        xd_ref[...] = (jnp.dot(act_ref[...], depth_w_ref[...],
                               preferred_element_type=jnp.float32)
                       + depth_b_ref[...]).astype(xd_ref.dtype)

    # Angles head right after res_angle2's second layer.
    @pl.when(l == 9)
    def _():
        xa_ref[...] = (jnp.dot(act_ref[...], angles_w_ref[...],
                               preferred_element_type=jnp.float32)
                       + angles_b_ref[...]).astype(xa_ref.dtype)


def _fused_forward(p, x_flat):
    B, F = x_flat.shape
    L, H, _ = p["res_w"].shape
    J = p["depth_w"].shape[1]
    A = p["angles_w"].shape[1]

    const2 = lambda l: (0, 0)
    grid_spec = pltpu.PrefetchScalarGridSpec(
        num_scalar_prefetch=0,
        grid=(L,),
        in_specs=[
            pl.BlockSpec((B, F), const2),                   # x_flat       (resident)
            pl.BlockSpec((F, H), const2),                   # head_w       (resident)
            pl.BlockSpec((1, H), const2),                   # head_b       (resident)
            pl.BlockSpec((1, H, H), lambda l: (l, 0, 0)),   # res_w        (streamed)
            pl.BlockSpec((1, 1, H), lambda l: (l, 0, 0)),   # res_b        (streamed)
            pl.BlockSpec((H, J), const2),                   # depth_w      (resident)
            pl.BlockSpec((1, J), const2),                   # depth_b      (resident)
            pl.BlockSpec((H, A), const2),                   # angles_w     (resident)
            pl.BlockSpec((1, A), const2),                   # angles_b     (resident)
        ],
        out_specs=[
            pl.BlockSpec((B, J), const2),                   # xd
            pl.BlockSpec((B, A), const2),                   # xa
        ],
        scratch_shapes=[
            pltpu.VMEM((B, H), jnp.float32),                # act (carried)
            pltpu.VMEM((B, H), jnp.float32),                # residual
            pltpu.VMEM((B, H), jnp.float32),                # common trunk
        ],
    )
    xd, xa = pl.pallas_call(
        _fused_kernel,
        out_shape=(jax.ShapeDtypeStruct((B, J), jnp.float32),
                   jax.ShapeDtypeStruct((B, A), jnp.float32)),
        grid_spec=grid_spec,
        compiler_params=pltpu.CompilerParams(
            dimension_semantics=("arbitrary",)),            # layer chain carries state
    )(x_flat, p["head_w"], p["head_b"], p["res_w"], p["res_b"],
      p["depth_w"], p["depth_b"], p["angles_w"], p["angles_b"])
    return xd, xa


def depth_angle_estimator_forward(packed_params, x):
    if isinstance(x, tuple):
        x = x[0]
    B = x.shape[0]
    x_flat = x.reshape(B, -1).astype(jnp.float32)           # (B, J*in_dim) glue reshape
    return _fused_forward(packed_params, x_flat)


# ----------------------------- parameter setup -----------------------------

def _get_graph(num_joints=17):
    # TODO(synk): get_graph() is not provided in the reference source; use a
    # deterministic 17-joint Human3.6M-style skeleton adjacency instead.
    edges = [(0, 1), (1, 2), (2, 3), (0, 4), (4, 5), (5, 6), (0, 7), (7, 8),
             (8, 9), (9, 10), (8, 11), (11, 12), (12, 13), (8, 14), (14, 15), (15, 16)]
    g = np.zeros((num_joints, num_joints), np.float32)
    for i, j in edges:
        g[i, j] = 1.0
        g[j, i] = 1.0
    return g


def init_params(key, in_dim=2, num_joints=17, h_dim=32, hidden=1024):
    graph = _get_graph(num_joints)
    du = graph.sum(axis=-1)
    laplace = (np.diag(du ** -0.5) @ (np.diag(du) - graph)
               @ np.diag(du ** -0.5)).astype(np.float32)

    keys = list(jax.random.split(key, 16))

    def lin(k, fan_in, fan_out):
        kw, kb = jax.random.split(k)
        bound = 1.0 / np.sqrt(fan_in)
        w = jax.random.uniform(kw, (fan_in, fan_out), jnp.float32, -bound, bound)
        b = jax.random.uniform(kb, (fan_out,), jnp.float32, -bound, bound)
        return w, b

    def res(k, n):
        k1, k2 = jax.random.split(k)
        w1, b1 = lin(k1, n, n)
        w2, b2 = lin(k2, n, n)
        return (w1, b1, w2, b2)

    params = {
        "laplace": jnp.asarray(laplace),
        "weight_1": jax.random.normal(keys[0], (in_dim, h_dim), jnp.float32),
    }
    params["upscale_w"], params["upscale_b"] = lin(keys[1], h_dim * num_joints, hidden)
    params["res_common"] = res(keys[2], hidden)
    params["res_pose1"] = res(keys[3], hidden)
    params["res_pose2"] = res(keys[4], hidden)
    params["res_angle1"] = res(keys[5], hidden)
    params["res_angle2"] = res(keys[6], hidden)
    params["depth_w"], params["depth_b"] = lin(keys[7], hidden, num_joints)
    params["angles_w"], params["angles_b"] = lin(keys[8], hidden, 1)
    return params


def pack_params(params, weight_dtype=jnp.bfloat16):
    """One-time parameter packing for the fused kernel (do NOT call inside jit).

    * Folds graph_conv (laplace @ x @ weight_1) + flatten + upscale into one
      (J*in_dim, hidden) matrix -- an exact linear-algebra identity.
    * Stacks the ten 1024x1024 res-block linears into (10, H, H) bf16 so the
      kernel can stream them with an auto double-buffered BlockSpec.
    """
    lap = params["laplace"]                              # (J, J)
    w1 = params["weight_1"]                              # (in_dim, h_dim)
    wup = params["upscale_w"]                            # (J*h_dim, hidden)
    bup = params["upscale_b"]                            # (hidden,)
    J = lap.shape[0]
    in_dim, h_dim = w1.shape
    hidden = wup.shape[1]
    wup3 = wup.reshape(J, h_dim, hidden)
    # head_w[(k, c), o] = sum_{j,h} lap[j,k] * w1[c,h] * wup[(j,h), o]
    head_w = jnp.einsum("jk,ch,jho->kco", lap, w1, wup3).reshape(J * in_dim, hidden)

    blocks = [params["res_common"], params["res_pose1"], params["res_pose2"],
              params["res_angle1"], params["res_angle2"]]
    res_w = jnp.stack([w for blk in blocks for w in (blk[0], blk[2])])   # (10, H, H)
    res_b = jnp.stack([b for blk in blocks for b in (blk[1], blk[3])])   # (10, H)

    return {
        "head_w": head_w.astype(jnp.float32),
        "head_b": bup.reshape(1, hidden).astype(jnp.float32),
        "res_w": res_w.astype(weight_dtype),
        "res_b": res_b.reshape(res_w.shape[0], 1, hidden).astype(jnp.float32),
        "depth_w": params["depth_w"].astype(jnp.float32),
        "depth_b": params["depth_b"].reshape(1, -1).astype(jnp.float32),
        "angles_w": params["angles_w"].astype(jnp.float32),
        "angles_b": params["angles_b"].reshape(1, -1).astype(jnp.float32),
    }


if __name__ == "__main__":
    key = jax.random.PRNGKey(0)
    pkey, xkey = jax.random.split(key)

    batch, num_joints, in_dim = 2, 17, 2
    params = init_params(pkey, in_dim=in_dim, num_joints=num_joints,
                         h_dim=32, hidden=1024)
    packed = pack_params(params)                         # one-time packing
    x = jax.random.normal(xkey, (batch, num_joints, in_dim), jnp.float32)

    fwd = jax.jit(depth_angle_estimator_forward)
    xd, xa = fwd(packed, x)
    jax.block_until_ready((xd, xa))

    assert xd.shape == (batch, num_joints) and xa.shape == (batch, 1)
    assert bool(jnp.all(jnp.isfinite(xd))) and bool(jnp.all(jnp.isfinite(xa)))
    print("KERNEL_OK")
</pallas_src>

<mosaic_0001>
module attributes {stable_mosaic.version = 11 : i64} {
  func.func @_fused_kernel(%arg0: i32, %arg1: memref<2x34xf32, #tpu.memory_space<vmem>>, %arg2: memref<34x1024xf32, #tpu.memory_space<vmem>>, %arg3: memref<1x1024xf32, #tpu.memory_space<vmem>>, %arg4: memref<1x1024x1024xbf16, #tpu.memory_space<vmem>>, %arg5: memref<1x1x1024xf32, #tpu.memory_space<vmem>>, %arg6: memref<1024x17xf32, #tpu.memory_space<vmem>>, %arg7: memref<1x17xf32, #tpu.memory_space<vmem>>, %arg8: memref<1024x1xf32, #tpu.memory_space<vmem>>, %arg9: memref<1x1xf32, #tpu.memory_space<vmem>>, %arg10: memref<2x17xf32, #tpu.memory_space<vmem>>, %arg11: memref<2x1xf32, #tpu.memory_space<vmem>>, %arg12: memref<2x1024xf32, #tpu.memory_space<vmem>>, %arg13: memref<2x1024xf32, #tpu.memory_space<vmem>>, %arg14: memref<2x1024xf32, #tpu.memory_space<vmem>>) attributes {dimension_semantics = [#tpu.dimension_semantics<arbitrary>], iteration_bounds = array<i64: 10>, scalar_prefetch = 0 : i64, scratch_operands = 3 : i64, tpu.core_type = #tpu.core_type<tc>, window_params = [{pipeline_mode = #tpu.pipeline_mode<synchronous>, transform_indices = @transform_0, window_bounds = array<i64: 2, 34>}, {pipeline_mode = #tpu.pipeline_mode<synchronous>, transform_indices = @transform_1, window_bounds = array<i64: 34, 1024>}, {pipeline_mode = #tpu.pipeline_mode<synchronous>, transform_indices = @transform_2, window_bounds = array<i64: 1, 1024>}, {transform_indices = @transform_3, window_bounds = array<i64: 1, 1024, 1024>}, {transform_indices = @transform_4, window_bounds = array<i64: 1, 1, 1024>}, {pipeline_mode = #tpu.pipeline_mode<synchronous>, transform_indices = @transform_5, window_bounds = array<i64: 1024, 17>}, {pipeline_mode = #tpu.pipeline_mode<synchronous>, transform_indices = @transform_6, window_bounds = array<i64: 1, 17>}, {pipeline_mode = #tpu.pipeline_mode<synchronous>, transform_indices = @transform_7, window_bounds = array<i64: 1024, 1>}, {pipeline_mode = #tpu.pipeline_mode<synchronous>, transform_indices = @transform_8, window_bounds = array<i64: 1, 1>}, {pipeline_mode = #tpu.pipeline_mode<synchronous>, transform_indices = @transform_9, window_bounds = array<i64: 2, 17>}, {pipeline_mode = #tpu.pipeline_mode<synchronous>, transform_indices = @transform_10, window_bounds = array<i64: 2, 1>}]} {
    %c0_i32 = arith.constant 0 : i32
    %0 = arith.cmpi eq, %arg0, %c0_i32 : i32
    %1 = arith.extui %0 : i1 to i32
    %c0_i32_0 = arith.constant 0 : i32
    %2 = arith.cmpi ne, %1, %c0_i32_0 : i32
    scf.if %2 {
      %c0_23 = arith.constant 0 : index
      %c0_24 = arith.constant 0 : index
      %47 = vector.load %arg1[%c0_23, %c0_24] : memref<2x34xf32, #tpu.memory_space<vmem>>, vector<2x34xf32>
      %c0_25 = arith.constant 0 : index
      %c0_26 = arith.constant 0 : index
      %48 = vector.load %arg2[%c0_25, %c0_26] : memref<34x1024xf32, #tpu.memory_space<vmem>>, vector<34x1024xf32>
      %cst_27 = arith.constant dense<0.000000e+00> : vector<2x1024xf32>
      %49 = tpu.matmul %47, %48, %cst_27 {dimension_numbers = #tpu.dot_dimension_numbers<[1], [0], [0], [1], [0, 0, 1, 1], [], []>} : vector<2x34xf32>, vector<34x1024xf32>, vector<2x1024xf32> -> vector<2x1024xf32>
      %c0_28 = arith.constant 0 : index
      %c0_29 = arith.constant 0 : index
      %50 = vector.load %arg3[%c0_28, %c0_29] : memref<1x1024xf32, #tpu.memory_space<vmem>>, vector<1x1024xf32>
      %51 = vector.broadcast %50 : vector<1x1024xf32> to vector<2x1024xf32>
      %52 = arith.addf %49, %51 : vector<2x1024xf32>
      %c0_30 = arith.constant 0 : index
      %c0_31 = arith.constant 0 : index
      %53 = vector.load %arg12[%c0_30, %c0_31] : memref<2x1024xf32, #tpu.memory_space<vmem>>, vector<2x1024xf32>
      tpu.vector_store %arg12[%c0_30, %c0_31], %52 {strides = array<i32>} : memref<2x1024xf32, #tpu.memory_space<vmem>>, vector<2x1024xf32>,
    } else {
    }
    %c2_i32 = arith.constant 2 : i32
    %3 = arith.cmpi eq, %arg0, %c2_i32 : i32
    %4 = arith.extui %3 : i1 to i32
    %c0_i32_1 = arith.constant 0 : i32
    %5 = arith.cmpi ne, %4, %c0_i32_1 : i32
    scf.if %5 {
      %c0_23 = arith.constant 0 : index
      %c0_24 = arith.constant 0 : index
      %47 = vector.load %arg12[%c0_23, %c0_24] : memref<2x1024xf32, #tpu.memory_space<vmem>>, vector<2x1024xf32>
      %c0_25 = arith.constant 0 : index
      %c0_26 = arith.constant 0 : index
      %48 = vector.load %arg14[%c0_25, %c0_26] : memref<2x1024xf32, #tpu.memory_space<vmem>>, vector<2x1024xf32>
      tpu.vector_store %arg14[%c0_25, %c0_26], %47 {strides = array<i32>} : memref<2x1024xf32, #tpu.memory_space<vmem>>, vector<2x1024xf32>,
    } else {
    }
    %c6_i32 = arith.constant 6 : i32
    %6 = arith.cmpi eq, %arg0, %c6_i32 : i32
    %7 = arith.extui %6 : i1 to i32
    %c0_i32_2 = arith.constant 0 : i32
    %8 = arith.cmpi ne, %7, %c0_i32_2 : i32
    scf.if %8 {
      %c0_23 = arith.constant 0 : index
      %c0_24 = arith.constant 0 : index
      %47 = vector.load %arg14[%c0_23, %c0_24] : memref<2x1024xf32, #tpu.memory_space<vmem>>, vector<2x1024xf32>
      %c0_25 = arith.constant 0 : index
      %c0_26 = arith.constant 0 : index
      %48 = vector.load %arg12[%c0_25, %c0_26] : memref<2x1024xf32, #tpu.memory_space<vmem>>, vector<2x1024xf32>
      tpu.vector_store %arg12[%c0_25, %c0_26], %47 {strides = array<i32>} : memref<2x1024xf32, #tpu.memory_space<vmem>>, vector<2x1024xf32>,
    } else {
    }
    %c2_i32_3 = arith.constant 2 : i32
    %c0_i32_4 = arith.constant 0 : i32
    %9 = arith.cmpi eq, %c2_i32_3, %c0_i32_4 : i32
    %c1_i32 = arith.constant 1 : i32
    %10 = arith.select %9, %c1_i32, %c2_i32_3 : i32
    %11 = arith.remsi %arg0, %10 : i32
    %c0_i32_5 = arith.constant 0 : i32
    %12 = arith.cmpi ne, %11, %c0_i32_5 : i32
    %c0_i32_6 = arith.constant 0 : i32
    %13 = arith.cmpi slt, %11, %c0_i32_6 : i32
    %c0_i32_7 = arith.constant 0 : i32
    %14 = arith.cmpi slt, %10, %c0_i32_7 : i32
    %15 = arith.xori %13, %14 : i1
    %16 = arith.andi %15, %12 : i1
    %17 = arith.addi %11, %10 : i32
    %18 = arith.select %16, %17, %11 : i32
    %c0_i32_8 = arith.constant 0 : i32
    %19 = arith.cmpi eq, %18, %c0_i32_8 : i32
    %20 = arith.extui %19 : i1 to i32
    %c0_i32_9 = arith.constant 0 : i32
    %21 = arith.cmpi ne, %20, %c0_i32_9 : i32
    scf.if %21 {
      %c0_23 = arith.constant 0 : index
      %c0_24 = arith.constant 0 : index
      %47 = vector.load %arg12[%c0_23, %c0_24] : memref<2x1024xf32, #tpu.memory_space<vmem>>, vector<2x1024xf32>
      %c0_25 = arith.constant 0 : index
      %c0_26 = arith.constant 0 : index
      %48 = vector.load %arg13[%c0_25, %c0_26] : memref<2x1024xf32, #tpu.memory_space<vmem>>, vector<2x1024xf32>
      tpu.vector_store %arg13[%c0_25, %c0_26], %47 {strides = array<i32>} : memref<2x1024xf32, #tpu.memory_space<vmem>>, vector<2x1024xf32>,
    } else {
    }
    %c0 = arith.constant 0 : index
    %c0_10 = arith.constant 0 : index
    %c0_11 = arith.constant 0 : index
    %22 = vector.load %arg4[%c0, %c0_10, %c0_11] : memref<1x1024x1024xbf16, #tpu.memory_space<vmem>>, vector<1x1024x1024xbf16>
    %23 = vector.shape_cast %22 : vector<1x1024x1024xbf16> to vector<1024x1024xbf16>
    %c0_12 = arith.constant 0 : index
    %c0_13 = arith.constant 0 : index
    %c0_14 = arith.constant 0 : index
    %24 = vector.load %arg5[%c0_12, %c0_13, %c0_14] : memref<1x1x1024xf32, #tpu.memory_space<vmem>>, vector<1x1x1024xf32>
    %25 = vector.shape_cast %24 : vector<1x1x1024xf32> to vector<1x1024xf32>
    %c0_15 = arith.constant 0 : index
    %c0_16 = arith.constant 0 : index
    %26 = vector.load %arg12[%c0_15, %c0_16] : memref<2x1024xf32, #tpu.memory_space<vmem>>, vector<2x1024xf32>
    %27 = arith.truncf %26 : vector<2x1024xf32> to vector<2x1024xbf16>
    %cst = arith.constant dense<0.000000e+00> : vector<2x1024xf32>
    %28 = tpu.matmul %27, %23, %cst {dimension_numbers = #tpu.dot_dimension_numbers<[1], [0], [0], [1], [0, 0, 1, 1], [], []>} : vector<2x1024xbf16>, vector<1024x1024xbf16>, vector<2x1024xf32> -> vector<2x1024xf32>
    %29 = vector.broadcast %25 : vector<1x1024xf32> to vector<2x1024xf32>
    %30 = arith.addf %28, %29 : vector<2x1024xf32>
    %cst_17 = arith.constant 0.000000e+00 : f32
    %31 = vector.broadcast %cst_17 : f32 to vector<2x1024xf32>
    %32 = arith.cmpf ogt, %30, %31 : vector<2x1024xf32>
    %cst_18 = arith.constant 0.00999999977 : f32
    %33 = vector.broadcast %cst_18 : f32 to vector<2x1024xf32>
    %34 = arith.mulf %33, %30 : vector<2x1024xf32>
    %35 = arith.select %32, %30, %34 : vector<2x1024xi1>, vector<2x1024xf32>
    %36 = arith.extui %19 : i1 to i32
    %c0_i32_19 = arith.constant 0 : i32
    %37 = arith.cmpi ne, %36, %c0_i32_19 : i32
    scf.if %37 {
      %c0_23 = arith.constant 0 : index
      %c0_24 = arith.constant 0 : index
      %47 = vector.load %arg12[%c0_23, %c0_24] : memref<2x1024xf32, #tpu.memory_space<vmem>>, vector<2x1024xf32>
      tpu.vector_store %arg12[%c0_23, %c0_24], %35 {strides = array<i32>} : memref<2x1024xf32, #tpu.memory_space<vmem>>, vector<2x1024xf32>,
    } else {
    }
    %true = arith.constant true
    %38 = arith.xori %19, %true : i1
    %39 = arith.extui %38 : i1 to i32
    %c0_i32_20 = arith.constant 0 : i32
    %40 = arith.cmpi ne, %39, %c0_i32_20 : i32
    scf.if %40 {
      %c0_23 = arith.constant 0 : index
      %c0_24 = arith.constant 0 : index
      %47 = vector.load %arg13[%c0_23, %c0_24] : memref<2x1024xf32, #tpu.memory_space<vmem>>, vector<2x1024xf32>
      %48 = arith.addf %35, %47 : vector<2x1024xf32>
      %cst_25 = arith.constant 0.000000e+00 : f32
      %49 = vector.broadcast %cst_25 : f32 to vector<2x1024xf32>
      %50 = arith.cmpf ogt, %48, %49 : vector<2x1024xf32>
      %cst_26 = arith.constant 0.00999999977 : f32
      %51 = vector.broadcast %cst_26 : f32 to vector<2x1024xf32>
      %52 = arith.mulf %51, %48 : vector<2x1024xf32>
      %53 = arith.select %50, %48, %52 : vector<2x1024xi1>, vector<2x1024xf32>
      %c0_27 = arith.constant 0 : index
      %c0_28 = arith.constant 0 : index
      %54 = vector.load %arg12[%c0_27, %c0_28] : memref<2x1024xf32, #tpu.memory_space<vmem>>, vector<2x1024xf32>
      tpu.vector_store %arg12[%c0_27, %c0_28], %53 {strides = array<i32>} : memref<2x1024xf32, #tpu.memory_space<vmem>>, vector<2x1024xf32>,
    } else {
    }
    %c5_i32 = arith.constant 5 : i32
    %41 = arith.cmpi eq, %arg0, %c5_i32 : i32
    %42 = arith.extui %41 : i1 to i32
    %c0_i32_21 = arith.constant 0 : i32
    %43 = arith.cmpi ne, %42, %c0_i32_21 : i32
    scf.if %43 {
      %c0_23 = arith.constant 0 : index
      %c0_24 = arith.constant 0 : index
      %47 = vector.load %arg12[%c0_23, %c0_24] : memref<2x1024xf32, #tpu.memory_space<vmem>>, vector<2x1024xf32>
      %c0_25 = arith.constant 0 : index
      %c0_26 = arith.constant 0 : index
      %48 = vector.load %arg6[%c0_25, %c0_26] : memref<1024x17xf32, #tpu.memory_space<vmem>>, vector<1024x17xf32>
      %cst_27 = arith.constant dense<0.000000e+00> : vector<2x17xf32>
      %49 = tpu.matmul %47, %48, %cst_27 {dimension_numbers = #tpu.dot_dimension_numbers<[1], [0], [0], [1], [0, 0, 1, 1], [], []>} : vector<2x1024xf32>, vector<1024x17xf32>, vector<2x17xf32> -> vector<2x17xf32>
      %c0_28 = arith.constant 0 : index
      %c0_29 = arith.constant 0 : index
      %50 = vector.load %arg7[%c0_28, %c0_29] : memref<1x17xf32, #tpu.memory_space<vmem>>, vector<1x17xf32>
      %51 = vector.broadcast %50 : vector<1x17xf32> to vector<2x17xf32>
      %52 = arith.addf %49, %51 : vector<2x17xf32>
      %c0_30 = arith.constant 0 : index
      %c0_31 = arith.constant 0 : index
      %53 = vector.load %arg10[%c0_30, %c0_31] : memref<2x17xf32, #tpu.memory_space<vmem>>, vector<2x17xf32>
      tpu.vector_store %arg10[%c0_30, %c0_31], %52 {strides = array<i32>} : memref<2x17xf32, #tpu.memory_space<vmem>>, vector<2x17xf32>,
    } else {
    }
    %c9_i32 = arith.constant 9 : i32
    %44 = arith.cmpi eq, %arg0, %c9_i32 : i32
    %45 = arith.extui %44 : i1 to i32
    %c0_i32_22 = arith.constant 0 : i32
    %46 = arith.cmpi ne, %45, %c0_i32_22 : i32
    scf.if %46 {
      %c0_23 = arith.constant 0 : index
      %c0_24 = arith.constant 0 : index
      %47 = vector.load %arg12[%c0_23, %c0_24] : memref<2x1024xf32, #tpu.memory_space<vmem>>, vector<2x1024xf32>
      %c0_25 = arith.constant 0 : index
      %c0_26 = arith.constant 0 : index
      %48 = vector.load %arg8[%c0_25, %c0_26] : memref<1024x1xf32, #tpu.memory_space<vmem>>, vector<1024x1xf32>
      %cst_27 = arith.constant dense<0.000000e+00> : vector<2x1xf32>
      %49 = tpu.matmul %47, %48, %cst_27 {dimension_numbers = #tpu.dot_dimension_numbers<[1], [0], [0], [1], [0, 0, 1, 1], [], []>} : vector<2x1024xf32>, vector<1024x1xf32>, vector<2x1xf32> -> vector<2x1xf32>
      %c0_28 = arith.constant 0 : index
      %c0_29 = arith.constant 0 : index
      %50 = vector.load %arg9[%c0_28, %c0_29] : memref<1x1xf32, #tpu.memory_space<vmem>>, vector<1x1xf32>
      %51 = vector.broadcast %50 : vector<1x1xf32> to vector<2x1xf32>
      %52 = arith.addf %49, %51 : vector<2x1xf32>
      %c0_30 = arith.constant 0 : index
      %c0_31 = arith.constant 0 : index
      %53 = vector.load %arg11[%c0_30, %c0_31] : memref<2x1xf32, #tpu.memory_space<vmem>>, vector<2x1xf32>
      tpu.vector_store %arg11[%c0_30, %c0_31], %52 {strides = array<i32>} : memref<2x1xf32, #tpu.memory_space<vmem>>, vector<2x1xf32>,
    } else {
    }
    return
  }
  func.func @transform_0(%arg0: i32) -> (i32, i32) {
    %c0_i32 = arith.constant 0 : i32
    %c0_i32_0 = arith.constant 0 : i32
    %c0_i32_1 = arith.constant 0 : i32
    return %c0_i32, %c0_i32_0 : i32, i32
  }
  func.func @transform_1(%arg0: i32) -> (i32, i32) {
    %c0_i32 = arith.constant 0 : i32
    %c0_i32_0 = arith.constant 0 : i32
    %c0_i32_1 = arith.constant 0 : i32
    return %c0_i32, %c0_i32_0 : i32, i32
  }
  func.func @transform_2(%arg0: i32) -> (i32, i32) {
    %c0_i32 = arith.constant 0 : i32
    %c0_i32_0 = arith.constant 0 : i32
    %c0_i32_1 = arith.constant 0 : i32
    return %c0_i32, %c0_i32_0 : i32, i32
  }
  func.func @transform_3(%arg0: i32) -> (i32, i32, i32) {
    %c0_i32 = arith.constant 0 : i32
    %c0_i32_0 = arith.constant 0 : i32
    %c0_i32_1 = arith.constant 0 : i32
    return %arg0, %c0_i32, %c0_i32_0 : i32, i32, i32
  }
  func.func @transform_4(%arg0: i32) -> (i32, i32, i32) {
    %c0_i32 = arith.constant 0 : i32
    %c0_i32_0 = arith.constant 0 : i32
    %c0_i32_1 = arith.constant 0 : i32
    return %arg0, %c0_i32, %c0_i32_0 : i32, i32, i32
  }
  func.func @transform_5(%arg0: i32) -> (i32, i32) {
    %c0_i32 = arith.constant 0 : i32
    %c0_i32_0 = arith.constant 0 : i32
    %c0_i32_1 = arith.constant 0 : i32
    return %c0_i32, %c0_i32_0 : i32, i32
  }
  func.func @transform_6(%arg0: i32) -> (i32, i32) {
    %c0_i32 = arith.constant 0 : i32
    %c0_i32_0 = arith.constant 0 : i32
    %c0_i32_1 = arith.constant 0 : i32
    return %c0_i32, %c0_i32_0 : i32, i32
  }
  func.func @transform_7(%arg0: i32) -> (i32, i32) {
    %c0_i32 = arith.constant 0 : i32
    %c0_i32_0 = arith.constant 0 : i32
    %c0_i32_1 = arith.constant 0 : i32
    return %c0_i32, %c0_i32_0 : i32, i32
  }
  func.func @transform_8(%arg0: i32) -> (i32, i32) {
    %c0_i32 = arith.constant 0 : i32
    %c0_i32_0 = arith.constant 0 : i32
    %c0_i32_1 = arith.constant 0 : i32
    return %c0_i32, %c0_i32_0 : i32, i32
  }
  func.func @transform_9(%arg0: i32) -> (i32, i32) {
    %c0_i32 = arith.constant 0 : i32
    %c0_i32_0 = arith.constant 0 : i32
    %c0_i32_1 = arith.constant 0 : i32
    return %c0_i32, %c0_i32_0 : i32, i32
  }
  func.func @transform_10(%arg0: i32) -> (i32, i32) {
    %c0_i32 = arith.constant 0 : i32
    %c0_i32_0 = arith.constant 0 : i32
    %c0_i32_1 = arith.constant 0 : i32
    return %c0_i32, %c0_i32_0 : i32, i32
  }
}

</mosaic_0001>

<bundles_post_ra>
// kernel: depth_angle_estimator_forward.1
= control target key start
LH: loop header
LB: loop body
LE: loop exit
PB: predicated region body
PF: predicated region fallthrough
CT: control target
= control target key end

     0   :  { %s10746_s0 = inlined_call_operand.vmem [shape: f32[2,34], index: 0, kind: input, shape index: {}]   ;;  %s10747_s1 = inlined_call_operand.hbm [shape: f32[34,1024], index: 1, kind: input, shape index: {}]   ;;  %s10748_s2 = inlined_call_operand.hbm [shape: f32[1,1024], index: 2, kind: input, shape index: {}]   ;;  %s10749_s3 = inlined_call_operand.hbm [shape: bf16[10,1024,1024], index: 3, kind: input, shape index: {}]   ;;  %s10750_s4 = inlined_call_operand.hbm [shape: f32[10,1,1024], index: 4, kind: input, shape index: {}]   ;;  %s10751_s5 = inlined_call_operand.vmem [shape: f32[1024,17], index: 5, kind: input, shape index: {}]   ;;  %s10752_s6 = inlined_call_operand.hbm [shape: f32[1,17], index: 6, kind: input, shape index: {}]   ;;  %s10753_s7 = inlined_call_operand.vmem [shape: f32[1024,1], index: 7, kind: input, shape index: {}]   ;;  %s10754_s8 = inlined_call_operand.<no memory space> [shape: f32[1,1], index: 8, kind: input, shape index: {}]   ;;  %s10755_s9 = inlined_call_operand.hbm [shape: f32[2,17], index: 9, kind: output, shape index: {0}]   ;;  %s10756_s10 = inlined_call_operand.vmem [shape: f32[2,1], index: 10, kind: output, shape index: {1}]  }
   0x1   :  { %10760 = sst [smem:[#allocation22_spill]] %s10747_s1  ;;  %v16_v0 = vstv %s10754_s8 }
   0x2   :  { %10761 = sst [smem:[#allocation23_spill]] %s10748_s2  ;;  %17 = vst [vmem:[#allocation5] sm:$0x1] %v16_v0 }
   0x3   :  { %10762 = sst [smem:[#allocation24_spill]] %s10749_s3 }
   0x4   :  { %10763 = sst [smem:[#allocation25_spill]] %s10752_s6 }
   0x5   :  { %18 = vsyncpa [#allocation7], 0 }
   0x6   :  { %19 = vsyncpa [#allocation10], 0 }
   0x7   :  { %20 = vsyncpa [#allocation8], 0  ;;  %s8604_s15 = smov 0   ;;  %s8606_s16 = smov 0  }
   0x8   :  { %s8608_s17 = smov 0   ;;  %s8610_s18 = smov 0  }
   0x9 LB: > { %s8623_s8 = sadd.s32 4294967295, %s8536_s18   ;;  %p109_p0 = scmp.ne.s32.totalorder %s8528_s16, %s8524_s15  ;;  %s8536_s18 = sphi %s8610_s18, %s10775_s18   ;;  %s8532_s17 = sphi %s8608_s17, %s10779_s17   ;;  %s8528_s16 = sphi %s8606_s16, %s10778_s16   ;;  %s8524_s15 = sphi %s8604_s15, %s10777_s15  }
   0xa   : > { %p110_p1 = scmp.eq.s32.totalorder %s8623_s8, 0  ;;  %p5610_p2 = scmp.ge.s32.totalorder %s8536_s18, 1 }
   0xb   : > { %p272_p3 = scmp.lt.s32.totalorder %s8536_s18, 11  ;;  %p5611_p4 = scmp.ne.s32.totalorder %s8623_s8, 0 }
   0xc   : > { %p8632_p5 = por %p110_p1, %p109_p0  ;;  %s10765_s1 = sld [smem:[#allocation22_spill]] }
   0xd   : > { %p8639_p6 = pnand %p5610_p2, %p272_p3  ;;  %s8538_s24 = smov [#allocation6]  }
   0xe   : > { %s288_s25 = sshll.u32 %s8538_s24, 4  ;;  %s10768_s2 = sld [smem:[#allocation23_spill]]  ;;  %s289_s25 = int_to_ptr.vmem [resolvable:$true] %s288_s25 }
   0xf   : > { %p8238_p7 = pneg %p8639_p6  ;;  %s8539_s30 = smov 1024  }
  0x10   : > { %s8540_s11 = smov 64   ;;  %s8541_s12 = smov [#allocation9]  }
  0x11   : > { %p8647_p8 = pnand %p8238_p7, %p110_p1  ;;  %s303_s13 = sshll.u32 %s8541_s12, 4  ;;  %s304_s13 = int_to_ptr.vmem [resolvable:$true] %s303_s13 }
  0x12   : > { %s286_s22 = sshll.u32 %s10765_s1, 4  ;;  %s8659_s14 = sadd.s32 1, %s8536_s18   ;;  %s287_s22 = int_to_ptr.hbm [resolvable:$true] %s286_s22 }
  0x13   : > { %8241 = dma.hbm_to_vmem [thread:$0]  (!%p8647_p8), %s287_s22, 5120, %s289_s25, [#allocation7], %s8539_s30, %s8539_s30, %s8540_s11  }
  0x14   : > { %s301_s29 = sshll.u32 %s10768_s2, 4  ;;  %10769 = sst [smem:[#allocation20_spill]] %s8659_s14  ;;  %s302_s29 = int_to_ptr.hbm [resolvable:$true] %s301_s29 }
  0x15   : > { %8244 = dma.hbm_to_vmem [thread:$0]  (!%p8647_p8), %s302_s29, 128, %s304_s13, [#allocation10]  }
  0x16   : > { %s96_s15 = sadd.s32 1, %s8532_s17  ;;  %s93_s20 = ssub.s32 %s8536_s18, %s8659_s14 }
  0x17   : > { %p103_p9 = scmp.ne.s32.totalorder %s8532_s17, %s8528_s16  ;;  %p94_p10 = scmp.eq.s32.totalorder %s93_s20, 0 }
  0x18   : > { %p104_p11 = scmp.eq.s32.totalorder %s8536_s18, 0  ;;  %p8258_p12 = scmp.lt.s32.totalorder %s8536_s18, 10 }
  0x19   : > { %s335_s21 = sand.u32 1, %s8536_s18   ;;  %s10757_s22 = sand.u32 1, %s8532_s17  }
  0x1a   : > { %s8670_s24 = scalar_select %p94_p10, %s8532_s17, %s96_s15  }
  0x1b   : > { %p105_p13 = por %p104_p11, %p103_p9  ;;  %s7705_s25 = sshll.u32 %s8536_s18, 12 }
  0x1c   : > { %10770 = sst [smem:[#allocation21_spill]] %s8670_s24  ;;  %s5615_s27 = sshll.u32 %s10757_s22, 12 }
  0x1d   : > { %s10771_s3 = sld [smem:[#allocation24_spill]]  ;;  %s339_s12 = scalar_lea.vmem [#allocation11], %s5615_s27 }
  0x1e   : > { %s347_s13 = sshll.u32 %s339_s12, 4  ;;  %p8681_p0 = pnand %p8258_p12, %p105_p13  ;;  %s348_s13 = int_to_ptr.vmem [resolvable:$true] %s347_s13 }
  0x1f   : > { %s10773_s6 = sld [smem:[#allocation25_spill]]  ;;  %s8688_s2 = scalar_lea.sflag [#allocation7], %s335_s21 }
  0x20   : > { %p8372_p3 = pneg %p8681_p0 }
  0x23   : > { %s344_s30 = scalar_lea.hbm %s10771_s3, %s7705_s25 }
  0x24   : > { %s345_s11 = sshll.u32 %s344_s30, 4  ;;  %s8375_s30 = scalar_lea.hbm %s10771_s3, 40960  ;;  %s346_s11 = int_to_ptr.hbm [resolvable:$true] %s345_s11 }
  0x25   : > { %s316_s22 = sshll.u32 %s10773_s6, 4  ;;  %s8368_s28 = sshra.s32 %s346_s11, 4  ;;  %s8369_s28 = int_to_ptr.hbm [resolvable:$true] %s8368_s28  ;;  %s317_s22 = int_to_ptr.hbm [resolvable:$true] %s316_s22 }
  0x26   : > { %s8370_s25 = scalar_lea.hbm %s8369_s28, 4096  ;;  %p8376_p10 = scmp.lt.s32.totalorder %s8369_s28, %s10771_s3 }
  0x27   : > { %p8371_p2 = scmp.ne.s32.totalorder %s8369_s28, %s8370_s25  ;;  %p8377_p11 = scmp.lt.s32.totalorder %s8375_s30, %s8370_s25 }
  0x29   : > { %p8373_p7 = pnand %p8372_p3, %p8371_p2  ;;  %p8378_p12 = por %p8377_p11, %p8376_p10 }
  0x2b   : > { %p8374_p9 = pneg %p8373_p7 }
  0x2d   : > { %p8379_p13 = pnand %p8378_p12, %p8374_p9 }
  0x2f   : > { %8382 = shalt.err (!%p8379_p13)
}
  0x30   : > { %s8542_s21 = smov 512   ;;  %s8543_s15 = smov 32  }
  0x31   : > { %8251 = dma.hbm_to_vmem [thread:$0]  (!%p8681_p0), %s346_s11, 65536, %s348_s13, %s8688_s2, %s8542_s21, %s8542_s21, %s8543_s15  }
  0x32   : > { %s8544_s27 = smov [#allocation13]   ;;  %s10774_s6 = sand.u32 1, %s8532_s17  }
  0x33   : > { %s318_s29 = sshll.u32 %s8544_s27, 4  ;;  %s5618_s1 = sshll.u32 %s10774_s6, 3  ;;  %s319_s29 = int_to_ptr.vmem [resolvable:$true] %s318_s29 }
  0x34   : > { %8247 = dma.hbm_to_vmem [thread:$0]  (!%p8647_p8), %s317_s22, 16, %s319_s29, [#allocation10]  }
  0x35   : > { %s5619_s28 = sshll.u32 %s8536_s18, 3  ;;  %s361_s25 = scalar_lea.vmem [#allocation12], %s5618_s1 }
  0x36   : > { %s369_s30 = sshll.u32 %s361_s25, 4  ;;  %s365_s24 = scalar_lea.hbm %s10750_s4, %s5619_s28  ;;  %s370_s30 = int_to_ptr.vmem [resolvable:$true] %s369_s30 }
  0x37   : > { %s367_s14 = sshll.u32 %s365_s24, 4  ;;  %s8435_s18 = scalar_lea.hbm %s10750_s4, 80  ;;  %s368_s14 = int_to_ptr.hbm [resolvable:$true] %s367_s14 }
  0x38   : > { %s8428_s11 = sshra.s32 %s368_s14, 4  ;;  %s8429_s11 = int_to_ptr.hbm [resolvable:$true] %s8428_s11 }
  0x39   : > { %s8430_s13 = scalar_lea.hbm %s8429_s11, 8  ;;  %p8436_p8 = scmp.lt.s32.totalorder %s8429_s11, %s10750_s4 }
  0x3a   : > { %p8431_p2 = scmp.ne.s32.totalorder %s8429_s11, %s8430_s13  ;;  %p8437_p10 = scmp.lt.s32.totalorder %s8435_s18, %s8430_s13 }
  0x3c   : > { %p8433_p7 = pnand %p8431_p2, %p8372_p3  ;;  %p8438_p11 = por %p8437_p10, %p8436_p8 }
  0x3e   : > { %p8434_p9 = pneg %p8433_p7 }
  0x40   : > { %p8439_p12 = pnand %p8438_p11, %p8434_p9 }
  0x42   : > { %8442 = shalt.err (!%p8439_p12)
}
  0x43   : > { %8254 = dma.hbm_to_vmem [thread:$0]  (!%p8681_p0), %s368_s14, 128, %s370_s30, %s8688_s2  }
  0x44   : > { %378 = sbr.rel (%p8639_p6) target bundleno = 1679 (0x68f), region = 56 }
  0x49   : > { %8503 = dma.done.wait (%p110_p1), [#allocation7], 5120  }
  0x4a   : > { %8505 = vsyncadd (%p110_p1), [#allocation7], 4294962176 }
  0x4b   : > { %8507 = dma.done.wait (%p110_p1), [#allocation10], 128  }
  0x4c   : > { %8509 = vsyncadd (%p110_p1), [#allocation10], 4294967168  ;;  %s390_s3 = sand.u32 1, %s8623_s8   ;;  %s392_s2 = sand.u32 1, %s8528_s16  }
  0x4d   : > { %s5623_s14 = sshll.u32 %s392_s2, 12  ;;  %s391_s23 = scalar_lea.sflag [#allocation7], %s390_s3 }
  0x4e   : > { %s8736_s24 = scalar_lea.vmem [#allocation11], %s5623_s14 }
  0x4f   : > { %8511 = dma.done.wait (%p8632_p5), %s391_s23, 65664  }
  0x50   : > { %8513 = vsyncadd (%p8632_p5), %s391_s23, 4294901632  ;;  %s5624_s20 = sshll.u32 %s392_s2, 3 }
  0x51   : > { %s8742_s15 = scalar_lea.vmem [#allocation12], %s5624_s20 }
  0x52   : > { %8515 = dma.done.wait (%p110_p1), [#allocation10], 16  }
  0x53   : > { %8517 = vsyncadd (%p110_p1), [#allocation10], 4294967280  ;;  %450 = sbr.rel (%p5611_p4) target bundleno = 248 (0xf8), region = 80 }
  0x58   : > { %v486_v1 = vld [vmem:[#allocation6 + $0x110] sm:$0x3]  ;;  %vm514_vm0 = vcmask 1041408   ;;  %v487_v2 = vld [vmem:[#allocation6 + $0x118] sm:$0x3]  ;;  %v477_v9 = vld [vmem:[#allocation6 + $0xc8] sm:$0xff] }
  0x59   : > { %v478_v3 = vld [vmem:[#allocation6 + $0xd0] sm:$0xff]  ;;  %5631 = vmatpush.msk.msra.mxu2 %vm514_vm0, %v486_v1  ;;  %5633 = vmatpush.msk.msra.mxu3 %vm514_vm0, %v487_v2  ;;  %v479_v4 = vld [vmem:[#allocation6 + $0xd8] sm:$0xff]  ;;  %v485_v7 = vld [vmem:[#allocation6 + $0x108] sm:$0x3]  ;;  %vm510_vm1 = vcmask 277504   ;;  %vm714_vm2 = vcmask 1045508  }
  0x5a   : > { %v470_v5 = vld [vmem:[#allocation6 + $0x90] sm:$0xff]  ;;  %v471_v6 = vld [vmem:[#allocation6 + $0x98] sm:$0xff]  ;;  %v484_v8 = vld [vmem:[#allocation6 + $0x100] sm:$0x3]  ;;  %5629 = vmatpush.msk.msra.mxu1 %vm514_vm0, %v485_v7  ;;  %vm716_vm3 = vcmask 1043456  }
  0x5b   : > { %591 = vmatpush.msra.mxu2 %v478_v3  ;;  %611 = vmatpush.msra.mxu3 %v479_v4  ;;  %v462_v10 = vld [vmem:[#allocation6 + $0x50] sm:$0xff]  ;;  %v463_v11 = vld [vmem:[#allocation6 + $0x58] sm:$0xff]  ;;  %v476_v12 = vld [vmem:[#allocation6 + $0xc0] sm:$0xff] }
  0x5c   : > { %5627 = vmatpush.msk.msra.mxu0 %vm514_vm0, %v484_v8  ;;  %v469_v13 = vld [vmem:[#allocation6 + $0x88] sm:$0xff]  ;;  %571 = vmatpush.msra.mxu1 %v477_v9  ;;  %v454_v14 = vld [vmem:[#allocation6 + $0x10] sm:$0xff]  ;;  %v455_v15 = vld [vmem:[#allocation6 + $0x18] sm:$0xff] }
  0x5d   : > { %592 = vmatpush.msra.mxu2 %v470_v5  ;;  %612 = vmatpush.msra.mxu3 %v471_v6  ;;  %v468_v16 = vld [vmem:[#allocation6 + $0x80] sm:$0xff]  ;;  %v490_v17 = vld [vmem:[#allocation6 + $0x130] sm:$0x3]  ;;  %v491_v18 = vld [vmem:[#allocation6 + $0x138] sm:$0x3] }
  0x5e   : > { %551 = vmatpush.msra.mxu0 %v476_v12  ;;  %572 = vmatpush.msra.mxu1 %v469_v13  ;;  %v451_v19 = vld [vmem:[%s10746_s0] sm:$0x3]  ;;  %v482_v20 = vld [vmem:[#allocation6 + $0xf0] sm:$0xff]  ;;  %v483_v21 = vld [vmem:[#allocation6 + $0xf8] sm:$0xff] }
  0x5f   : > { %593 = vmatpush.msra.mxu2 %v462_v10  ;;  %613 = vmatpush.msra.mxu3 %v463_v11  ;;  %v461_v22 = vld [vmem:[#allocation6 + $0x48] sm:$0xff]  ;;  %v460_v23 = vld [vmem:[#allocation6 + $0x40] sm:$0xff]  ;;  %v474_v24 = vld [vmem:[#allocation6 + $0xb0] sm:$0xff] }
  0x60   : > { %552 = vmatpush.msra.mxu0 %v468_v16  ;;  %v475_v25 = vld [vmem:[#allocation6 + $0xb8] sm:$0xff]  ;;  %v453_v26 = vld [vmem:[#allocation6 + $0x8] sm:$0xff]  ;;  %v452_v27 = vld [vmem:[#allocation6] sm:$0xff]  ;;  %573 = vmatpush.msra.mxu1 %v461_v22 }
  0x61   : > { %594 = vmatpush.msra.mxu2 %v454_v14  ;;  %614 = vmatpush.msra.mxu3 %v455_v15  ;;  %v489_v28 = vld [vmem:[#allocation6 + $0x128] sm:$0x3]  ;;  %v466_v29 = vld [vmem:[#allocation6 + $0x70] sm:$0xff]  ;;  %v467_v30 = vld [vmem:[#allocation6 + $0x78] sm:$0xff] }
  0x62   : > { %5632 = vmatmul.msk.f32.vlgmr.msra.gmra.mxu2 %vm510_vm1, %v451_v19  ;;  %5634 = vmatmul.msk.f32.vlgmr.msra.gmra.mxu3 %vm510_vm1, %v451_v19  ;;  %v488_v31 = vld [vmem:[#allocation6 + $0x120] sm:$0x3]  ;;  %v481_v32 = vld [vmem:[#allocation6 + $0xe8] sm:$0xff]  ;;  %v458_v33 = vld [vmem:[#allocation6 + $0x30] sm:$0xff] }
  0x63   : > { %5639 = vmatpush.msk.msrb.mxu2 %vm514_vm0, %v490_v17  ;;  %5641 = vmatpush.msk.msrb.mxu3 %vm514_vm0, %v491_v18  ;;  %v459_v34 = vld [vmem:[#allocation6 + $0x38] sm:$0xff]  ;;  %v480_v35 = vld [vmem:[#allocation6 + $0xe0] sm:$0xff]  ;;  %v473_v36 = vld [vmem:[#allocation6 + $0xa8] sm:$0xff] }
  0x64   : > { %553 = vmatpush.msra.mxu0 %v460_v23  ;;  %574 = vmatpush.msra.mxu1 %v453_v26  ;;  %v472_v37 = vld [vmem:[#allocation6 + $0xa0] sm:$0xff]  ;;  %v465_v38 = vld [vmem:[#allocation6 + $0x68] sm:$0xff] }
  0x65   : > { %671 = vmatpush.msrb.mxu2 %v482_v20  ;;  %691 = vmatpush.msrb.mxu3 %v483_v21  ;;  %v464_v39 = vld [vmem:[#allocation6 + $0x60] sm:$0xff]  ;;  %v457_v40 = vld [vmem:[#allocation6 + $0x28] sm:$0xff] }
  0x66   : > { %554 = vmatpush.msra.mxu0 %v452_v27  ;;  %5637 = vmatpush.msk.msrb.mxu1 %vm514_vm0, %v489_v28  ;;  %v456_v41 = vld [vmem:[#allocation6 + $0x20] sm:$0xff] }
  0x67   : > { %672 = vmatpush.msrb.mxu2 %v474_v24  ;;  %692 = vmatpush.msrb.mxu3 %v475_v25  ;;  %v492_v42 = vld [vmem:[#allocation9] sm:$0xff] }
  0x68   : > { %5630 = vmatmul.msk.f32.vlgmr.msra.gmra.mxu1 %vm510_vm1, %v451_v19  ;;  %5635 = vmatpush.msk.msrb.mxu0 %vm514_vm0, %v488_v31  ;;  %v495_v43 = vperm.slane %v492_v42, 1  ;;  %v496_v44 = vperm.slane %v492_v42, 2  ;;  %v497_v45 = vperm.slane %v492_v42, 3  ;;  %v494_v48 = vperm.slane %v492_v42, 0 }
  0x69   : > { %673 = vmatpush.msrb.mxu2 %v466_v29  ;;  %693 = vmatpush.msrb.mxu3 %v467_v30  ;;  %v500_v60 = vperm.slane %v492_v42, 6  ;;  %v499_v62 = vperm.slane %v492_v42, 5  ;;  %v501_v63 = vperm.slane %v492_v42, 7  ;;  %v498_v0 = vperm.slane %v492_v42, 4 }
  0x6a   : > { %651 = vmatpush.msrb.mxu1 %v481_v32  ;;  %5628 = vmatmul.msk.f32.vlgmr.msra.gmra.mxu0 %vm510_vm1, %v451_v19 }
  0x6b   : > { %674 = vmatpush.msrb.mxu2 %v458_v33  ;;  %694 = vmatpush.msrb.mxu3 %v459_v34 }
  0x6c   : > { %5640 = vmatmul.msk.f32.vlgmr.msrb.gmra.mxu2 %vm510_vm1, %v451_v19  ;;  %5642 = vmatmul.msk.f32.vlgmr.msrb.gmra.mxu3 %vm510_vm1, %v451_v19 }
  0x6d   : > { %631 = vmatpush.msrb.mxu0 %v480_v35  ;;  %652 = vmatpush.msrb.mxu1 %v473_v36 }
  0x6f   : > { %632 = vmatpush.msrb.mxu0 %v472_v37  ;;  %653 = vmatpush.msrb.mxu1 %v465_v38 }
  0x71   : > { %633 = vmatpush.msrb.mxu0 %v464_v39  ;;  %654 = vmatpush.msrb.mxu1 %v457_v40 }
  0x72   : > { %5638 = vmatmul.msk.f32.vlgmr.msrb.gmra.mxu1 %vm510_vm1, %v451_v19 }
  0x73   : > { %634 = vmatpush.msrb.mxu0 %v456_v41 }
  0x74   : > { %5636 = vmatmul.msk.f32.vlgmr.msrb.gmra.mxu0 %vm510_vm1, %v451_v19 }
  0xe5   : > { %v576_v46 = vpop.f32.mrf.mxu1  ;;  %v596_v47 = vpop.f32.mrf.mxu2 }
  0xe6   : > { %v577_v49 = vadd.f32 %v576_v46, %v495_v43  ;;  %v597_v50 = vadd.f32 %v596_v47, %v496_v44  ;;  %v616_v51 = vpop.f32.mrf.mxu3 }
  0xe7   : > { %v617_v52 = vadd.f32 %v616_v51, %v497_v45  ;;  %v556_v55 = vpop.f32.mrf.mxu0 }
  0xe8   : > { %v707_v53 = vrot.slane %v577_v49, 6  ;;  %v708_v54 = vrot.slane %v597_v50, 4  ;;  %v557_v57 = vadd.f32 %v556_v55, %v494_v48 }
  0xe9   : > { %v709_v56 = vrot.slane %v617_v52, 2 }
  0xea   : > { %v713_v59 = vsel %vm514_vm0, %v557_v57, %v707_v53 }
  0xeb   : > { %v715_v58 = vsel %vm714_vm2, %v708_v54, %v709_v56 }
  0xec   : > { %v717_v61 = vsel %vm716_vm3, %v713_v59, %v715_v58 }
  0xed   : > { %723 = vst [vmem:[#allocation2] sm:$0xff] %v717_v61 }
  0xef   : > { %v676_v1 = vpop.f32.mrf.mxu2  ;;  %v656_v2 = vpop.f32.mrf.mxu1 }
  0xf0   : > { %v677_v3 = vadd.f32 %v676_v1, %v500_v60  ;;  %v696_v4 = vpop.f32.mrf.mxu3  ;;  %v657_v5 = vadd.f32 %v656_v2, %v499_v62 }
  0xf1   : > { %v697_v6 = vadd.f32 %v696_v4, %v501_v63  ;;  %v636_v7 = vpop.f32.mrf.mxu0 }
  0xf2   : > { %v711_v8 = vrot.slane %v677_v3, 4  ;;  %v637_v9 = vadd.f32 %v636_v7, %v498_v0  ;;  %v710_v10 = vrot.slane %v657_v5, 6 }
  0xf3   : > { %v712_v11 = vrot.slane %v697_v6, 2 }
  0xf4   : > { %v718_v13 = vsel %vm514_vm0, %v637_v9, %v710_v10 }
  0xf5   : > { %v719_v12 = vsel %vm714_vm2, %v711_v8, %v712_v11 }
  0xf6   : > { %v720_v14 = vsel %vm716_vm3, %v718_v13, %v719_v12 }
  0xf7   : > { %724 = vst [vmem:[#allocation2 + $0x8] sm:$0xff] %v720_v14 }
  0xf8 PF: > { %p5643_p1 = scmp.ne.s32.totalorder %s8623_s8, 2 }
  0xfa   : > { %728 = sbr.rel (%p5643_p1) target bundleno = 258 (0x102), region = 84 }
  0xff   : > { %v729_v15 = vld [vmem:[#allocation2] sm:$0xff]  ;;  %v730_v16 = vld [vmem:[#allocation2 + $0x8] sm:$0xff] }
 0x100   : > { %731 = vst [vmem:[#allocation4 + $0x8] sm:$0xff] %v729_v15 }
 0x101   : > { %732 = vst [vmem:[#allocation4] sm:$0xff] %v730_v16 }
 0x102 PF: > { %p5644_p4 = scmp.ne.s32.totalorder %s8623_s8, 6 }
 0x104   : > { %736 = sbr.rel (%p5644_p4) target bundleno = 268 (0x10c), region = 88 }
 0x109   : > { %v737_v17 = vld [vmem:[#allocation4 + $0x8] sm:$0xff]  ;;  %v738_v18 = vld [vmem:[#allocation4] sm:$0xff] }
 0x10a   : > { %739 = vst [vmem:[#allocation2] sm:$0xff] %v737_v17 }
 0x10b   : > { %740 = vst [vmem:[#allocation2 + $0x8] sm:$0xff] %v738_v18 }
 0x10c PF: > { %p741_p5 = scmp.lt.s32.totalorder %s8623_s8, 0  ;;  %s742_s29 = ssub.s32 0, %s8623_s8 }
 0x10d   : > { %s5645_s1 = smin.u32 %s8623_s8, %s742_s29 }
 0x10e   : > { %s744_s28 = sand.u32 1, %s5645_s1  }
 0x10f   : > { %s745_s25 = ssub.s32 0, %s744_s28 }
 0x110   : > { %s10781_s25 = smov (!%p741_p5, %s745_s25), %s744_s28 }
 0x111   : > { %p5647_p6 = scmp.lt.s32.totalorder %s10781_s25, 0  ;;  %s751_s30 = sadd.s32 2, %s10781_s25 }
 0x113   : > { %s10783_s30 = smov (!%p5647_p6, %s751_s30), %s10781_s25 }
 0x114   : > { %p5648_p0 = scmp.ne.s32.totalorder %s10783_s30, 0 }
 0x116   : > { %756 = sbr.rel (%p5648_p0) target bundleno = 286 (0x11e), region = 92 }
 0x11b   : > { %v757_v19 = vld [vmem:[#allocation2] sm:$0xff]  ;;  %v758_v20 = vld [vmem:[#allocation2 + $0x8] sm:$0xff] }
 0x11c   : > { %759 = vst [vmem:[#allocation3 + $0x8] sm:$0xff] %v757_v19 }
 0x11d   : > { %760 = vst [vmem:[#allocation3] sm:$0xff] %v758_v20 }
 0x11e PF: > { %v5875_v21 = vld [vmem:[%s8736_s24 + $0x1c0] sm:$0xf] }
 0x11f   : > { %v7766_v22 = vld [vmem:[%s8736_s24 + $0x1dc] sm:$0xf0] }
 0x120   : > { %v6131_v23 = vld [vmem:[%s8736_s24 + $0x3c0] sm:$0xf]  ;;  %v5876_v24 = vor.u32 %v7766_v22, %v5875_v21 }
 0x121   : > { %v7830_v25 = vld [vmem:[%s8736_s24 + $0x3dc] sm:$0xf0] }
 0x122   : > { %v6387_v26 = vld [vmem:[%s8736_s24 + $0x5c0] sm:$0xf]  ;;  %v6132_v28 = vor.u32 %v7830_v25, %v6131_v23  ;;  %3882 = vmatpush.bf16.msra.mxu0 %v5876_v24 }
 0x123   : > { %v7894_v27 = vld [vmem:[%s8736_s24 + $0x5dc] sm:$0xf0] }
 0x124   : > { %v6388_v29 = vor.u32 %v7894_v27, %v6387_v26  ;;  %v6643_v30 = vld [vmem:[%s8736_s24 + $0x7c0] sm:$0xf]  ;;  %3895 = vmatpush.bf16.msra.mxu1 %v6132_v28 }
 0x125   : > { %v7958_v31 = vld [vmem:[%s8736_s24 + $0x7dc] sm:$0xf0] }
 0x126   : > { %v5843_v32 = vld [vmem:[%s8736_s24 + $0x180] sm:$0xf]  ;;  %v6644_v33 = vor.u32 %v7958_v31, %v6643_v30  ;;  %3908 = vmatpush.bf16.msra.mxu2 %v6388_v29 }
 0x127   : > { %v7758_v34 = vld [vmem:[%s8736_s24 + $0x19c] sm:$0xf0] }
 0x128   : > { %v6099_v35 = vld [vmem:[%s8736_s24 + $0x380] sm:$0xf]  ;;  %v5844_v37 = vor.u32 %v7758_v34, %v5843_v32  ;;  %3921 = vmatpush.bf16.msra.mxu3 %v6644_v33 }
 0x129   : > { %v7822_v36 = vld [vmem:[%s8736_s24 + $0x39c] sm:$0xf0] }
 0x12a   : > { %v6100_v38 = vor.u32 %v7822_v36, %v6099_v35  ;;  %v6355_v39 = vld [vmem:[%s8736_s24 + $0x580] sm:$0xf]  ;;  %3883 = vmatpush.bf16.msra.mxu0 %v5844_v37 }
 0x12b   : > { %v7886_v40 = vld [vmem:[%s8736_s24 + $0x59c] sm:$0xf0] }
 0x12c   : > { %v6611_v41 = vld [vmem:[%s8736_s24 + $0x780] sm:$0xf]  ;;  %v6356_v42 = vor.u32 %v7886_v40, %v6355_v39  ;;  %3896 = vmatpush.bf16.msra.mxu1 %v6100_v38 }
 0x12d   : > { %v7950_v43 = vld [vmem:[%s8736_s24 + $0x79c] sm:$0xf0] }
 0x12e   : > { %v5811_v44 = vld [vmem:[%s8736_s24 + $0x140] sm:$0xf]  ;;  %v6612_v46 = vor.u32 %v7950_v43, %v6611_v41  ;;  %3909 = vmatpush.bf16.msra.mxu2 %v6356_v42 }
 0x12f   : > { %v7750_v45 = vld [vmem:[%s8736_s24 + $0x15c] sm:$0xf0] }
 0x130   : > { %v6067_v47 = vld [vmem:[%s8736_s24 + $0x340] sm:$0xf]  ;;  %v5812_v50 = vor.u32 %v7750_v45, %v5811_v44  ;;  %3922 = vmatpush.bf16.msra.mxu3 %v6612_v46 }
 0x131   : > { %v7814_v48 = vld [vmem:[%s8736_s24 + $0x35c] sm:$0xf0] }
 0x132   : > { %v6323_v49 = vld [vmem:[%s8736_s24 + $0x540] sm:$0xf]  ;;  %v6068_v54 = vor.u32 %v7814_v48, %v6067_v47  ;;  %3884 = vmatpush.bf16.msra.mxu0 %v5812_v50 }
 0x133   : > { %v7878_v51 = vld [vmem:[%s8736_s24 + $0x55c] sm:$0xf0] }
 0x134   : > { %v6579_v52 = vld [vmem:[%s8736_s24 + $0x740] sm:$0xf]  ;;  %v6324_v55 = vor.u32 %v7878_v51, %v6323_v49  ;;  %3897 = vmatpush.bf16.msra.mxu1 %v6068_v54 }
 0x135   : > { %v7942_v53 = vld [vmem:[%s8736_s24 + $0x75c] sm:$0xf0] }
 0x136   : > { %v5779_v56 = vld [vmem:[%s8736_s24 + $0x100] sm:$0xf]  ;;  %v6580_v59 = vor.u32 %v7942_v53, %v6579_v52  ;;  %3910 = vmatpush.bf16.msra.mxu2 %v6324_v55 }
 0x137   : > { %v7742_v57 = vld [vmem:[%s8736_s24 + $0x11c] sm:$0xf0] }
 0x138   : > { %v6035_v58 = vld [vmem:[%s8736_s24 + $0x300] sm:$0xf]  ;;  %v5780_v1 = vor.u32 %v7742_v57, %v5779_v56  ;;  %3923 = vmatpush.bf16.msra.mxu3 %v6580_v59 }
 0x139   : > { %v7806_v60 = vld [vmem:[%s8736_s24 + $0x31c] sm:$0xf0] }
 0x13a   : > { %v6291_v61 = vld [vmem:[%s8736_s24 + $0x500] sm:$0xf]  ;;  %v6036_v2 = vor.u32 %v7806_v60, %v6035_v58  ;;  %3885 = vmatpush.bf16.msra.mxu0 %v5780_v1 }
 0x13b   : > { %v7870_v62 = vld [vmem:[%s8736_s24 + $0x51c] sm:$0xf0] }
 0x13c   : > { %v6547_v63 = vld [vmem:[%s8736_s24 + $0x700] sm:$0xf]  ;;  %v6292_v3 = vor.u32 %v7870_v62, %v6291_v61  ;;  %3898 = vmatpush.bf16.msra.mxu1 %v6036_v2 }
 0x13d   : > { %v7934_v0 = vld [vmem:[%s8736_s24 + $0x71c] sm:$0xf0] }
 0x13e   : > { %v5747_v4 = vld [vmem:[%s8736_s24 + $0xc0] sm:$0xf]  ;;  %v6548_v7 = vor.u32 %v7934_v0, %v6547_v63  ;;  %3911 = vmatpush.bf16.msra.mxu2 %v6292_v3 }
 0x13f   : > { %v7734_v5 = vld [vmem:[%s8736_s24 + $0xdc] sm:$0xf0] }
 0x140   : > { %v6003_v6 = vld [vmem:[%s8736_s24 + $0x2c0] sm:$0xf]  ;;  %v5748_v13 = vor.u32 %v7734_v5, %v5747_v4  ;;  %3924 = vmatpush.bf16.msra.mxu3 %v6548_v7 }
 0x141   : > { %v7798_v8 = vld [vmem:[%s8736_s24 + $0x2dc] sm:$0xf0] }
 0x142   : > { %v6259_v9 = vld [vmem:[%s8736_s24 + $0x4c0] sm:$0xf]  ;;  %v6004_v14 = vor.u32 %v7798_v8, %v6003_v6  ;;  %3886 = vmatpush.bf16.msra.mxu0 %v5748_v13 }
 0x143   : > { %v7862_v10 = vld [vmem:[%s8736_s24 + $0x4dc] sm:$0xf0] }
 0x144   : > { %v6515_v11 = vld [vmem:[%s8736_s24 + $0x6c0] sm:$0xf]  ;;  %v6260_v15 = vor.u32 %v7862_v10, %v6259_v9  ;;  %3899 = vmatpush.bf16.msra.mxu1 %v6004_v14 }
 0x145   : > { %v7926_v12 = vld [vmem:[%s8736_s24 + $0x6dc] sm:$0xf0] }
 0x146   : > { %v5715_v16 = vld [vmem:[%s8736_s24 + $0x80] sm:$0xf]  ;;  %v6516_v19 = vor.u32 %v7926_v12, %v6515_v11  ;;  %3912 = vmatpush.bf16.msra.mxu2 %v6260_v15 }
 0x147   : > { %v7726_v17 = vld [vmem:[%s8736_s24 + $0x9c] sm:$0xf0] }
 0x148   : > { %v5971_v18 = vld [vmem:[%s8736_s24 + $0x280] sm:$0xf]  ;;  %v5716_v25 = vor.u32 %v7726_v17, %v5715_v16  ;;  %3925 = vmatpush.bf16.msra.mxu3 %v6516_v19  ;;  %v1274_v16 = vld [vmem:[#allocation2] sm:$0xff] }
 0x149   : > { %v7790_v20 = vld [vmem:[%s8736_s24 + $0x29c] sm:$0xf0]  ;;  %1278 = vst [vmem:[#allocation1] ss:$4 sm:$0xff] %v1274_v16 }
 0x14a   : > { %v6227_v21 = vld [vmem:[%s8736_s24 + $0x480] sm:$0xf]  ;;  %v5972_v26 = vor.u32 %v7790_v20, %v5971_v18  ;;  %3887 = vmatpush.bf16.msra.mxu0 %v5716_v25 }
 0x14b   : > { %v7854_v22 = vld [vmem:[%s8736_s24 + $0x49c] sm:$0xf0] }
 0x14c   : > { %v6483_v23 = vld [vmem:[%s8736_s24 + $0x680] sm:$0xf]  ;;  %v6228_v27 = vor.u32 %v7854_v22, %v6227_v21  ;;  %3900 = vmatpush.bf16.msra.mxu1 %v5972_v26 }
 0x14d   : > { %v7918_v24 = vld [vmem:[%s8736_s24 + $0x69c] sm:$0xf0] }
 0x14e   : > { %v5683_v28 = vld [vmem:[%s8736_s24 + $0x40] sm:$0xf]  ;;  %v6484_v31 = vor.u32 %v7918_v24, %v6483_v23  ;;  %3913 = vmatpush.bf16.msra.mxu2 %v6228_v27 }
 0x14f   : > { %v7718_v29 = vld [vmem:[%s8736_s24 + $0x5c] sm:$0xf0] }
 0x150   : > { %v5939_v30 = vld [vmem:[%s8736_s24 + $0x240] sm:$0xf]  ;;  %v5684_v37 = vor.u32 %v7718_v29, %v5683_v28  ;;  %3926 = vmatpush.bf16.msra.mxu3 %v6484_v31 }
 0x151   : > { %v7782_v32 = vld [vmem:[%s8736_s24 + $0x25c] sm:$0xf0] }
 0x152   : > { %v6195_v33 = vld [vmem:[%s8736_s24 + $0x440] sm:$0xf]  ;;  %v5940_v40 = vor.u32 %v7782_v32, %v5939_v30  ;;  %3888 = vmatpush.bf16.msra.mxu0 %v5684_v37 }
 0x153   : > { %v7846_v34 = vld [vmem:[%s8736_s24 + $0x45c] sm:$0xf0] }
 0x154   : > { %v6451_v35 = vld [vmem:[%s8736_s24 + $0x640] sm:$0xf]  ;;  %v6196_v41 = vor.u32 %v7846_v34, %v6195_v33  ;;  %3901 = vmatpush.bf16.msra.mxu1 %v5940_v40 }
 0x155   : > { %v7910_v36 = vld [vmem:[%s8736_s24 + $0x65c] sm:$0xf0] }
 0x156   : > { %v5651_v38 = vld [vmem:[%s8736_s24] sm:$0xf]  ;;  %v6452_v45 = vor.u32 %v7910_v36, %v6451_v35  ;;  %3914 = vmatpush.bf16.msra.mxu2 %v6196_v41 }
 0x157   : > { %v7710_v39 = vld [vmem:[%s8736_s24 + $0x1c] sm:$0xf0] }
 0x158   : > { %v5907_v42 = vld [vmem:[%s8736_s24 + $0x200] sm:$0xf]  ;;  %v5652_v52 = vor.u32 %v7710_v39, %v5651_v38  ;;  %3927 = vmatpush.bf16.msra.mxu3 %v6452_v45 }
 0x159   : > { %v7774_v43 = vld [vmem:[%s8736_s24 + $0x21c] sm:$0xf0] }
 0x15a   : > { %v6163_v44 = vld [vmem:[%s8736_s24 + $0x400] sm:$0xf]  ;;  %v5908_v56 = vor.u32 %v7774_v43, %v5907_v42  ;;  %3889 = vmatpush.bf16.msra.mxu0 %v5652_v52  ;;  %v1283_v43 = vld.sshfl [vmem:[#allocation1 + $0x10] sm:$0xff pattern:$0x73625140] }
 0x15b   : > { %v7838_v46 = vld [vmem:[%s8736_s24 + $0x41c] sm:$0xf0] }
 0x15c   : > { %v6419_v47 = vld [vmem:[%s8736_s24 + $0x600] sm:$0xf]  ;;  %v6164_v57 = vor.u32 %v7838_v46, %v6163_v44  ;;  %3902 = vmatpush.bf16.msra.mxu1 %v5908_v56  ;;  %v8887_v46 = vpack.c.bf16 %v1283_v43, %v1283_v43 }
 0x15d   : > { %v7902_v48 = vld [vmem:[%s8736_s24 + $0x61c] sm:$0xf0] }
 0x15e   : > { %v6899_v49 = vld [vmem:[%s8736_s24 + $0x9c0] sm:$0xf]  ;;  %v6420_v60 = vor.u32 %v7902_v48, %v6419_v47  ;;  %3915 = vmatpush.bf16.msra.mxu2 %v6164_v57  ;;  %v1284_v48 = vld.sshfl [vmem:[#allocation1 + $0x18] sm:$0xff pattern:$0x73625140] }
 0x15f   : > { %v8022_v50 = vld [vmem:[%s8736_s24 + $0x9dc] sm:$0xf0]  ;;  %v8893_v52 = vpack.c.bf16 %v1284_v48, %v1284_v48 }
 0x160   : > { %v7155_v51 = vld [vmem:[%s8736_s24 + $0xbc0] sm:$0xf]  ;;  %v6900_v61 = vor.u32 %v8022_v50, %v6899_v49  ;;  %3928 = vmatpush.bf16.msra.mxu3 %v6420_v60  ;;  %v1282_v49 = vld.sshfl [vmem:[#allocation1 + $0x8] sm:$0xff pattern:$0x73625140] }
 0x161   : > { %v8086_v53 = vld [vmem:[%s8736_s24 + $0xbdc] sm:$0xf0]  ;;  %3916 = vmatmul.bf16.vlgmr.msra.gmra.mxu2 %v8887_v46 }
 0x162   : > { %v7411_v54 = vld [vmem:[%s8736_s24 + $0xdc0] sm:$0xf]  ;;  %v7156_v62 = vor.u32 %v8086_v53, %v7155_v51  ;;  %3934 = vmatpush.bf16.msrb.mxu0 %v6900_v61  ;;  %v8895_v53 = vpack.c.bf16 %v1282_v49, %v1282_v49  ;;  %v7818_v49 = vld [vmem:[%s8736_s24 + $0x384] sm:$0xf] }
 0x163   : > { %v8150_v55 = vld [vmem:[%s8736_s24 + $0xddc] sm:$0xf0]  ;;  %3929 = vmatmul.bf16.vlgmr.msra.gmra.mxu3 %v8893_v52 }
 0x164   : > { %v7667_v58 = vld [vmem:[%s8736_s24 + $0xfc0] sm:$0xf]  ;;  %v7412_v63 = vor.u32 %v8150_v55, %v7411_v54  ;;  %3947 = vmatpush.bf16.msrb.mxu1 %v7156_v62 }
 0x165   : > { %v8214_v59 = vld [vmem:[%s8736_s24 + $0xfdc] sm:$0xf0]  ;;  %3903 = vmatmul.bf16.vlgmr.msra.gmra.mxu1 %v8895_v53 }
 0x166   : > { %v6867_v0 = vld [vmem:[%s8736_s24 + $0x980] sm:$0xf]  ;;  %v7668_v3 = vor.u32 %v8214_v59, %v7667_v58  ;;  %3960 = vmatpush.bf16.msrb.mxu2 %v7412_v63 }
 0x167   : > { %v8014_v1 = vld [vmem:[%s8736_s24 + $0x99c] sm:$0xf0] }
 0x168   : > { %v7123_v2 = vld [vmem:[%s8736_s24 + $0xb80] sm:$0xf]  ;;  %v6868_v9 = vor.u32 %v8014_v1, %v6867_v0  ;;  %3973 = vmatpush.bf16.msrb.mxu3 %v7668_v3 }
 0x169   : > { %v8078_v4 = vld [vmem:[%s8736_s24 + $0xb9c] sm:$0xf0] }
 0x16a   : > { %v7379_v5 = vld [vmem:[%s8736_s24 + $0xd80] sm:$0xf]  ;;  %v7124_v12 = vor.u32 %v8078_v4, %v7123_v2  ;;  %3935 = vmatpush.bf16.msrb.mxu0 %v6868_v9  ;;  %v1275_v2 = vld [vmem:[#allocation2 + $0x8] sm:$0xff] }
 0x16b   : > { %v8142_v6 = vld [vmem:[%s8736_s24 + $0xd9c] sm:$0xf0]  ;;  %1280 = vst [vmem:[#allocation1 + $0x20] ss:$4 sm:$0xff] %v1275_v2  ;;  %v7746_v2 = vld [vmem:[%s8736_s24 + $0x144] sm:$0xf] }
 0x16c   : > { %v7635_v7 = vld [vmem:[%s8736_s24 + $0xf80] sm:$0xf]  ;;  %v7380_v13 = vor.u32 %v8142_v6, %v7379_v5  ;;  %3948 = vmatpush.bf16.msrb.mxu1 %v7124_v12 }
 0x16d   : > { %v8206_v8 = vld [vmem:[%s8736_s24 + $0xf9c] sm:$0xf0] }
 0x16e   : > { %v6835_v10 = vld [vmem:[%s8736_s24 + $0x940] sm:$0xf]  ;;  %v7636_v17 = vor.u32 %v8206_v8, %v7635_v7  ;;  %3961 = vmatpush.bf16.msrb.mxu2 %v7380_v13 }
 0x16f   : > { %v8006_v11 = vld [vmem:[%s8736_s24 + $0x95c] sm:$0xf0] }
 0x170   : > { %v7091_v14 = vld [vmem:[%s8736_s24 + $0xb40] sm:$0xf]  ;;  %v6836_v22 = vor.u32 %v8006_v11, %v6835_v10  ;;  %3974 = vmatpush.bf16.msrb.mxu3 %v7636_v17 }
 0x171   : > { %v8070_v15 = vld [vmem:[%s8736_s24 + $0xb5c] sm:$0xf0] }
 0x172   : > { %v7347_v18 = vld [vmem:[%s8736_s24 + $0xd40] sm:$0xf]  ;;  %v7092_v24 = vor.u32 %v8070_v15, %v7091_v14  ;;  %3936 = vmatpush.bf16.msrb.mxu0 %v6836_v22 }
 0x173   : > { %v8134_v19 = vld [vmem:[%s8736_s24 + $0xd5c] sm:$0xf0] }
 0x174   : > { %v7603_v20 = vld [vmem:[%s8736_s24 + $0xf40] sm:$0xf]  ;;  %v7348_v25 = vor.u32 %v8134_v19, %v7347_v18  ;;  %3949 = vmatpush.bf16.msrb.mxu1 %v7092_v24 }
 0x175   : > { %v8198_v21 = vld [vmem:[%s8736_s24 + $0xf5c] sm:$0xf0] }
 0x176   : > { %v6803_v23 = vld [vmem:[%s8736_s24 + $0x900] sm:$0xf]  ;;  %v7604_v29 = vor.u32 %v8198_v21, %v7603_v20  ;;  %3962 = vmatpush.bf16.msrb.mxu2 %v7348_v25 }
 0x177   : > { %v7998_v26 = vld [vmem:[%s8736_s24 + $0x91c] sm:$0xf0] }
 0x178   : > { %v7059_v27 = vld [vmem:[%s8736_s24 + $0xb00] sm:$0xf]  ;;  %v6804_v36 = vor.u32 %v7998_v26, %v6803_v23  ;;  %3975 = vmatpush.bf16.msrb.mxu3 %v7604_v29  ;;  %v7826_v29 = vld [vmem:[%s8736_s24 + $0x3c4] sm:$0xf] }
 0x179   : > { %v8062_v28 = vld [vmem:[%s8736_s24 + $0xb1c] sm:$0xf0] }
 0x17a   : > { %v7315_v30 = vld [vmem:[%s8736_s24 + $0xd00] sm:$0xf]  ;;  %v7060_v41 = vor.u32 %v8062_v28, %v7059_v27  ;;  %3937 = vmatpush.bf16.msrb.mxu0 %v6804_v36  ;;  %v7762_v27 = vld [vmem:[%s8736_s24 + $0x1c4] sm:$0xf] }
 0x17b   : > { %v8126_v31 = vld [vmem:[%s8736_s24 + $0xd1c] sm:$0xf0]  ;;  %v5877_v28 = vld [vmem:[%s8736_s24 + $0x1e0] sm:$0xf0] }
 0x17c   : > { %v7571_v32 = vld [vmem:[%s8736_s24 + $0xf00] sm:$0xf]  ;;  %v7316_v42 = vor.u32 %v8126_v31, %v7315_v30  ;;  %3950 = vmatpush.bf16.msrb.mxu1 %v7060_v41  ;;  %v6133_v30 = vld [vmem:[%s8736_s24 + $0x3e0] sm:$0xf0] }
 0x17d   : > { %v8190_v33 = vld [vmem:[%s8736_s24 + $0xf1c] sm:$0xf0]  ;;  %v7890_v31 = vld [vmem:[%s8736_s24 + $0x5c4] sm:$0xf] }
 0x17e   : > { %v6771_v34 = vld [vmem:[%s8736_s24 + $0x8c0] sm:$0xf]  ;;  %v7572_v45 = vor.u32 %v8190_v33, %v7571_v32  ;;  %3963 = vmatpush.bf16.msrb.mxu2 %v7316_v42  ;;  %v6389_v33 = vld [vmem:[%s8736_s24 + $0x5e0] sm:$0xf0]  ;;  %v5880_v42 = vor.u32 %v7762_v27, %v5877_v28 }
 0x17f   : > { %v7990_v35 = vld [vmem:[%s8736_s24 + $0x8dc] sm:$0xf0]  ;;  %v6392_v48 = vor.u32 %v7890_v31, %v6389_v33  ;;  %v5749_v27 = vld [vmem:[%s8736_s24 + $0xe0] sm:$0xf0] }
 0x180   : > { %v7027_v37 = vld [vmem:[%s8736_s24 + $0xac0] sm:$0xf]  ;;  %v6772_v54 = vor.u32 %v7990_v35, %v6771_v34  ;;  %3976 = vmatpush.bf16.msrb.mxu3 %v7572_v45  ;;  %v7954_v34 = vld [vmem:[%s8736_s24 + $0x7c4] sm:$0xf]  ;;  %v6136_v45 = vor.u32 %v7826_v29, %v6133_v30 }
 0x181   : > { %v8054_v38 = vld [vmem:[%s8736_s24 + $0xadc] sm:$0xf0]  ;;  %v6645_v35 = vld [vmem:[%s8736_s24 + $0x7e0] sm:$0xf0] }
 0x182   : > { %v7283_v39 = vld [vmem:[%s8736_s24 + $0xcc0] sm:$0xf]  ;;  %v7028_v55 = vor.u32 %v8054_v38, %v7027_v37  ;;  %3938 = vmatpush.bf16.msrb.mxu0 %v6772_v54  ;;  %v1287_v38 = vld.sshfl [vmem:[#allocation1 + $0x30] sm:$0xff pattern:$0x73625140] }
 0x183   : > { %v8118_v40 = vld [vmem:[%s8736_s24 + $0xcdc] sm:$0xf0]  ;;  %v8936_v54 = vpack.c.bf16 %v1287_v38, %v1287_v38  ;;  %v7794_v28 = vld [vmem:[%s8736_s24 + $0x2c4] sm:$0xf] }
 0x184   : > { %v1281_v44 = vld.sshfl [vmem:[#allocation1] sm:$0xff pattern:$0x73625140]  ;;  %v7284_v56 = vor.u32 %v8118_v40, %v7283_v39  ;;  %3951 = vmatpush.bf16.msrb.mxu1 %v7028_v55 }
 0x185   : > { %v8889_v47 = vpack.c.bf16 %v1281_v44, %v1281_v44  ;;  %v7539_v50 = vld [vmem:[%s8736_s24 + $0xec0] sm:$0xf]  ;;  %v7754_v39 = vld [vmem:[%s8736_s24 + $0x184] sm:$0xf] }
 0x186   : > { %v8182_v51 = vld [vmem:[%s8736_s24 + $0xedc] sm:$0xf0]  ;;  %3964 = vmatpush.bf16.msrb.mxu2 %v7284_v56  ;;  %v5845_v40 = vld [vmem:[%s8736_s24 + $0x1a0] sm:$0xf0] }
 0x187   : > { %v6739_v57 = vld [vmem:[%s8736_s24 + $0x880] sm:$0xf]  ;;  %v7540_v60 = vor.u32 %v8182_v51, %v7539_v50  ;;  %3890 = vmatmul.bf16.vlgmr.msra.gmra.mxu0 %v8889_v47  ;;  %v1288_v44 = vld.sshfl [vmem:[#allocation1 + $0x38] sm:$0xff pattern:$0x73625140]  ;;  %v6648_v51 = vor.u32 %v7954_v34, %v6645_v35 }
 0x188   : > { %v7982_v58 = vld [vmem:[%s8736_s24 + $0x89c] sm:$0xf0]  ;;  %v1286_v50 = vld.sshfl [vmem:[#allocation1 + $0x28] sm:$0xff pattern:$0x73625140] }
 0x189   : > { %v6995_v59 = vld [vmem:[%s8736_s24 + $0xa80] sm:$0xf]  ;;  %v6740_v3 = vor.u32 %v7982_v58, %v6739_v57  ;;  %3977 = vmatpush.bf16.msrb.mxu3 %v7540_v60  ;;  %v6101_v55 = vld [vmem:[%s8736_s24 + $0x3a0] sm:$0xf0] }
 0x18a   : > { %v8046_v61 = vld [vmem:[%s8736_s24 + $0xa9c] sm:$0xf0]  ;;  %v7882_v56 = vld [vmem:[%s8736_s24 + $0x584] sm:$0xf] }
 0x18b   : > { %v7251_v62 = vld [vmem:[%s8736_s24 + $0xc80] sm:$0xf]  ;;  %v6996_v4 = vor.u32 %v8046_v61, %v6995_v59  ;;  %3939 = vmatpush.bf16.msrb.mxu0 %v6740_v3  ;;  %v6357_v57 = vld [vmem:[%s8736_s24 + $0x5a0] sm:$0xf0]  ;;  %v8945_v61 = vpack.c.bf16 %v1288_v44, %v1288_v44 }
 0x18c   : > { %v8110_v63 = vld [vmem:[%s8736_s24 + $0xc9c] sm:$0xf0]  ;;  %v7946_v58 = vld [vmem:[%s8736_s24 + $0x784] sm:$0xf] }
 0x18d   : > { %v7507_v0 = vld [vmem:[%s8736_s24 + $0xe80] sm:$0xf]  ;;  %v7252_v5 = vor.u32 %v8110_v63, %v7251_v62  ;;  %3952 = vmatpush.bf16.msrb.mxu1 %v6996_v4  ;;  %v6613_v59 = vld [vmem:[%s8736_s24 + $0x7a0] sm:$0xf0]  ;;  %v5848_v62 = vor.u32 %v7754_v39, %v5845_v40  ;;  %v8947_v63 = vpack.c.bf16 %v1286_v50, %v1286_v50 }
 0x18e   : > { %v8174_v1 = vld [vmem:[%s8736_s24 + $0xe9c] sm:$0xf0]  ;;  %v5813_v3 = vld [vmem:[%s8736_s24 + $0x160] sm:$0xf0] }
 0x18f   : > { %v6707_v6 = vld [vmem:[%s8736_s24 + $0x840] sm:$0xf]  ;;  %v7508_v9 = vor.u32 %v8174_v1, %v7507_v0  ;;  %3965 = vmatpush.bf16.msrb.mxu2 %v7252_v5  ;;  %v6104_v0 = vor.u32 %v7818_v49, %v6101_v55  ;;  %v6360_v1 = vor.u32 %v7882_v56, %v6357_v57  ;;  %v7810_v4 = vld [vmem:[%s8736_s24 + $0x344] sm:$0xf]  ;;  %v6616_v5 = vor.u32 %v7946_v58, %v6613_v59 }
 0x190   : > { %v7974_v7 = vld [vmem:[%s8736_s24 + $0x85c] sm:$0xf0]  ;;  %v6005_v30 = vld [vmem:[%s8736_s24 + $0x2e0] sm:$0xf0] }
 0x191   : > { %v6963_v8 = vld [vmem:[%s8736_s24 + $0xa40] sm:$0xf]  ;;  %v6708_v16 = vor.u32 %v7974_v7, %v6707_v6  ;;  %3978 = vmatpush.bf16.msrb.mxu3 %v7508_v9  ;;  %v6069_v6 = vld [vmem:[%s8736_s24 + $0x360] sm:$0xf0] }
 0x192   : > { %v8038_v10 = vld [vmem:[%s8736_s24 + $0xa5c] sm:$0xf0]  ;;  %v7874_v7 = vld [vmem:[%s8736_s24 + $0x544] sm:$0xf] }
 0x193   : > { %v7219_v11 = vld [vmem:[%s8736_s24 + $0xc40] sm:$0xf]  ;;  %v6964_v20 = vor.u32 %v8038_v10, %v6963_v8  ;;  %3940 = vmatpush.bf16.msrb.mxu0 %v6708_v16  ;;  %v6325_v8 = vld [vmem:[%s8736_s24 + $0x560] sm:$0xf0] }
 0x194   : > { %v8102_v12 = vld [vmem:[%s8736_s24 + $0xc5c] sm:$0xf0]  ;;  %v7938_v9 = vld [vmem:[%s8736_s24 + $0x744] sm:$0xf] }
 0x195   : > { %v7475_v13 = vld [vmem:[%s8736_s24 + $0xe40] sm:$0xf]  ;;  %v7220_v21 = vor.u32 %v8102_v12, %v7219_v11  ;;  %3953 = vmatpush.bf16.msrb.mxu1 %v6964_v20  ;;  %v6581_v10 = vld [vmem:[%s8736_s24 + $0x760] sm:$0xf0]  ;;  %v5816_v11 = vor.u32 %v7746_v2, %v5813_v3  ;;  %v6072_v12 = vor.u32 %v7810_v4, %v6069_v6 }
 0x196   : > { %v8166_v14 = vld [vmem:[%s8736_s24 + $0xe5c] sm:$0xf0]  ;;  %v7802_v16 = vld [vmem:[%s8736_s24 + $0x304] sm:$0xf] }
 0x197   : > { %v6675_v15 = vld [vmem:[%s8736_s24 + $0x800] sm:$0xf]  ;;  %v7476_v25 = vor.u32 %v8166_v14, %v7475_v13  ;;  %3966 = vmatpush.bf16.msrb.mxu2 %v7220_v21  ;;  %v6328_v13 = vor.u32 %v7874_v7, %v6325_v8  ;;  %v7738_v14 = vld [vmem:[%s8736_s24 + $0x104] sm:$0xf] }
 0x198   : > { %v7966_v17 = vld [vmem:[%s8736_s24 + $0x81c] sm:$0xf0]  ;;  %v6293_v20 = vld [vmem:[%s8736_s24 + $0x520] sm:$0xf0] }
 0x199   : > { %v6931_v18 = vld [vmem:[%s8736_s24 + $0xa00] sm:$0xf]  ;;  %v6676_v32 = vor.u32 %v7966_v17, %v6675_v15  ;;  %3979 = vmatpush.bf16.msrb.mxu3 %v7476_v25  ;;  %v5781_v15 = vld [vmem:[%s8736_s24 + $0x120] sm:$0xf0]  ;;  %v6584_v17 = vor.u32 %v7938_v9, %v6581_v10 }
 0x19a   : > { %v8030_v19 = vld [vmem:[%s8736_s24 + $0xa1c] sm:$0xf0]  ;;  %v7930_v21 = vld [vmem:[%s8736_s24 + $0x704] sm:$0xf] }
 0x19b   : > { %v7187_v22 = vld [vmem:[%s8736_s24 + $0xc00] sm:$0xf]  ;;  %v6932_v36 = vor.u32 %v8030_v19, %v6931_v18  ;;  %3941 = vmatpush.bf16.msrb.mxu0 %v6676_v32  ;;  %v6037_v18 = vld [vmem:[%s8736_s24 + $0x320] sm:$0xf0] }
 0x19c   : > { %v8094_v23 = vld [vmem:[%s8736_s24 + $0xc1c] sm:$0xf0]  ;;  %v7866_v19 = vld [vmem:[%s8736_s24 + $0x504] sm:$0xf] }
 0x19d   : > { %v7443_v24 = vld [vmem:[%s8736_s24 + $0xe00] sm:$0xf]  ;;  %v7188_v37 = vor.u32 %v8094_v23, %v7187_v22  ;;  %3954 = vmatpush.bf16.msrb.mxu1 %v6932_v36  ;;  %v6549_v22 = vld [vmem:[%s8736_s24 + $0x720] sm:$0xf0]  ;;  %v5784_v23 = vor.u32 %v7738_v14, %v5781_v15  ;;  %v6296_v25 = vor.u32 %v7866_v19, %v6293_v20  ;;  %v6008_v36 = vor.u32 %v7794_v28, %v6005_v30 }
 0x19e   : > { %v8158_v26 = vld [vmem:[%s8736_s24 + $0xe1c] sm:$0xf0]  ;;  %v6552_v29 = vor.u32 %v7930_v21, %v6549_v22  ;;  %v7858_v31 = vld [vmem:[%s8736_s24 + $0x4c4] sm:$0xf] }
 0x19f   : > { %v7444_v41 = vor.u32 %v8158_v26, %v7443_v24  ;;  %v1285_v43 = vld.sshfl [vmem:[#allocation1 + $0x20] sm:$0xff pattern:$0x73625140]  ;;  %3967 = vmatpush.bf16.msrb.mxu2 %v7188_v37  ;;  %3986 = vmatpush.bf16.msra.mxu0 %v5880_v42  ;;  %v6040_v24 = vor.u32 %v7802_v16, %v6037_v18 }
 0x1a0   : > { %v8943_v60 = vpack.c.bf16 %v1285_v43, %v1285_v43  ;;  %3955 = vmatmul.bf16.vlgmr.msrb.gmra.mxu1 %v8947_v63  ;;  %v7730_v26 = vld [vmem:[%s8736_s24 + $0xc4] sm:$0xf] }
 0x1a1   : > { %3980 = vmatpush.bf16.msrb.mxu3 %v7444_v41  ;;  %3999 = vmatpush.bf16.msra.mxu1 %v6136_v45  ;;  %v6261_v32 = vld [vmem:[%s8736_s24 + $0x4e0] sm:$0xf0]  ;;  %v5752_v35 = vor.u32 %v7730_v26, %v5749_v27 }
 0x1a2   : > { %3968 = vmatmul.bf16.vlgmr.msrb.gmra.mxu2 %v8936_v54  ;;  %3942 = vmatmul.bf16.vlgmr.msrb.gmra.mxu0 %v8943_v60  ;;  %v7922_v33 = vld [vmem:[%s8736_s24 + $0x6c4] sm:$0xf]  ;;  %v6264_v37 = vor.u32 %v7858_v31, %v6261_v32 }
 0x1a3   : > { %4012 = vmatpush.bf16.msra.mxu2 %v6392_v48  ;;  %3987 = vmatpush.bf16.msra.mxu0 %v5848_v62  ;;  %v6517_v34 = vld [vmem:[%s8736_s24 + $0x6e0] sm:$0xf0] }
 0x1a4   : > { %3981 = vmatmul.bf16.vlgmr.msrb.gmra.mxu3 %v8945_v61  ;;  %v7722_v38 = vld [vmem:[%s8736_s24 + $0x84] sm:$0xf]  ;;  %v6520_v41 = vor.u32 %v7922_v33, %v6517_v34 }
 0x1a5   : > { %4025 = vmatpush.bf16.msra.mxu3 %v6648_v51  ;;  %4000 = vmatpush.bf16.msra.mxu1 %v6104_v0  ;;  %v5717_v39 = vld [vmem:[%s8736_s24 + $0xa0] sm:$0xf0] }
 0x1a6   : > { %v7786_v40 = vld [vmem:[%s8736_s24 + $0x284] sm:$0xf]  ;;  %v5720_v49 = vor.u32 %v7722_v38, %v5717_v39 }
 0x1a7   : > { %4013 = vmatpush.bf16.msra.mxu2 %v6360_v1  ;;  %3988 = vmatpush.bf16.msra.mxu0 %v5816_v11  ;;  %v5973_v42 = vld [vmem:[%s8736_s24 + $0x2a0] sm:$0xf0] }
 0x1a8   : > { %v7850_v43 = vld [vmem:[%s8736_s24 + $0x484] sm:$0xf]  ;;  %v5976_v50 = vor.u32 %v7786_v40, %v5973_v42 }
 0x1a9   : > { %4026 = vmatpush.bf16.msra.mxu3 %v6616_v5  ;;  %4001 = vmatpush.bf16.msra.mxu1 %v6072_v12  ;;  %v6229_v44 = vld [vmem:[%s8736_s24 + $0x4a0] sm:$0xf0] }
 0x1aa   : > { %v7914_v45 = vld [vmem:[%s8736_s24 + $0x684] sm:$0xf]  ;;  %v6232_v51 = vor.u32 %v7850_v43, %v6229_v44 }
 0x1ab   : > { %4014 = vmatpush.bf16.msra.mxu2 %v6328_v13  ;;  %3989 = vmatpush.bf16.msra.mxu0 %v5784_v23  ;;  %v6485_v48 = vld [vmem:[%s8736_s24 + $0x6a0] sm:$0xf0] }
 0x1ac   : > { %v7714_v55 = vld [vmem:[%s8736_s24 + $0x44] sm:$0xf]  ;;  %v6488_v58 = vor.u32 %v7914_v45, %v6485_v48 }
 0x1ad   : > { %4027 = vmatpush.bf16.msra.mxu3 %v6584_v17  ;;  %4002 = vmatpush.bf16.msra.mxu1 %v6040_v24  ;;  %v5685_v56 = vld [vmem:[%s8736_s24 + $0x60] sm:$0xf0] }
 0x1ae   : > { %v7778_v57 = vld [vmem:[%s8736_s24 + $0x244] sm:$0xf]  ;;  %v5688_v3 = vor.u32 %v7714_v55, %v5685_v56 }
 0x1af   : > { %4015 = vmatpush.bf16.msra.mxu2 %v6296_v25  ;;  %3990 = vmatpush.bf16.msra.mxu0 %v5752_v35  ;;  %v5941_v59 = vld [vmem:[%s8736_s24 + $0x260] sm:$0xf0] }
 0x1b0   : > { %v7842_v62 = vld [vmem:[%s8736_s24 + $0x444] sm:$0xf]  ;;  %v5944_v6 = vor.u32 %v7778_v57, %v5941_v59 }
 0x1b1   : > { %4028 = vmatpush.bf16.msra.mxu3 %v6552_v29  ;;  %4003 = vmatpush.bf16.msra.mxu1 %v6008_v36  ;;  %v6197_v0 = vld [vmem:[%s8736_s24 + $0x460] sm:$0xf0] }
 0x1b2   : > { %v7906_v1 = vld [vmem:[%s8736_s24 + $0x644] sm:$0xf]  ;;  %v6200_v7 = vor.u32 %v7842_v62, %v6197_v0 }
 0x1b3   : > { %4016 = vmatpush.bf16.msra.mxu2 %v6264_v37  ;;  %v6453_v2 = vld [vmem:[%s8736_s24 + $0x660] sm:$0xf0]  ;;  %3991 = vmatpush.bf16.msra.mxu0 %v5720_v49 }
 0x1b4   : > { %v7706_v4 = vld [vmem:[%s8736_s24 + $0x4] sm:$0xf]  ;;  %v6456_v11 = vor.u32 %v7906_v1, %v6453_v2 }
 0x1b5   : > { %4029 = vmatpush.bf16.msra.mxu3 %v6520_v41  ;;  %v5653_v5 = vld [vmem:[%s8736_s24 + $0x20] sm:$0xf0]  ;;  %4004 = vmatpush.bf16.msra.mxu1 %v5976_v50 }
 0x1b6   : > { %v7770_v8 = vld [vmem:[%s8736_s24 + $0x204] sm:$0xf]  ;;  %v5656_v18 = vor.u32 %v7706_v4, %v5653_v5 }
 0x1b7   : > { %4017 = vmatpush.bf16.msra.mxu2 %v6232_v51  ;;  %v5909_v9 = vld [vmem:[%s8736_s24 + $0x220] sm:$0xf0]  ;;  %3992 = vmatpush.bf16.msra.mxu0 %v5688_v3 }
 0x1b8   : > { %v7834_v10 = vld [vmem:[%s8736_s24 + $0x404] sm:$0xf]  ;;  %v5912_v22 = vor.u32 %v7770_v8, %v5909_v9 }
 0x1b9   : > { %4030 = vmatpush.bf16.msra.mxu3 %v6488_v58  ;;  %v6165_v12 = vld [vmem:[%s8736_s24 + $0x420] sm:$0xf0]  ;;  %4005 = vmatpush.bf16.msra.mxu1 %v5944_v6 }
 0x1ba   : > { %v7898_v13 = vld [vmem:[%s8736_s24 + $0x604] sm:$0xf]  ;;  %v6168_v23 = vor.u32 %v7834_v10, %v6165_v12 }
 0x1bb   : > { %v6421_v14 = vld [vmem:[%s8736_s24 + $0x620] sm:$0xf0]  ;;  %4018 = vmatpush.bf16.msra.mxu2 %v6200_v7  ;;  %3993 = vmatpush.bf16.msra.mxu0 %v5656_v18 }
 0x1bc   : > { %v8018_v15 = vld [vmem:[%s8736_s24 + $0x9c4] sm:$0xf]  ;;  %v6424_v26 = vor.u32 %v7898_v13, %v6421_v14 }
 0x1bd   : > { %v6901_v16 = vld [vmem:[%s8736_s24 + $0x9e0] sm:$0xf0]  ;;  %4031 = vmatpush.bf16.msra.mxu3 %v6456_v11  ;;  %4006 = vmatpush.bf16.msra.mxu1 %v5912_v22 }
 0x1be   : > { %v8082_v17 = vld [vmem:[%s8736_s24 + $0xbc4] sm:$0xf]  ;;  %v6904_v27 = vor.u32 %v8018_v15, %v6901_v16  ;;  %3994 = vmatmul.bf16.vlgmr.msra.gmra.mxu0 %v8889_v47 }
 0x1bf   : > { %v7157_v19 = vld [vmem:[%s8736_s24 + $0xbe0] sm:$0xf0]  ;;  %4019 = vmatpush.bf16.msra.mxu2 %v6168_v23 }
 0x1c0   : > { %v8146_v20 = vld [vmem:[%s8736_s24 + $0xdc4] sm:$0xf]  ;;  %v7160_v28 = vor.u32 %v8082_v17, %v7157_v19  ;;  %4038 = vmatpush.bf16.msrb.mxu0 %v6904_v27  ;;  %4007 = vmatmul.bf16.vlgmr.msra.gmra.mxu1 %v8895_v53 }
 0x1c1   : > { %v7413_v21 = vld [vmem:[%s8736_s24 + $0xde0] sm:$0xf0]  ;;  %4032 = vmatpush.bf16.msra.mxu3 %v6424_v26 }
 0x1c2   : > { %v8210_v24 = vld [vmem:[%s8736_s24 + $0xfc4] sm:$0xf]  ;;  %v7416_v29 = vor.u32 %v8146_v20, %v7413_v21  ;;  %4051 = vmatpush.bf16.msrb.mxu1 %v7160_v28  ;;  %4020 = vmatmul.bf16.vlgmr.msra.gmra.mxu2 %v8887_v46 }
 0x1c3   : > { %v7669_v25 = vld [vmem:[%s8736_s24 + $0xfe0] sm:$0xf0] }
 0x1c4   : > { %v8010_v30 = vld [vmem:[%s8736_s24 + $0x984] sm:$0xf]  ;;  %v7672_v33 = vor.u32 %v8210_v24, %v7669_v25  ;;  %4064 = vmatpush.bf16.msrb.mxu2 %v7416_v29  ;;  %4033 = vmatmul.bf16.vlgmr.msra.gmra.mxu3 %v8893_v52 }
 0x1c5   : > { %v6869_v31 = vld [vmem:[%s8736_s24 + $0x9a0] sm:$0xf0] }
 0x1c6   : > { %v8074_v32 = vld [vmem:[%s8736_s24 + $0xb84] sm:$0xf]  ;;  %v6872_v39 = vor.u32 %v8010_v30, %v6869_v31  ;;  %4077 = vmatpush.bf16.msrb.mxu3 %v7672_v33 }
 0x1c7   : > { %v7125_v34 = vld [vmem:[%s8736_s24 + $0xba0] sm:$0xf0] }
 0x1c8   : > { %v8138_v35 = vld [vmem:[%s8736_s24 + $0xd84] sm:$0xf]  ;;  %v7128_v40 = vor.u32 %v8074_v32, %v7125_v34  ;;  %4039 = vmatpush.bf16.msrb.mxu0 %v6872_v39 }
 0x1c9   : > { %v7381_v36 = vld [vmem:[%s8736_s24 + $0xda0] sm:$0xf0] }
 0x1ca   : > { %v8202_v37 = vld [vmem:[%s8736_s24 + $0xf84] sm:$0xf]  ;;  %v7384_v41 = vor.u32 %v8138_v35, %v7381_v36  ;;  %4052 = vmatpush.bf16.msrb.mxu1 %v7128_v40 }
 0x1cb   : > { %v7637_v38 = vld [vmem:[%s8736_s24 + $0xfa0] sm:$0xf0] }
 0x1cc   : > { %v8002_v42 = vld [vmem:[%s8736_s24 + $0x944] sm:$0xf]  ;;  %v7640_v45 = vor.u32 %v8202_v37, %v7637_v38  ;;  %4065 = vmatpush.bf16.msrb.mxu2 %v7384_v41 }
 0x1cd   : > { %v6837_v43 = vld [vmem:[%s8736_s24 + $0x960] sm:$0xf0] }
 0x1ce   : > { %v8066_v44 = vld [vmem:[%s8736_s24 + $0xb44] sm:$0xf]  ;;  %v6840_v56 = vor.u32 %v8002_v42, %v6837_v43  ;;  %4078 = vmatpush.bf16.msrb.mxu3 %v7640_v45 }
 0x1cf   : > { %v7093_v48 = vld [vmem:[%s8736_s24 + $0xb60] sm:$0xf0] }
 0x1d0   : > { %v8130_v49 = vld [vmem:[%s8736_s24 + $0xd44] sm:$0xf]  ;;  %v7096_v57 = vor.u32 %v8066_v44, %v7093_v48  ;;  %4040 = vmatpush.bf16.msrb.mxu0 %v6840_v56 }
 0x1d1   : > { %v7349_v50 = vld [vmem:[%s8736_s24 + $0xd60] sm:$0xf0] }
 0x1d2   : > { %v8194_v51 = vld [vmem:[%s8736_s24 + $0xf44] sm:$0xf]  ;;  %v7352_v58 = vor.u32 %v8130_v49, %v7349_v50  ;;  %4053 = vmatpush.bf16.msrb.mxu1 %v7096_v57 }
 0x1d3   : > { %v7605_v55 = vld [vmem:[%s8736_s24 + $0xf60] sm:$0xf0] }
 0x1d4   : > { %v7994_v59 = vld [vmem:[%s8736_s24 + $0x904] sm:$0xf]  ;;  %v7608_v1 = vor.u32 %v8194_v51, %v7605_v55  ;;  %4066 = vmatpush.bf16.msrb.mxu2 %v7352_v58 }
 0x1d5   : > { %v6805_v62 = vld [vmem:[%s8736_s24 + $0x920] sm:$0xf0] }
 0x1d6   : > { %v8058_v0 = vld [vmem:[%s8736_s24 + $0xb04] sm:$0xf]  ;;  %v6808_v7 = vor.u32 %v7994_v59, %v6805_v62  ;;  %4079 = vmatpush.bf16.msrb.mxu3 %v7608_v1  ;;  %v5883_v62 = vld [vmem:[%s8736_s24 + $0x1c8] sm:$0xf] }
 0x1d7   : > { %v7061_v2 = vld [vmem:[%s8736_s24 + $0xb20] sm:$0xf0]  ;;  %v6139_v1 = vld [vmem:[%s8736_s24 + $0x3c8] sm:$0xf] }
 0x1d8   : > { %v8122_v3 = vld [vmem:[%s8736_s24 + $0xd04] sm:$0xf]  ;;  %v7064_v8 = vor.u32 %v8058_v0, %v7061_v2  ;;  %4041 = vmatpush.bf16.msrb.mxu0 %v6808_v7  ;;  %v7767_v0 = vld [vmem:[%s8736_s24 + $0x1e4] sm:$0xf0] }
 0x1d9   : > { %v7317_v4 = vld [vmem:[%s8736_s24 + $0xd20] sm:$0xf0] }
 0x1da   : > { %v8186_v5 = vld [vmem:[%s8736_s24 + $0xf04] sm:$0xf]  ;;  %v7320_v9 = vor.u32 %v8122_v3, %v7317_v4  ;;  %4054 = vmatpush.bf16.msrb.mxu1 %v7064_v8  ;;  %v7831_v3 = vld [vmem:[%s8736_s24 + $0x3e4] sm:$0xf0] }
 0x1db   : > { %v7573_v6 = vld [vmem:[%s8736_s24 + $0xf20] sm:$0xf0]  ;;  %v6395_v4 = vld [vmem:[%s8736_s24 + $0x5c8] sm:$0xf] }
 0x1dc   : > { %v7986_v10 = vld [vmem:[%s8736_s24 + $0x8c4] sm:$0xf]  ;;  %v7576_v13 = vor.u32 %v8186_v5, %v7573_v6  ;;  %4067 = vmatpush.bf16.msrb.mxu2 %v7320_v9  ;;  %v7895_v5 = vld [vmem:[%s8736_s24 + $0x5e4] sm:$0xf0] }
 0x1dd   : > { %v6773_v11 = vld [vmem:[%s8736_s24 + $0x8e0] sm:$0xf0]  ;;  %v6651_v8 = vld [vmem:[%s8736_s24 + $0x7c8] sm:$0xf] }
 0x1de   : > { %v8050_v12 = vld [vmem:[%s8736_s24 + $0xac4] sm:$0xf]  ;;  %v6776_v19 = vor.u32 %v7986_v10, %v6773_v11  ;;  %4080 = vmatpush.bf16.msrb.mxu3 %v7576_v13  ;;  %v7959_v9 = vld [vmem:[%s8736_s24 + $0x7e4] sm:$0xf0]  ;;  %v5884_v11 = vor.u32 %v7767_v0, %v5883_v62  ;;  %v6396_v13 = vor.u32 %v7895_v5, %v6395_v4 }
 0x1df   : > { %v7029_v14 = vld [vmem:[%s8736_s24 + $0xae0] sm:$0xf0]  ;;  %v6267_v62 = vld [vmem:[%s8736_s24 + $0x4c8] sm:$0xf] }
 0x1e0   : > { %v8114_v15 = vld [vmem:[%s8736_s24 + $0xcc4] sm:$0xf]  ;;  %v7032_v20 = vor.u32 %v8050_v12, %v7029_v14  ;;  %4042 = vmatpush.bf16.msrb.mxu0 %v6776_v19  ;;  %v6140_v12 = vor.u32 %v7831_v3, %v6139_v1  ;;  %v5851_v14 = vld [vmem:[%s8736_s24 + $0x188] sm:$0xf] }
 0x1e1   : > { %v7285_v16 = vld [vmem:[%s8736_s24 + $0xce0] sm:$0xf0]  ;;  %v6363_v19 = vld [vmem:[%s8736_s24 + $0x588] sm:$0xf] }
 0x1e2   : > { %v8178_v17 = vld [vmem:[%s8736_s24 + $0xec4] sm:$0xf]  ;;  %v7288_v21 = vor.u32 %v8114_v15, %v7285_v16  ;;  %4055 = vmatpush.bf16.msrb.mxu1 %v7032_v20  ;;  %v7759_v15 = vld [vmem:[%s8736_s24 + $0x1a4] sm:$0xf0] }
 0x1e3   : > { %v7541_v18 = vld [vmem:[%s8736_s24 + $0xee0] sm:$0xf0]  ;;  %v6107_v16 = vld [vmem:[%s8736_s24 + $0x388] sm:$0xf] }
 0x1e4   : > { %v7978_v22 = vld [vmem:[%s8736_s24 + $0x884] sm:$0xf]  ;;  %v7544_v25 = vor.u32 %v8178_v17, %v7541_v18  ;;  %4068 = vmatpush.bf16.msrb.mxu2 %v7288_v21  ;;  %v6652_v17 = vor.u32 %v7959_v9, %v6651_v8  ;;  %v7823_v18 = vld [vmem:[%s8736_s24 + $0x3a4] sm:$0xf0] }
 0x1e5   : > { %v6741_v23 = vld [vmem:[%s8736_s24 + $0x8a0] sm:$0xf0]  ;;  %v7887_v20 = vld [vmem:[%s8736_s24 + $0x5a4] sm:$0xf0] }
 0x1e6   : > { %v8042_v24 = vld [vmem:[%s8736_s24 + $0xa84] sm:$0xf]  ;;  %v6744_v31 = vor.u32 %v7978_v22, %v6741_v23  ;;  %4081 = vmatpush.bf16.msrb.mxu3 %v7544_v25  ;;  %v6619_v21 = vld [vmem:[%s8736_s24 + $0x788] sm:$0xf]  ;;  %v5852_v23 = vor.u32 %v7759_v15, %v5851_v14  ;;  %v6364_v25 = vor.u32 %v7887_v20, %v6363_v19 }
 0x1e7   : > { %v6997_v26 = vld [vmem:[%s8736_s24 + $0xaa0] sm:$0xf0]  ;;  %v7951_v22 = vld [vmem:[%s8736_s24 + $0x7a4] sm:$0xf0] }
 0x1e8   : > { %v8106_v27 = vld [vmem:[%s8736_s24 + $0xc84] sm:$0xf]  ;;  %v7000_v32 = vor.u32 %v8042_v24, %v6997_v26  ;;  %4043 = vmatpush.bf16.msrb.mxu0 %v6744_v31  ;;  %v6108_v24 = vor.u32 %v7823_v18, %v6107_v16  ;;  %v5819_v26 = vld [vmem:[%s8736_s24 + $0x148] sm:$0xf] }
 0x1e9   : > { %v7253_v28 = vld [vmem:[%s8736_s24 + $0xca0] sm:$0xf0]  ;;  %v6331_v31 = vld [vmem:[%s8736_s24 + $0x548] sm:$0xf] }
 0x1ea   : > { %v8170_v29 = vld [vmem:[%s8736_s24 + $0xe84] sm:$0xf]  ;;  %v7256_v33 = vor.u32 %v8106_v27, %v7253_v28  ;;  %4056 = vmatpush.bf16.msrb.mxu1 %v7000_v32  ;;  %v7751_v27 = vld [vmem:[%s8736_s24 + $0x164] sm:$0xf0] }
 0x1eb   : > { %v7509_v30 = vld [vmem:[%s8736_s24 + $0xea0] sm:$0xf0]  ;;  %v6075_v28 = vld [vmem:[%s8736_s24 + $0x348] sm:$0xf] }
 0x1ec   : > { %v7970_v34 = vld [vmem:[%s8736_s24 + $0x844] sm:$0xf]  ;;  %v7512_v37 = vor.u32 %v8170_v29, %v7509_v30  ;;  %4069 = vmatpush.bf16.msrb.mxu2 %v7256_v33  ;;  %v6620_v29 = vor.u32 %v7951_v22, %v6619_v21  ;;  %v7815_v30 = vld [vmem:[%s8736_s24 + $0x364] sm:$0xf0] }
 0x1ed   : > { %v6709_v35 = vld [vmem:[%s8736_s24 + $0x860] sm:$0xf0]  ;;  %v7879_v32 = vld [vmem:[%s8736_s24 + $0x564] sm:$0xf0] }
 0x1ee   : > { %v8034_v36 = vld [vmem:[%s8736_s24 + $0xa44] sm:$0xf]  ;;  %v6712_v43 = vor.u32 %v7970_v34, %v6709_v35  ;;  %4082 = vmatpush.bf16.msrb.mxu3 %v7512_v37  ;;  %v6587_v33 = vld [vmem:[%s8736_s24 + $0x748] sm:$0xf]  ;;  %v5820_v35 = vor.u32 %v7751_v27, %v5819_v26  ;;  %v6332_v37 = vor.u32 %v7879_v32, %v6331_v31 }
 0x1ef   : > { %v6965_v38 = vld [vmem:[%s8736_s24 + $0xa60] sm:$0xf0]  ;;  %v7943_v34 = vld [vmem:[%s8736_s24 + $0x764] sm:$0xf0] }
 0x1f0   : > { %v8098_v39 = vld [vmem:[%s8736_s24 + $0xc44] sm:$0xf]  ;;  %v6968_v48 = vor.u32 %v8034_v36, %v6965_v38  ;;  %4044 = vmatpush.bf16.msrb.mxu0 %v6712_v43  ;;  %v6076_v36 = vor.u32 %v7815_v30, %v6075_v28  ;;  %v5787_v38 = vld [vmem:[%s8736_s24 + $0x108] sm:$0xf] }
 0x1f1   : > { %v7221_v40 = vld [vmem:[%s8736_s24 + $0xc60] sm:$0xf0]  ;;  %v6299_v43 = vld [vmem:[%s8736_s24 + $0x508] sm:$0xf] }
 0x1f2   : > { %v8162_v41 = vld [vmem:[%s8736_s24 + $0xe44] sm:$0xf]  ;;  %v7224_v49 = vor.u32 %v8098_v39, %v7221_v40  ;;  %4057 = vmatpush.bf16.msrb.mxu1 %v6968_v48  ;;  %v7743_v39 = vld [vmem:[%s8736_s24 + $0x124] sm:$0xf0] }
 0x1f3   : > { %v7477_v42 = vld [vmem:[%s8736_s24 + $0xe60] sm:$0xf0]  ;;  %v6043_v40 = vld [vmem:[%s8736_s24 + $0x308] sm:$0xf] }
 0x1f4   : > { %v7962_v44 = vld [vmem:[%s8736_s24 + $0x804] sm:$0xf]  ;;  %v7480_v56 = vor.u32 %v8162_v41, %v7477_v42  ;;  %4070 = vmatpush.bf16.msrb.mxu2 %v7224_v49  ;;  %v6588_v41 = vor.u32 %v7943_v34, %v6587_v33  ;;  %v7807_v42 = vld [vmem:[%s8736_s24 + $0x324] sm:$0xf0]  ;;  %v5788_v49 = vor.u32 %v7743_v39, %v5787_v38 }
 0x1f5   : > { %v6677_v45 = vld [vmem:[%s8736_s24 + $0x820] sm:$0xf0]  ;;  %v7935_v48 = vld [vmem:[%s8736_s24 + $0x724] sm:$0xf0] }
 0x1f6   : > { %v8026_v50 = vld [vmem:[%s8736_s24 + $0xa04] sm:$0xf]  ;;  %v6680_v2 = vor.u32 %v7962_v44, %v6677_v45  ;;  %4083 = vmatpush.bf16.msrb.mxu3 %v7480_v56  ;;  %v7871_v44 = vld [vmem:[%s8736_s24 + $0x524] sm:$0xf0] }
 0x1f7   : > { %v6933_v51 = vld [vmem:[%s8736_s24 + $0xa20] sm:$0xf0]  ;;  %v6555_v45 = vld [vmem:[%s8736_s24 + $0x708] sm:$0xf] }
 0x1f8   : > { %v8090_v55 = vld [vmem:[%s8736_s24 + $0xc04] sm:$0xf]  ;;  %v6936_v6 = vor.u32 %v8026_v50, %v6933_v51  ;;  %4045 = vmatpush.bf16.msrb.mxu0 %v6680_v2  ;;  %v6044_v50 = vor.u32 %v7807_v42, %v6043_v40  ;;  %v6300_v51 = vor.u32 %v7871_v44, %v6299_v43  ;;  %v7735_v56 = vld [vmem:[%s8736_s24 + $0xe4] sm:$0xf0] }
 0x1f9   : > { %v7189_v57 = vld [vmem:[%s8736_s24 + $0xc20] sm:$0xf0]  ;;  %v7863_v0 = vld [vmem:[%s8736_s24 + $0x4e4] sm:$0xf0] }
 0x1fa   : > { %v8154_v58 = vld [vmem:[%s8736_s24 + $0xe04] sm:$0xf]  ;;  %v7192_v7 = vor.u32 %v8090_v55, %v7189_v57  ;;  %4058 = vmatpush.bf16.msrb.mxu1 %v6936_v6  ;;  %v5755_v55 = vld [vmem:[%s8736_s24 + $0xc8] sm:$0xf]  ;;  %v6268_v5 = vor.u32 %v7863_v0, %v6267_v62 }
 0x1fb   : > { %v7445_v59 = vld [vmem:[%s8736_s24 + $0xe20] sm:$0xf0]  ;;  %4046 = vmatmul.bf16.vlgmr.msrb.gmra.mxu0 %v8943_v60  ;;  %v6011_v57 = vld [vmem:[%s8736_s24 + $0x2c8] sm:$0xf]  ;;  %v5756_v3 = vor.u32 %v7735_v56, %v5755_v55 }
 0x1fc   : > { %v7448_v10 = vor.u32 %v8154_v58, %v7445_v59  ;;  %4071 = vmatpush.bf16.msrb.mxu2 %v7192_v7  ;;  %4090 = vmatpush.bf16.msra.mxu0 %v5884_v11  ;;  %v6556_v58 = vor.u32 %v7935_v48, %v6555_v45  ;;  %v7799_v59 = vld [vmem:[%s8736_s24 + $0x2e4] sm:$0xf0] }
 0x1fd   : > { %4059 = vmatmul.bf16.vlgmr.msrb.gmra.mxu1 %v8947_v63  ;;  %v6523_v1 = vld [vmem:[%s8736_s24 + $0x6c8] sm:$0xf]  ;;  %v6012_v4 = vor.u32 %v7799_v59, %v6011_v57 }
 0x1fe   : > { %4084 = vmatpush.bf16.msrb.mxu3 %v7448_v10  ;;  %4103 = vmatpush.bf16.msra.mxu1 %v6140_v12  ;;  %v7927_v2 = vld [vmem:[%s8736_s24 + $0x6e4] sm:$0xf0] }
 0x1ff   : > { %4072 = vmatmul.bf16.vlgmr.msrb.gmra.mxu2 %v8936_v54  ;;  %v5723_v6 = vld [vmem:[%s8736_s24 + $0x88] sm:$0xf]  ;;  %v6524_v9 = vor.u32 %v7927_v2, %v6523_v1 }
 0x200   : > { %4116 = vmatpush.bf16.msra.mxu2 %v6396_v13  ;;  %4091 = vmatpush.bf16.msra.mxu0 %v5852_v23  ;;  %v7727_v7 = vld [vmem:[%s8736_s24 + $0xa4] sm:$0xf0] }
 0x201   : > { %4085 = vmatmul.bf16.vlgmr.msrb.gmra.mxu3 %v8945_v61  ;;  %v5979_v8 = vld [vmem:[%s8736_s24 + $0x288] sm:$0xf]  ;;  %v5724_v15 = vor.u32 %v7727_v7, %v5723_v6 }
 0x202   : > { %4129 = vmatpush.bf16.msra.mxu3 %v6652_v17  ;;  %4104 = vmatpush.bf16.msra.mxu1 %v6108_v24  ;;  %v7791_v10 = vld [vmem:[%s8736_s24 + $0x2a4] sm:$0xf0] }
 0x203   : > { %v6235_v11 = vld [vmem:[%s8736_s24 + $0x488] sm:$0xf]  ;;  %v5980_v16 = vor.u32 %v7791_v10, %v5979_v8 }
 0x204   : > { %4117 = vmatpush.bf16.msra.mxu2 %v6364_v25  ;;  %4092 = vmatpush.bf16.msra.mxu0 %v5820_v35  ;;  %v7855_v12 = vld [vmem:[%s8736_s24 + $0x4a4] sm:$0xf0] }
 0x205   : > { %v6491_v13 = vld [vmem:[%s8736_s24 + $0x688] sm:$0xf]  ;;  %v6236_v17 = vor.u32 %v7855_v12, %v6235_v11 }
 0x206   : > { %4130 = vmatpush.bf16.msra.mxu3 %v6620_v29  ;;  %4105 = vmatpush.bf16.msra.mxu1 %v6076_v36  ;;  %v7919_v14 = vld [vmem:[%s8736_s24 + $0x6a4] sm:$0xf0] }
 0x207   : > { %v5691_v18 = vld [vmem:[%s8736_s24 + $0x48] sm:$0xf]  ;;  %v6492_v21 = vor.u32 %v7919_v14, %v6491_v13 }
 0x208   : > { %4118 = vmatpush.bf16.msra.mxu2 %v6332_v37  ;;  %4093 = vmatpush.bf16.msra.mxu0 %v5788_v49  ;;  %v7719_v19 = vld [vmem:[%s8736_s24 + $0x64] sm:$0xf0] }
 0x209   : > { %v5947_v20 = vld [vmem:[%s8736_s24 + $0x248] sm:$0xf]  ;;  %v5692_v27 = vor.u32 %v7719_v19, %v5691_v18 }
 0x20a   : > { %4131 = vmatpush.bf16.msra.mxu3 %v6588_v41  ;;  %4106 = vmatpush.bf16.msra.mxu1 %v6044_v50  ;;  %v7783_v22 = vld [vmem:[%s8736_s24 + $0x264] sm:$0xf0] }
 0x20b   : > { %v6203_v23 = vld [vmem:[%s8736_s24 + $0x448] sm:$0xf]  ;;  %v5948_v30 = vor.u32 %v7783_v22, %v5947_v20 }
 0x20c   : > { %4119 = vmatpush.bf16.msra.mxu2 %v6300_v51  ;;  %4094 = vmatpush.bf16.msra.mxu0 %v5756_v3  ;;  %v7847_v24 = vld [vmem:[%s8736_s24 + $0x464] sm:$0xf0] }
 0x20d   : > { %v6459_v25 = vld [vmem:[%s8736_s24 + $0x648] sm:$0xf]  ;;  %v6204_v31 = vor.u32 %v7847_v24, %v6203_v23 }
 0x20e   : > { %4132 = vmatpush.bf16.msra.mxu3 %v6556_v58  ;;  %4107 = vmatpush.bf16.msra.mxu1 %v6012_v4  ;;  %v7911_v26 = vld [vmem:[%s8736_s24 + $0x664] sm:$0xf0] }
 0x20f   : > { %v5659_v28 = vld [vmem:[%s8736_s24 + $0x8] sm:$0xf]  ;;  %v6460_v35 = vor.u32 %v7911_v26, %v6459_v25 }
 0x210   : > { %4120 = vmatpush.bf16.msra.mxu2 %v6268_v5  ;;  %4095 = vmatpush.bf16.msra.mxu0 %v5724_v15  ;;  %v7711_v29 = vld [vmem:[%s8736_s24 + $0x24] sm:$0xf0] }
 0x211   : > { %v5915_v32 = vld [vmem:[%s8736_s24 + $0x208] sm:$0xf]  ;;  %v5660_v42 = vor.u32 %v7711_v29, %v5659_v28 }
 0x212   : > { %4133 = vmatpush.bf16.msra.mxu3 %v6524_v9  ;;  %4108 = vmatpush.bf16.msra.mxu1 %v5980_v16  ;;  %v7775_v33 = vld [vmem:[%s8736_s24 + $0x224] sm:$0xf0] }
 0x213   : > { %v6171_v34 = vld [vmem:[%s8736_s24 + $0x408] sm:$0xf]  ;;  %v5916_v48 = vor.u32 %v7775_v33, %v5915_v32 }
 0x214   : > { %4121 = vmatpush.bf16.msra.mxu2 %v6236_v17  ;;  %v7839_v36 = vld [vmem:[%s8736_s24 + $0x424] sm:$0xf0]  ;;  %4096 = vmatpush.bf16.msra.mxu0 %v5692_v27 }
 0x215   : > { %v6427_v37 = vld [vmem:[%s8736_s24 + $0x608] sm:$0xf]  ;;  %v6172_v49 = vor.u32 %v7839_v36, %v6171_v34 }
 0x216   : > { %4134 = vmatpush.bf16.msra.mxu3 %v6492_v21  ;;  %v7903_v38 = vld [vmem:[%s8736_s24 + $0x624] sm:$0xf0]  ;;  %4109 = vmatpush.bf16.msra.mxu1 %v5948_v30 }
 0x217   : > { %v6907_v39 = vld [vmem:[%s8736_s24 + $0x9c8] sm:$0xf]  ;;  %v6428_v55 = vor.u32 %v7903_v38, %v6427_v37 }
 0x218   : > { %v8023_v40 = vld [vmem:[%s8736_s24 + $0x9e4] sm:$0xf0]  ;;  %4122 = vmatpush.bf16.msra.mxu2 %v6204_v31  ;;  %4097 = vmatpush.bf16.msra.mxu0 %v5660_v42 }
 0x219   : > { %v7163_v41 = vld [vmem:[%s8736_s24 + $0xbc8] sm:$0xf]  ;;  %v6908_v56 = vor.u32 %v8023_v40, %v6907_v39 }
 0x21a   : > { %v8087_v43 = vld [vmem:[%s8736_s24 + $0xbe4] sm:$0xf0]  ;;  %4135 = vmatpush.bf16.msra.mxu3 %v6460_v35  ;;  %4110 = vmatpush.bf16.msra.mxu1 %v5916_v48 }
 0x21b   : > { %v7419_v44 = vld [vmem:[%s8736_s24 + $0xdc8] sm:$0xf]  ;;  %v7164_v57 = vor.u32 %v8087_v43, %v7163_v41  ;;  %4098 = vmatmul.bf16.vlgmr.msra.gmra.mxu0 %v8889_v47 }
 0x21c   : > { %v8151_v45 = vld [vmem:[%s8736_s24 + $0xde4] sm:$0xf0]  ;;  %4123 = vmatpush.bf16.msra.mxu2 %v6172_v49  ;;  %4142 = vmatpush.bf16.msrb.mxu0 %v6908_v56 }
 0x21d   : > { %v7675_v50 = vld [vmem:[%s8736_s24 + $0xfc8] sm:$0xf]  ;;  %v7420_v58 = vor.u32 %v8151_v45, %v7419_v44  ;;  %4111 = vmatmul.bf16.vlgmr.msra.gmra.mxu1 %v8895_v53 }
 0x21e   : > { %v8215_v51 = vld [vmem:[%s8736_s24 + $0xfe4] sm:$0xf0]  ;;  %4136 = vmatpush.bf16.msra.mxu3 %v6428_v55  ;;  %4155 = vmatpush.bf16.msrb.mxu1 %v7164_v57 }
 0x21f   : > { %v6875_v59 = vld [vmem:[%s8736_s24 + $0x988] sm:$0xf]  ;;  %v7676_v1 = vor.u32 %v8215_v51, %v7675_v50  ;;  %4124 = vmatmul.bf16.vlgmr.msra.gmra.mxu2 %v8887_v46 }
 0x220   : > { %v8015_v62 = vld [vmem:[%s8736_s24 + $0x9a4] sm:$0xf0]  ;;  %4168 = vmatpush.bf16.msrb.mxu2 %v7420_v58 }
 0x221   : > { %v7131_v0 = vld [vmem:[%s8736_s24 + $0xb88] sm:$0xf]  ;;  %v6876_v7 = vor.u32 %v8015_v62, %v6875_v59  ;;  %4137 = vmatmul.bf16.vlgmr.msra.gmra.mxu3 %v8893_v52 }
 0x222   : > { %v8079_v2 = vld [vmem:[%s8736_s24 + $0xba4] sm:$0xf0]  ;;  %4181 = vmatpush.bf16.msrb.mxu3 %v7676_v1 }
 0x223   : > { %v7387_v3 = vld [vmem:[%s8736_s24 + $0xd88] sm:$0xf]  ;;  %v7132_v8 = vor.u32 %v8079_v2, %v7131_v0  ;;  %4143 = vmatpush.bf16.msrb.mxu0 %v6876_v7 }
 0x224   : > { %v8143_v4 = vld [vmem:[%s8736_s24 + $0xda4] sm:$0xf0] }
 0x225   : > { %v7643_v5 = vld [vmem:[%s8736_s24 + $0xf88] sm:$0xf]  ;;  %v7388_v9 = vor.u32 %v8143_v4, %v7387_v3  ;;  %4156 = vmatpush.bf16.msrb.mxu1 %v7132_v8 }
 0x226   : > { %v8207_v6 = vld [vmem:[%s8736_s24 + $0xfa4] sm:$0xf0] }
 0x227   : > { %v6843_v10 = vld [vmem:[%s8736_s24 + $0x948] sm:$0xf]  ;;  %v7644_v13 = vor.u32 %v8207_v6, %v7643_v5  ;;  %4169 = vmatpush.bf16.msrb.mxu2 %v7388_v9 }
 0x228   : > { %v8007_v11 = vld [vmem:[%s8736_s24 + $0x964] sm:$0xf0] }
 0x229   : > { %v7099_v12 = vld [vmem:[%s8736_s24 + $0xb48] sm:$0xf]  ;;  %v6844_v19 = vor.u32 %v8007_v11, %v6843_v10  ;;  %4182 = vmatpush.bf16.msrb.mxu3 %v7644_v13  ;;  %v3891_v13 = vpop.f32.mrf.mxu0 }
 0x22a   : > { %v8071_v14 = vld [vmem:[%s8736_s24 + $0xb64] sm:$0xf0] }
 0x22b   : > { %v7355_v15 = vld [vmem:[%s8736_s24 + $0xd48] sm:$0xf]  ;;  %v7100_v20 = vor.u32 %v8071_v14, %v7099_v12  ;;  %4144 = vmatpush.bf16.msrb.mxu0 %v6844_v19 }
 0x22c   : > { %v8135_v16 = vld [vmem:[%s8736_s24 + $0xd64] sm:$0xf0] }
 0x22d   : > { %v7611_v17 = vld [vmem:[%s8736_s24 + $0xf48] sm:$0xf]  ;;  %v7356_v21 = vor.u32 %v8135_v16, %v7355_v15  ;;  %4157 = vmatpush.bf16.msrb.mxu1 %v7100_v20 }
 0x22e   : > { %v8199_v18 = vld [vmem:[%s8736_s24 + $0xf64] sm:$0xf0] }
 0x22f   : > { %v6811_v22 = vld [vmem:[%s8736_s24 + $0x908] sm:$0xf]  ;;  %v7612_v25 = vor.u32 %v8199_v18, %v7611_v17  ;;  %4170 = vmatpush.bf16.msrb.mxu2 %v7356_v21  ;;  %v3904_v18 = vpop.f32.mrf.mxu1 }
 0x230   : > { %v7999_v23 = vld [vmem:[%s8736_s24 + $0x924] sm:$0xf0] }
 0x231   : > { %v7067_v24 = vld [vmem:[%s8736_s24 + $0xb08] sm:$0xf]  ;;  %v6812_v31 = vor.u32 %v7999_v23, %v6811_v22  ;;  %4183 = vmatpush.bf16.msrb.mxu3 %v7612_v25 }
 0x232   : > { %v8063_v26 = vld [vmem:[%s8736_s24 + $0xb24] sm:$0xf0] }
 0x233   : > { %v7323_v27 = vld [vmem:[%s8736_s24 + $0xd08] sm:$0xf]  ;;  %v7068_v32 = vor.u32 %v8063_v26, %v7067_v24  ;;  %4145 = vmatpush.bf16.msrb.mxu0 %v6812_v31  ;;  %v7827_v31 = vld [vmem:[%s8736_s24 + $0x3cc] sm:$0xf] }
 0x234   : > { %v8127_v28 = vld [vmem:[%s8736_s24 + $0xd24] sm:$0xf0] }
 0x235   : > { %v7579_v29 = vld [vmem:[%s8736_s24 + $0xf08] sm:$0xf]  ;;  %v7324_v33 = vor.u32 %v8127_v28, %v7323_v27  ;;  %4158 = vmatpush.bf16.msrb.mxu1 %v7068_v32  ;;  %v3917_v32 = vpop.f32.mrf.mxu2 }
 0x236   : > { %v8191_v30 = vld [vmem:[%s8736_s24 + $0xf24] sm:$0xf0] }
 0x237   : > { %v6779_v34 = vld [vmem:[%s8736_s24 + $0x8c8] sm:$0xf]  ;;  %v7580_v37 = vor.u32 %v8191_v30, %v7579_v29  ;;  %4171 = vmatpush.bf16.msrb.mxu2 %v7324_v33  ;;  %v7763_v29 = vld [vmem:[%s8736_s24 + $0x1cc] sm:$0xf] }
 0x238   : > { %v7991_v35 = vld [vmem:[%s8736_s24 + $0x8e4] sm:$0xf0]  ;;  %v5885_v30 = vld [vmem:[%s8736_s24 + $0x1e8] sm:$0xf0] }
 0x239   : > { %v7035_v36 = vld [vmem:[%s8736_s24 + $0xac8] sm:$0xf]  ;;  %v6780_v43 = vor.u32 %v7991_v35, %v6779_v34  ;;  %4184 = vmatpush.bf16.msrb.mxu3 %v7580_v37  ;;  %v6141_v34 = vld [vmem:[%s8736_s24 + $0x3e8] sm:$0xf0] }
 0x23a   : > { %v8055_v38 = vld [vmem:[%s8736_s24 + $0xae4] sm:$0xf0]  ;;  %v7891_v35 = vld [vmem:[%s8736_s24 + $0x5cc] sm:$0xf] }
 0x23b   : > { %v7291_v39 = vld [vmem:[%s8736_s24 + $0xcc8] sm:$0xf]  ;;  %v7036_v45 = vor.u32 %v8055_v38, %v7035_v36  ;;  %4146 = vmatpush.bf16.msrb.mxu0 %v6780_v43  ;;  %v6397_v36 = vld [vmem:[%s8736_s24 + $0x5e8] sm:$0xf0]  ;;  %v5888_v43 = vor.u32 %v7763_v29, %v5885_v30 }
 0x23c   : > { %v8119_v40 = vld [vmem:[%s8736_s24 + $0xce4] sm:$0xf0]  ;;  %v6557_v29 = vld [vmem:[%s8736_s24 + $0x728] sm:$0xf0] }
 0x23d   : > { %v7547_v41 = vld [vmem:[%s8736_s24 + $0xec8] sm:$0xf]  ;;  %v7292_v48 = vor.u32 %v8119_v40, %v7291_v39  ;;  %4159 = vmatpush.bf16.msrb.mxu1 %v7036_v45  ;;  %v7955_v40 = vld [vmem:[%s8736_s24 + $0x7cc] sm:$0xf]  ;;  %v6144_v45 = vor.u32 %v7827_v31, %v6141_v34 }
 0x23e   : > { %v8183_v42 = vld [vmem:[%s8736_s24 + $0xee4] sm:$0xf0] }
 0x23f   : > { %v6747_v44 = vld [vmem:[%s8736_s24 + $0x888] sm:$0xf]  ;;  %v7548_v55 = vor.u32 %v8183_v42, %v7547_v41  ;;  %4172 = vmatpush.bf16.msrb.mxu2 %v7292_v48  ;;  %v6653_v41 = vld [vmem:[%s8736_s24 + $0x7e8] sm:$0xf0]  ;;  %v6400_v48 = vor.u32 %v7891_v35, %v6397_v36 }
 0x240   : > { %v7983_v49 = vld [vmem:[%s8736_s24 + $0x8a4] sm:$0xf0]  ;;  %v7731_v35 = vld [vmem:[%s8736_s24 + $0xcc] sm:$0xf] }
 0x241   : > { %v7003_v50 = vld [vmem:[%s8736_s24 + $0xa88] sm:$0xf]  ;;  %v6748_v0 = vor.u32 %v7983_v49, %v6747_v44  ;;  %4185 = vmatpush.bf16.msrb.mxu3 %v7548_v55  ;;  %v3930_v44 = vpop.f32.mrf.mxu3  ;;  %v7755_v49 = vld [vmem:[%s8736_s24 + $0x18c] sm:$0xf] }
 0x242   : > { %v9185_v51 = vld [vmem:[%s8742_s15] sm:$0xff] }
 0x243   : > { %v8047_v56 = vld [vmem:[%s8736_s24 + $0xaa4] sm:$0xf0]  ;;  %v1306_v1 = vperm.slane %v9185_v51, 0  ;;  %4147 = vmatpush.bf16.msrb.mxu0 %v6748_v0  ;;  %v7819_v55 = vld [vmem:[%s8736_s24 + $0x38c] sm:$0xf] }
 0x244   : > { %v7259_v57 = vld [vmem:[%s8736_s24 + $0xc88] sm:$0xf]  ;;  %v7004_v2 = vor.u32 %v8047_v56, %v7003_v50  ;;  %v5853_v50 = vld [vmem:[%s8736_s24 + $0x1a8] sm:$0xf0] }
 0x245   : > { %v8111_v58 = vld [vmem:[%s8736_s24 + $0xca4] sm:$0xf0]  ;;  %v3892_v15 = vadd.f32 %v3891_v13, %v1306_v1  ;;  %v6365_v0 = vld [vmem:[%s8736_s24 + $0x5a8] sm:$0xf0]  ;;  %v3906_v1 = vpop.f32.mrf.mxu1 }
 0x246   : > { %v7515_v59 = vld [vmem:[%s8736_s24 + $0xe88] sm:$0xf]  ;;  %v7260_v3 = vor.u32 %v8111_v58, %v7259_v57  ;;  %4160 = vmatpush.bf16.msrb.mxu1 %v7004_v2  ;;  %v3893_v57 = vpop.f32.mrf.mxu0  ;;  %v6656_v58 = vor.u32 %v7955_v40, %v6653_v41  ;;  %v7947_v2 = vld [vmem:[%s8736_s24 + $0x78c] sm:$0xf] }
 0x247   : > { %v8175_v62 = vld [vmem:[%s8736_s24 + $0xea4] sm:$0xf0]  ;;  %v3905_v28 = vadd.f32 %v3904_v18, %v3892_v15  ;;  %v7875_v13 = vld [vmem:[%s8736_s24 + $0x54c] sm:$0xf] }
 0x248   : > { %v6715_v4 = vld [vmem:[%s8736_s24 + $0x848] sm:$0xf]  ;;  %v7516_v7 = vor.u32 %v8175_v62, %v7515_v59  ;;  %4173 = vmatpush.bf16.msrb.mxu2 %v7260_v3  ;;  %v6109_v59 = vld [vmem:[%s8736_s24 + $0x3a8] sm:$0xf0] }
 0x249   : > { %v7975_v5 = vld [vmem:[%s8736_s24 + $0x864] sm:$0xf0]  ;;  %v3918_v37 = vadd.f32 %v3917_v32, %v3905_v28  ;;  %v7883_v62 = vld [vmem:[%s8736_s24 + $0x58c] sm:$0xf]  ;;  %v3932_v18 = vpop.f32.mrf.mxu3 }
 0x24a   : > { %v6971_v6 = vld [vmem:[%s8736_s24 + $0xa48] sm:$0xf]  ;;  %v6716_v14 = vor.u32 %v7975_v5, %v6715_v4  ;;  %4186 = vmatpush.bf16.msrb.mxu3 %v7516_v7  ;;  %v6621_v3 = vld [vmem:[%s8736_s24 + $0x7a8] sm:$0xf0]  ;;  %v5856_v4 = vor.u32 %v7755_v49, %v5853_v50  ;;  %v6112_v5 = vor.u32 %v7819_v55, %v6109_v59 }
 0x24b   : > { %v8039_v8 = vld [vmem:[%s8736_s24 + $0xa64] sm:$0xf0]  ;;  %v3931_v56 = vadd.f32 %v3930_v44, %v3918_v37  ;;  %v7747_v7 = vld [vmem:[%s8736_s24 + $0x14c] sm:$0xf] }
 0x24c   : > { %v7227_v9 = vld [vmem:[%s8736_s24 + $0xc48] sm:$0xf]  ;;  %v6972_v19 = vor.u32 %v8039_v8, %v6971_v6  ;;  %4148 = vmatpush.bf16.msrb.mxu0 %v6716_v14  ;;  %v6368_v6 = vor.u32 %v7883_v62, %v6365_v0  ;;  %v5821_v8 = vld [vmem:[%s8736_s24 + $0x168] sm:$0xf0] }
 0x24d   : > { %v8103_v10 = vld [vmem:[%s8736_s24 + $0xc64] sm:$0xf0]  ;;  %v6333_v14 = vld [vmem:[%s8736_s24 + $0x568] sm:$0xf0] }
 0x24e   : > { %v7483_v11 = vld [vmem:[%s8736_s24 + $0xe48] sm:$0xf]  ;;  %v7228_v20 = vor.u32 %v8103_v10, %v7227_v9  ;;  %4161 = vmatpush.bf16.msrb.mxu1 %v6972_v19  ;;  %v7811_v9 = vld [vmem:[%s8736_s24 + $0x34c] sm:$0xf]  ;;  %v3919_v10 = vpop.f32.mrf.mxu2  ;;  %v3943_v31 = vpop.f32.mrf.mxu0 }
 0x24f   : > { %v8167_v12 = vld [vmem:[%s8736_s24 + $0xe64] sm:$0xf0]  ;;  %v7939_v15 = vld [vmem:[%s8736_s24 + $0x74c] sm:$0xf]  ;;  %v3944_v34 = vadd.f32 %v3943_v31, %v3931_v56 }
 0x250   : > { %v6683_v16 = vld [vmem:[%s8736_s24 + $0x808] sm:$0xf]  ;;  %v7484_v24 = vor.u32 %v8167_v12, %v7483_v11  ;;  %4174 = vmatpush.bf16.msrb.mxu2 %v7228_v20  ;;  %v6624_v11 = vor.u32 %v7947_v2, %v6621_v3  ;;  %v6077_v12 = vld [vmem:[%s8736_s24 + $0x368] sm:$0xf0]  ;;  %v6336_v20 = vor.u32 %v7875_v13, %v6333_v14 }
 0x251   : > { %v7967_v17 = vld [vmem:[%s8736_s24 + $0x824] sm:$0xf0]  ;;  %v6080_v19 = vor.u32 %v7811_v9, %v6077_v12  ;;  %v7931_v28 = vld [vmem:[%s8736_s24 + $0x70c] sm:$0xf]  ;;  %v3982_v3 = vpop.f32.mrf.mxu3 }
 0x252   : > { %v6939_v21 = vld [vmem:[%s8736_s24 + $0xa08] sm:$0xf]  ;;  %v6684_v33 = vor.u32 %v7967_v17, %v6683_v16  ;;  %4187 = vmatpush.bf16.msrb.mxu3 %v7484_v24  ;;  %v6589_v16 = vld [vmem:[%s8736_s24 + $0x768] sm:$0xf0]  ;;  %v5824_v17 = vor.u32 %v7747_v7, %v5821_v8 }
 0x253   : > { %v8031_v22 = vld [vmem:[%s8736_s24 + $0xa24] sm:$0xf0]  ;;  %v6592_v24 = vor.u32 %v7939_v15, %v6589_v16  ;;  %v5757_v36 = vld [vmem:[%s8736_s24 + $0xe8] sm:$0xf0] }
 0x254   : > { %v7195_v23 = vld [vmem:[%s8736_s24 + $0xc08] sm:$0xf]  ;;  %v6940_v38 = vor.u32 %v8031_v22, %v6939_v21  ;;  %4149 = vmatpush.bf16.msrb.mxu0 %v6684_v33  ;;  %v7739_v21 = vld [vmem:[%s8736_s24 + $0x10c] sm:$0xf] }
 0x255   : > { %v8095_v25 = vld [vmem:[%s8736_s24 + $0xc24] sm:$0xf0]  ;;  %v5789_v22 = vld [vmem:[%s8736_s24 + $0x128] sm:$0xf0] }
 0x256   : > { %v7451_v26 = vld [vmem:[%s8736_s24 + $0xe08] sm:$0xf]  ;;  %v7196_v39 = vor.u32 %v8095_v25, %v7195_v23  ;;  %4162 = vmatpush.bf16.msrb.mxu1 %v6940_v38  ;;  %v7803_v23 = vld [vmem:[%s8736_s24 + $0x30c] sm:$0xf]  ;;  %v5792_v30 = vor.u32 %v7739_v21, %v5789_v22  ;;  %v3956_v38 = vpop.f32.mrf.mxu1  ;;  %v3969_v55 = vpop.f32.mrf.mxu2 }
 0x257   : > { %v8159_v27 = vld [vmem:[%s8736_s24 + $0xe24] sm:$0xf0]  ;;  %4150 = vmatmul.bf16.vlgmr.msrb.gmra.mxu0 %v8943_v60  ;;  %v6045_v25 = vld [vmem:[%s8736_s24 + $0x328] sm:$0xf0]  ;;  %v3945_v10 = vpop.f32.mrf.mxu0 }
 0x258   : > { %v7452_v42 = vor.u32 %v8159_v27, %v7451_v26  ;;  %4175 = vmatpush.bf16.msrb.mxu2 %v7196_v39  ;;  %4194 = vmatpush.bf16.msra.mxu0 %v5888_v43  ;;  %v7867_v26 = vld [vmem:[%s8736_s24 + $0x50c] sm:$0xf]  ;;  %v6048_v32 = vor.u32 %v7803_v23, %v6045_v25  ;;  %v6560_v39 = vor.u32 %v7931_v28, %v6557_v29 }
 0x259   : > { %4163 = vmatmul.bf16.vlgmr.msrb.gmra.mxu1 %v8947_v63  ;;  %v6301_v27 = vld [vmem:[%s8736_s24 + $0x528] sm:$0xf0] }
 0x25a   : > { %4188 = vmatpush.bf16.msrb.mxu3 %v7452_v42  ;;  %4207 = vmatpush.bf16.msra.mxu1 %v6144_v45  ;;  %v6304_v33 = vor.u32 %v7867_v26, %v6301_v27  ;;  %v7795_v37 = vld [vmem:[%s8736_s24 + $0x2cc] sm:$0xf]  ;;  %v3957_v45 = vadd.f32 %v3956_v38, %v3944_v34 }
 0x25b   : > { %4176 = vmatmul.bf16.vlgmr.msrb.gmra.mxu2 %v8936_v54  ;;  %v6013_v40 = vld [vmem:[%s8736_s24 + $0x2e8] sm:$0xf0] }
 0x25c   : > { %4220 = vmatpush.bf16.msra.mxu2 %v6400_v48  ;;  %4195 = vmatpush.bf16.msra.mxu0 %v5856_v4  ;;  %v7859_v41 = vld [vmem:[%s8736_s24 + $0x4cc] sm:$0xf]  ;;  %v5760_v48 = vor.u32 %v7731_v35, %v5757_v36  ;;  %v6016_v49 = vor.u32 %v7795_v37, %v6013_v40  ;;  %v3970_v62 = vadd.f32 %v3969_v55, %v3957_v45  ;;  %v3984_v36 = vpop.f32.mrf.mxu3 }
 0x25d   : > { %4189 = vmatmul.bf16.vlgmr.msrb.gmra.mxu3 %v8945_v61  ;;  %v6269_v42 = vld [vmem:[%s8736_s24 + $0x4e8] sm:$0xf0] }
 0x25e   : > { %4233 = vmatpush.bf16.msra.mxu3 %v6656_v58  ;;  %4208 = vmatpush.bf16.msra.mxu1 %v6112_v5  ;;  %v7923_v43 = vld [vmem:[%s8736_s24 + $0x6cc] sm:$0xf]  ;;  %v6272_v50 = vor.u32 %v7859_v41, %v6269_v42  ;;  %v3983_v7 = vadd.f32 %v3982_v3, %v3970_v62  ;;  %v3958_v16 = vpop.f32.mrf.mxu1  ;;  %v3971_v31 = vpop.f32.mrf.mxu2 }
 0x25f   : > { %v6525_v44 = vld [vmem:[%s8736_s24 + $0x6e8] sm:$0xf0] }
 0x260   : > { %4221 = vmatpush.bf16.msra.mxu2 %v6368_v6  ;;  %4196 = vmatpush.bf16.msra.mxu0 %v5824_v17  ;;  %v7723_v56 = vld [vmem:[%s8736_s24 + $0x8c] sm:$0xf]  ;;  %v6528_v59 = vor.u32 %v7923_v43, %v6525_v44  ;;  %vm4714_vm4 = vcmp.gt.f32.partialorder %v3983_v7, 0.0  ;;  %v4722_v18 = vmul.f32 0.01, %v3983_v7 }
 0x261   : > { %v5725_v57 = vld [vmem:[%s8736_s24 + $0xa8] sm:$0xf0] }
 0x262   : > { %4234 = vmatpush.bf16.msra.mxu3 %v6624_v11  ;;  %4209 = vmatpush.bf16.msra.mxu1 %v6080_v19  ;;  %v7787_v58 = vld [vmem:[%s8736_s24 + $0x28c] sm:$0xf]  ;;  %v5728_v6 = vor.u32 %v7723_v56, %v5725_v57  ;;  %v9269_v22 = vsel %vm4714_vm4, %v3983_v7, %v4722_v18 }
 0x263   : > { %v5981_v0 = vld [vmem:[%s8736_s24 + $0x2a8] sm:$0xf0] }
 0x264   : > { %4222 = vmatpush.bf16.msra.mxu2 %v6336_v20  ;;  %4197 = vmatpush.bf16.msra.mxu0 %v5792_v30  ;;  %v7851_v1 = vld [vmem:[%s8736_s24 + $0x48c] sm:$0xf]  ;;  %v5984_v11 = vor.u32 %v7787_v58, %v5981_v0 }
 0x265   : > { %v6237_v2 = vld [vmem:[%s8736_s24 + $0x4a8] sm:$0xf0] }
 0x266   : > { %4235 = vmatpush.bf16.msra.mxu3 %v6592_v24  ;;  %4210 = vmatpush.bf16.msra.mxu1 %v6048_v32  ;;  %v7915_v4 = vld [vmem:[%s8736_s24 + $0x68c] sm:$0xf]  ;;  %v6240_v12 = vor.u32 %v7851_v1, %v6237_v2 }
 0x267   : > { %v6493_v5 = vld [vmem:[%s8736_s24 + $0x6a8] sm:$0xf0] }
 0x268   : > { %4223 = vmatpush.bf16.msra.mxu2 %v6304_v33  ;;  %4198 = vmatpush.bf16.msra.mxu0 %v5760_v48  ;;  %v7715_v8 = vld [vmem:[%s8736_s24 + $0x4c] sm:$0xf]  ;;  %v6496_v17 = vor.u32 %v7915_v4, %v6493_v5 }
 0x269   : > { %v5693_v9 = vld [vmem:[%s8736_s24 + $0x68] sm:$0xf0] }
 0x26a   : > { %4236 = vmatpush.bf16.msra.mxu3 %v6560_v39  ;;  %4211 = vmatpush.bf16.msra.mxu1 %v6016_v49  ;;  %v7779_v13 = vld [vmem:[%s8736_s24 + $0x24c] sm:$0xf]  ;;  %v5696_v23 = vor.u32 %v7715_v8, %v5693_v9 }
 0x26b   : > { %v5949_v14 = vld [vmem:[%s8736_s24 + $0x268] sm:$0xf0] }
 0x26c   : > { %4224 = vmatpush.bf16.msra.mxu2 %v6272_v50  ;;  %v7843_v15 = vld [vmem:[%s8736_s24 + $0x44c] sm:$0xf]  ;;  %4199 = vmatpush.bf16.msra.mxu0 %v5728_v6  ;;  %v5952_v26 = vor.u32 %v7779_v13, %v5949_v14 }
 0x26d   : > { %v6205_v19 = vld [vmem:[%s8736_s24 + $0x468] sm:$0xf0] }
 0x26e   : > { %4237 = vmatpush.bf16.msra.mxu3 %v6528_v59  ;;  %v7907_v20 = vld [vmem:[%s8736_s24 + $0x64c] sm:$0xf]  ;;  %4212 = vmatpush.bf16.msra.mxu1 %v5984_v11  ;;  %v6208_v27 = vor.u32 %v7843_v15, %v6205_v19 }
 0x26f   : > { %v6461_v21 = vld [vmem:[%s8736_s24 + $0x668] sm:$0xf0] }
 0x270   : > { %v7707_v24 = vld [vmem:[%s8736_s24 + $0xc] sm:$0xf]  ;;  %4225 = vmatpush.bf16.msra.mxu2 %v6240_v12  ;;  %v6464_v32 = vor.u32 %v7907_v20, %v6461_v21  ;;  %4200 = vmatpush.bf16.msra.mxu0 %v5696_v23 }
 0x271   : > { %v5661_v25 = vld [vmem:[%s8736_s24 + $0x28] sm:$0xf0] }
 0x272   : > { %v7771_v28 = vld [vmem:[%s8736_s24 + $0x20c] sm:$0xf]  ;;  %4238 = vmatpush.bf16.msra.mxu3 %v6496_v17  ;;  %v5664_v40 = vor.u32 %v7707_v24, %v5661_v25  ;;  %4213 = vmatpush.bf16.msra.mxu1 %v5952_v26  ;;  %v1307_v25 = vperm.slane %v9185_v51, 1 }
 0x273   : > { %v5917_v29 = vld [vmem:[%s8736_s24 + $0x228] sm:$0xf0] }
 0x274   : > { %v7835_v30 = vld [vmem:[%s8736_s24 + $0x40c] sm:$0xf]  ;;  %4226 = vmatpush.bf16.msra.mxu2 %v6208_v27  ;;  %v5920_v44 = vor.u32 %v7771_v28, %v5917_v29  ;;  %4201 = vmatpush.bf16.msra.mxu0 %v5664_v40 }
 0x275   : > { %v6173_v33 = vld [vmem:[%s8736_s24 + $0x428] sm:$0xf0] }
 0x276   : > { %v7899_v34 = vld [vmem:[%s8736_s24 + $0x60c] sm:$0xf]  ;;  %v6176_v45 = vor.u32 %v7835_v30, %v6173_v33  ;;  %4239 = vmatpush.bf16.msra.mxu3 %v6464_v32  ;;  %4214 = vmatpush.bf16.msra.mxu1 %v5920_v44  ;;  %v3995_v33 = vpop.f32.mrf.mxu0 }
 0x277   : > { %v6429_v35 = vld [vmem:[%s8736_s24 + $0x628] sm:$0xf0]  ;;  %4202 = vmatmul.bf16.vlgmr.msra.gmra.mxu0 %v8889_v47 }
 0x278   : > { %v8019_v37 = vld [vmem:[%s8736_s24 + $0x9cc] sm:$0xf]  ;;  %v6432_v50 = vor.u32 %v7899_v34, %v6429_v35  ;;  %4227 = vmatpush.bf16.msra.mxu2 %v6176_v45 }
 0x279   : > { %v6909_v38 = vld [vmem:[%s8736_s24 + $0x9e8] sm:$0xf0]  ;;  %4215 = vmatmul.bf16.vlgmr.msra.gmra.mxu1 %v8895_v53 }
 0x27a   : > { %v8083_v39 = vld [vmem:[%s8736_s24 + $0xbcc] sm:$0xf]  ;;  %v6912_v55 = vor.u32 %v8019_v37, %v6909_v38  ;;  %4240 = vmatpush.bf16.msra.mxu3 %v6432_v50  ;;  %v3996_v38 = vadd.f32 %v3995_v33, %v1307_v25 }
 0x27b   : > { %v7165_v41 = vld [vmem:[%s8736_s24 + $0xbe8] sm:$0xf0]  ;;  %4228 = vmatmul.bf16.vlgmr.msra.gmra.mxu2 %v8887_v46 }
 0x27c   : > { %v8147_v42 = vld [vmem:[%s8736_s24 + $0xdcc] sm:$0xf]  ;;  %v7168_v56 = vor.u32 %v8083_v39, %v7165_v41  ;;  %4246 = vmatpush.bf16.msrb.mxu0 %v6912_v55  ;;  %v4008_v39 = vpop.f32.mrf.mxu1 }
 0x27d   : > { %v7421_v43 = vld [vmem:[%s8736_s24 + $0xde8] sm:$0xf0]  ;;  %4241 = vmatmul.bf16.vlgmr.msra.gmra.mxu3 %v8893_v52 }
 0x27e   : > { %v8211_v48 = vld [vmem:[%s8736_s24 + $0xfcc] sm:$0xf]  ;;  %v7424_v57 = vor.u32 %v8147_v42, %v7421_v43  ;;  %4259 = vmatpush.bf16.msrb.mxu1 %v7168_v56 }
 0x27f   : > { %v7677_v49 = vld [vmem:[%s8736_s24 + $0xfe8] sm:$0xf0] }
 0x280   : > { %v8011_v58 = vld [vmem:[%s8736_s24 + $0x98c] sm:$0xf]  ;;  %v7680_v0 = vor.u32 %v8211_v48, %v7677_v49  ;;  %4272 = vmatpush.bf16.msrb.mxu2 %v7424_v57  ;;  %v4009_v48 = vadd.f32 %v4008_v39, %v3996_v38  ;;  %v6147_v38 = vld [vmem:[%s8736_s24 + $0x3d0] sm:$0xf] }
 0x281   : > { %v6877_v59 = vld [vmem:[%s8736_s24 + $0x9a8] sm:$0xf0] }
 0x282   : > { %v8075_v62 = vld [vmem:[%s8736_s24 + $0xb8c] sm:$0xf]  ;;  %v6880_v6 = vor.u32 %v8011_v58, %v6877_v59  ;;  %4285 = vmatpush.bf16.msrb.mxu3 %v7680_v0  ;;  %v4021_v59 = vpop.f32.mrf.mxu2 }
 0x283   : > { %v7133_v1 = vld [vmem:[%s8736_s24 + $0xba8] sm:$0xf0] }
 0x284   : > { %v8139_v2 = vld [vmem:[%s8736_s24 + $0xd8c] sm:$0xf]  ;;  %v7136_v7 = vor.u32 %v8075_v62, %v7133_v1  ;;  %4247 = vmatpush.bf16.msrb.mxu0 %v6880_v6 }
 0x285   : > { %v7389_v3 = vld [vmem:[%s8736_s24 + $0xda8] sm:$0xf0] }
 0x286   : > { %v8203_v4 = vld [vmem:[%s8736_s24 + $0xf8c] sm:$0xf]  ;;  %v7392_v8 = vor.u32 %v8139_v2, %v7389_v3  ;;  %4260 = vmatpush.bf16.msrb.mxu1 %v7136_v7  ;;  %v4022_v3 = vadd.f32 %v4021_v59, %v4009_v48  ;;  %v7960_v48 = vld [vmem:[%s8736_s24 + $0x7ec] sm:$0xf0] }
 0x287   : > { %v7645_v5 = vld [vmem:[%s8736_s24 + $0xfa8] sm:$0xf0]  ;;  %v6115_v59 = vld [vmem:[%s8736_s24 + $0x390] sm:$0xf] }
 0x288   : > { %v8003_v9 = vld [vmem:[%s8736_s24 + $0x94c] sm:$0xf]  ;;  %v7648_v12 = vor.u32 %v8203_v4, %v7645_v5  ;;  %4273 = vmatpush.bf16.msrb.mxu2 %v7392_v8  ;;  %v4034_v4 = vpop.f32.mrf.mxu3 }
 0x289   : > { %v6845_v10 = vld [vmem:[%s8736_s24 + $0x968] sm:$0xf0]  ;;  %v9332_v8 = vadd.f32 %v4034_v4, %v4022_v3  ;;  %v6627_v3 = vld [vmem:[%s8736_s24 + $0x790] sm:$0xf] }
 0x28a   : > { %v8067_v11 = vld [vmem:[%s8736_s24 + $0xb4c] sm:$0xf]  ;;  %v6848_v18 = vor.u32 %v8003_v9, %v6845_v10  ;;  %4286 = vmatpush.bf16.msrb.mxu3 %v7648_v12  ;;  %v3997_v9 = vpop.f32.mrf.mxu0  ;;  %v7952_v4 = vld [vmem:[%s8736_s24 + $0x7ac] sm:$0xf0] }
 0x28b   : > { %v7101_v13 = vld [vmem:[%s8736_s24 + $0xb68] sm:$0xf0]  ;;  %v5827_v9 = vld [vmem:[%s8736_s24 + $0x150] sm:$0xf] }
 0x28c   : > { %v8131_v14 = vld [vmem:[%s8736_s24 + $0xd4c] sm:$0xf]  ;;  %v7104_v20 = vor.u32 %v8067_v11, %v7101_v13  ;;  %4248 = vmatpush.bf16.msrb.mxu0 %v6848_v18 }
 0x28d   : > { %v7357_v15 = vld [vmem:[%s8736_s24 + $0xd68] sm:$0xf0] }
 0x28e   : > { %v8195_v16 = vld [vmem:[%s8736_s24 + $0xf4c] sm:$0xf]  ;;  %v7360_v21 = vor.u32 %v8131_v14, %v7357_v15  ;;  %4261 = vmatpush.bf16.msrb.mxu1 %v7104_v20  ;;  %v4010_v15 = vpop.f32.mrf.mxu1 }
 0x28f   : > { %v7613_v17 = vld [vmem:[%s8736_s24 + $0xf68] sm:$0xf0]  ;;  %v7880_v15 = vld [vmem:[%s8736_s24 + $0x56c] sm:$0xf0] }
 0x290   : > { %v7995_v19 = vld [vmem:[%s8736_s24 + $0x90c] sm:$0xf]  ;;  %v7616_v26 = vor.u32 %v8195_v16, %v7613_v17  ;;  %4274 = vmatpush.bf16.msrb.mxu2 %v7360_v21 }
 0x291   : > { %v6813_v23 = vld [vmem:[%s8736_s24 + $0x928] sm:$0xf0] }
 0x292   : > { %v8059_v24 = vld [vmem:[%s8736_s24 + $0xb0c] sm:$0xf]  ;;  %v6816_v32 = vor.u32 %v7995_v19, %v6813_v23  ;;  %4287 = vmatpush.bf16.msrb.mxu3 %v7616_v26 }
 0x293   : > { %v7069_v27 = vld [vmem:[%s8736_s24 + $0xb28] sm:$0xf0] }
 0x294   : > { %v8123_v28 = vld [vmem:[%s8736_s24 + $0xd0c] sm:$0xf]  ;;  %v7072_v51 = vor.u32 %v8059_v24, %v7069_v27  ;;  %4249 = vmatpush.bf16.msrb.mxu0 %v6816_v32 }
 0x295   : > { %v7325_v29 = vld [vmem:[%s8736_s24 + $0xd28] sm:$0xf0] }
 0x296   : > { %v8187_v30 = vld [vmem:[%s8736_s24 + $0xf0c] sm:$0xf]  ;;  %v7328_v34 = vor.u32 %v8123_v28, %v7325_v29  ;;  %4262 = vmatpush.bf16.msrb.mxu1 %v7072_v51 }
 0x297   : > { %v7581_v31 = vld [vmem:[%s8736_s24 + $0xf28] sm:$0xf0] }
 0x298   : > { %v7987_v35 = vld [vmem:[%s8736_s24 + $0x8cc] sm:$0xf]  ;;  %v7584_v40 = vor.u32 %v8187_v30, %v7581_v31  ;;  %4275 = vmatpush.bf16.msrb.mxu2 %v7328_v34  ;;  %v4023_v31 = vpop.f32.mrf.mxu2 }
 0x299   : > { %v6781_v36 = vld [vmem:[%s8736_s24 + $0x8e8] sm:$0xf0] }
 0x29a   : > { %v8051_v37 = vld [vmem:[%s8736_s24 + $0xacc] sm:$0xf]  ;;  %v6784_v49 = vor.u32 %v7987_v35, %v6781_v36  ;;  %4288 = vmatpush.bf16.msrb.mxu3 %v7584_v40  ;;  %v4036_v35 = vpop.f32.mrf.mxu3  ;;  %v5891_v36 = vld [vmem:[%s8736_s24 + $0x1d0] sm:$0xf] }
 0x29b   : > { %v7037_v41 = vld [vmem:[%s8736_s24 + $0xae8] sm:$0xf0]  ;;  %v7832_v40 = vld [vmem:[%s8736_s24 + $0x3ec] sm:$0xf0] }
 0x29c   : > { %v8115_v42 = vld [vmem:[%s8736_s24 + $0xccc] sm:$0xf]  ;;  %v7040_v50 = vor.u32 %v8051_v37, %v7037_v41  ;;  %4250 = vmatpush.bf16.msrb.mxu0 %v6784_v49  ;;  %v7768_v37 = vld [vmem:[%s8736_s24 + $0x1ec] sm:$0xf0] }
 0x29d   : > { %v7293_v43 = vld [vmem:[%s8736_s24 + $0xce8] sm:$0xf0]  ;;  %v6403_v41 = vld [vmem:[%s8736_s24 + $0x5d0] sm:$0xf] }
 0x29e   : > { %v8179_v44 = vld [vmem:[%s8736_s24 + $0xecc] sm:$0xf]  ;;  %v7296_v55 = vor.u32 %v8115_v42, %v7293_v43  ;;  %4263 = vmatpush.bf16.msrb.mxu1 %v7040_v50  ;;  %v7896_v42 = vld [vmem:[%s8736_s24 + $0x5ec] sm:$0xf0]  ;;  %v5892_v50 = vor.u32 %v7768_v37, %v5891_v36 }
 0x29f   : > { %v7549_v45 = vld [vmem:[%s8736_s24 + $0xee8] sm:$0xf0]  ;;  %v5763_v35 = vld [vmem:[%s8736_s24 + $0xd0] sm:$0xf] }
 0x2a0   : > { %v7979_v56 = vld [vmem:[%s8736_s24 + $0x88c] sm:$0xf]  ;;  %v7552_v62 = vor.u32 %v8179_v44, %v7549_v45  ;;  %4276 = vmatpush.bf16.msrb.mxu2 %v7296_v55  ;;  %v6659_v45 = vld [vmem:[%s8736_s24 + $0x7d0] sm:$0xf]  ;;  %v6148_v55 = vor.u32 %v7832_v40, %v6147_v38  ;;  %v4060_v38 = vpop.f32.mrf.mxu1 }
 0x2a1   : > { %v6749_v57 = vld [vmem:[%s8736_s24 + $0x8a8] sm:$0xf0]  ;;  %v7736_v36 = vld [vmem:[%s8736_s24 + $0xec] sm:$0xf0] }
 0x2a2   : > { %v8043_v58 = vld [vmem:[%s8736_s24 + $0xa8c] sm:$0xf]  ;;  %v6752_v7 = vor.u32 %v7979_v56, %v6749_v57  ;;  %4289 = vmatpush.bf16.msrb.mxu3 %v7552_v62  ;;  %v6404_v56 = vor.u32 %v7896_v42, %v6403_v41  ;;  %v5859_v57 = vld [vmem:[%s8736_s24 + $0x190] sm:$0xf]  ;;  %v6660_v62 = vor.u32 %v7960_v48, %v6659_v45 }
 0x2a3   : > { %v7005_v0 = vld [vmem:[%s8736_s24 + $0xaa8] sm:$0xf0]  ;;  %v6019_v37 = vld [vmem:[%s8736_s24 + $0x2d0] sm:$0xf] }
 0x2a4   : > { %v8107_v1 = vld [vmem:[%s8736_s24 + $0xc8c] sm:$0xf]  ;;  %v7008_v10 = vor.u32 %v8043_v58, %v7005_v0  ;;  %4251 = vmatpush.bf16.msrb.mxu0 %v6752_v7  ;;  %v7760_v58 = vld [vmem:[%s8736_s24 + $0x1ac] sm:$0xf0] }
 0x2a5   : > { %v7261_v2 = vld [vmem:[%s8736_s24 + $0xca8] sm:$0xf0]  ;;  %v7824_v0 = vld [vmem:[%s8736_s24 + $0x3ac] sm:$0xf0] }
 0x2a6   : > { %v8171_v5 = vld [vmem:[%s8736_s24 + $0xe8c] sm:$0xf]  ;;  %v7264_v11 = vor.u32 %v8107_v1, %v7261_v2  ;;  %4264 = vmatpush.bf16.msrb.mxu1 %v7008_v10  ;;  %v6371_v1 = vld [vmem:[%s8736_s24 + $0x590] sm:$0xf] }
 0x2a7   : > { %v7517_v6 = vld [vmem:[%s8736_s24 + $0xea8] sm:$0xf0]  ;;  %v7888_v2 = vld [vmem:[%s8736_s24 + $0x5ac] sm:$0xf0] }
 0x2a8   : > { %v7971_v12 = vld [vmem:[%s8736_s24 + $0x84c] sm:$0xf]  ;;  %v7520_v16 = vor.u32 %v8171_v5, %v7517_v6  ;;  %4277 = vmatpush.bf16.msrb.mxu2 %v7264_v11  ;;  %v5860_v5 = vor.u32 %v7760_v58, %v5859_v57  ;;  %v6116_v6 = vor.u32 %v7824_v0, %v6115_v59  ;;  %v6372_v7 = vor.u32 %v7888_v2, %v6371_v1  ;;  %v7752_v10 = vld [vmem:[%s8736_s24 + $0x16c] sm:$0xf0]  ;;  %v4086_v2 = vpop.f32.mrf.mxu3 }
 0x2a9   : > { %v6717_v13 = vld [vmem:[%s8736_s24 + $0x868] sm:$0xf0]  ;;  %v6083_v11 = vld [vmem:[%s8736_s24 + $0x350] sm:$0xf] }
 0x2aa   : > { %v8035_v14 = vld [vmem:[%s8736_s24 + $0xa4c] sm:$0xf]  ;;  %v6720_v23 = vor.u32 %v7971_v12, %v6717_v13  ;;  %4290 = vmatpush.bf16.msrb.mxu3 %v7520_v16  ;;  %v6628_v12 = vor.u32 %v7952_v4, %v6627_v3  ;;  %v7816_v13 = vld [vmem:[%s8736_s24 + $0x36c] sm:$0xf0] }
 0x2ab   : > { %v6973_v17 = vld [vmem:[%s8736_s24 + $0xa68] sm:$0xf0]  ;;  %v6595_v16 = vld [vmem:[%s8736_s24 + $0x750] sm:$0xf] }
 0x2ac   : > { %v8099_v18 = vld [vmem:[%s8736_s24 + $0xc4c] sm:$0xf]  ;;  %v6976_v26 = vor.u32 %v8035_v14, %v6973_v17  ;;  %4252 = vmatpush.bf16.msrb.mxu0 %v6720_v23  ;;  %v6339_v14 = vld [vmem:[%s8736_s24 + $0x550] sm:$0xf] }
 0x2ad   : > { %v7229_v19 = vld [vmem:[%s8736_s24 + $0xc68] sm:$0xf0]  ;;  %v7944_v17 = vld [vmem:[%s8736_s24 + $0x76c] sm:$0xf0] }
 0x2ae   : > { %v8163_v20 = vld [vmem:[%s8736_s24 + $0xe4c] sm:$0xf]  ;;  %v7232_v27 = vor.u32 %v8099_v18, %v7229_v19  ;;  %4265 = vmatpush.bf16.msrb.mxu1 %v6976_v26  ;;  %v5828_v18 = vor.u32 %v7752_v10, %v5827_v9  ;;  %v6084_v19 = vor.u32 %v7816_v13, %v6083_v11  ;;  %v7744_v23 = vld [vmem:[%s8736_s24 + $0x12c] sm:$0xf0] }
 0x2af   : > { %v7485_v21 = vld [vmem:[%s8736_s24 + $0xe68] sm:$0xf0]  ;;  %v7808_v26 = vld [vmem:[%s8736_s24 + $0x32c] sm:$0xf0] }
 0x2b0   : > { %v7963_v24 = vld [vmem:[%s8736_s24 + $0x80c] sm:$0xf]  ;;  %v7488_v32 = vor.u32 %v8163_v20, %v7485_v21  ;;  %4278 = vmatpush.bf16.msrb.mxu2 %v7232_v27  ;;  %v6340_v20 = vor.u32 %v7880_v15, %v6339_v14  ;;  %v5795_v21 = vld [vmem:[%s8736_s24 + $0x110] sm:$0xf] }
 0x2b1   : > { %v6685_v25 = vld [vmem:[%s8736_s24 + $0x828] sm:$0xf0]  ;;  %v6307_v27 = vld [vmem:[%s8736_s24 + $0x510] sm:$0xf]  ;;  %v5796_v31 = vor.u32 %v7744_v23, %v5795_v21 }
 0x2b2   : > { %v8027_v28 = vld [vmem:[%s8736_s24 + $0xa0c] sm:$0xf]  ;;  %v6688_v39 = vor.u32 %v7963_v24, %v6685_v25  ;;  %4291 = vmatpush.bf16.msrb.mxu3 %v7488_v32  ;;  %v6051_v24 = vld [vmem:[%s8736_s24 + $0x310] sm:$0xf]  ;;  %v6596_v25 = vor.u32 %v7944_v17, %v6595_v16  ;;  %v4047_v32 = vpop.f32.mrf.mxu0  ;;  %v4062_v16 = vpop.f32.mrf.mxu1 }
 0x2b3   : > { %v6941_v29 = vld [vmem:[%s8736_s24 + $0xa28] sm:$0xf0]  ;;  %v7800_v40 = vld [vmem:[%s8736_s24 + $0x2ec] sm:$0xf0] }
 0x2b4   : > { %v8091_v30 = vld [vmem:[%s8736_s24 + $0xc0c] sm:$0xf]  ;;  %v6944_v43 = vor.u32 %v8027_v28, %v6941_v29  ;;  %4253 = vmatpush.bf16.msrb.mxu0 %v6688_v39  ;;  %v7872_v28 = vld [vmem:[%s8736_s24 + $0x52c] sm:$0xf0]  ;;  %v6020_v48 = vor.u32 %v7800_v40, %v6019_v37 }
 0x2b5   : > { %v7197_v33 = vld [vmem:[%s8736_s24 + $0xc28] sm:$0xf0]  ;;  %v6563_v29 = vld [vmem:[%s8736_s24 + $0x710] sm:$0xf] }
 0x2b6   : > { %v8155_v51 = vld [vmem:[%s8736_s24 + $0xe0c] sm:$0xf]  ;;  %v7200_v44 = vor.u32 %v8091_v30, %v7197_v33  ;;  %4266 = vmatpush.bf16.msrb.mxu1 %v6944_v43  ;;  %v7936_v30 = vld [vmem:[%s8736_s24 + $0x72c] sm:$0xf0]  ;;  %v6052_v33 = vor.u32 %v7808_v26, %v6051_v24 }
 0x2b7   : > { %v7453_v34 = vld [vmem:[%s8736_s24 + $0xe28] sm:$0xf0]  ;;  %4254 = vmatmul.bf16.vlgmr.msrb.gmra.mxu0 %v8943_v60  ;;  %v6564_v39 = vor.u32 %v7936_v30, %v6563_v29  ;;  %v6275_v41 = vld [vmem:[%s8736_s24 + $0x4d0] sm:$0xf] }
 0x2b8   : > { %v7456_v49 = vor.u32 %v8155_v51, %v7453_v34  ;;  %4279 = vmatpush.bf16.msrb.mxu2 %v7200_v44  ;;  %4298 = vmatpush.bf16.msra.mxu0 %v5892_v50  ;;  %v6308_v51 = vor.u32 %v7872_v28, %v6307_v27  ;;  %v4048_v34 = vadd.f32 %v4047_v32, %v9332_v8  ;;  %v7864_v42 = vld [vmem:[%s8736_s24 + $0x4ec] sm:$0xf0]  ;;  %v4073_v50 = vpop.f32.mrf.mxu2 }
 0x2b9   : > { %4267 = vmatmul.bf16.vlgmr.msrb.gmra.mxu1 %v8947_v63  ;;  %v6531_v43 = vld [vmem:[%s8736_s24 + $0x6d0] sm:$0xf]  ;;  %v5764_v8 = vor.u32 %v7736_v36, %v5763_v35  ;;  %v4088_v36 = vpop.f32.mrf.mxu3 }
 0x2ba   : > { %4292 = vmatpush.bf16.msrb.mxu3 %v7456_v49  ;;  %4311 = vmatpush.bf16.msra.mxu1 %v6148_v55  ;;  %v7928_v44 = vld [vmem:[%s8736_s24 + $0x6ec] sm:$0xf0]  ;;  %v4061_v45 = vadd.f32 %v4060_v38, %v4048_v34  ;;  %v6276_v49 = vor.u32 %v7864_v42, %v6275_v41  ;;  %v4049_v10 = vpop.f32.mrf.mxu0 }
 0x2bb   : > { %4280 = vmatmul.bf16.vlgmr.msrb.gmra.mxu2 %v8936_v54  ;;  %v5731_v55 = vld [vmem:[%s8736_s24 + $0x90] sm:$0xf]  ;;  %v6532_v58 = vor.u32 %v7928_v44, %v6531_v43 }
 0x2bc   : > { %4324 = vmatpush.bf16.msra.mxu2 %v6404_v56  ;;  %4299 = vmatpush.bf16.msra.mxu0 %v5860_v5  ;;  %v7728_v56 = vld [vmem:[%s8736_s24 + $0xac] sm:$0xf0]  ;;  %v4074_v59 = vadd.f32 %v4073_v50, %v4061_v45 }
 0x2bd   : > { %4293 = vmatmul.bf16.vlgmr.msrb.gmra.mxu3 %v8945_v61  ;;  %v5987_v57 = vld [vmem:[%s8736_s24 + $0x290] sm:$0xf]  ;;  %v5732_v5 = vor.u32 %v7728_v56, %v5731_v55 }
 0x2be   : > { %4337 = vmatpush.bf16.msra.mxu3 %v6660_v62  ;;  %4312 = vmatpush.bf16.msra.mxu1 %v6116_v6  ;;  %v7792_v62 = vld [vmem:[%s8736_s24 + $0x2ac] sm:$0xf0]  ;;  %v4087_v6 = vadd.f32 %v4086_v2, %v4074_v59 }
 0x2bf   : > { %v6243_v0 = vld [vmem:[%s8736_s24 + $0x490] sm:$0xf]  ;;  %v5988_v11 = vor.u32 %v7792_v62, %v5987_v57 }
 0x2c0   : > { %4325 = vmatpush.bf16.msra.mxu2 %v6372_v7  ;;  %4300 = vmatpush.bf16.msra.mxu0 %v5828_v18  ;;  %v7856_v1 = vld [vmem:[%s8736_s24 + $0x4ac] sm:$0xf0]  ;;  %vm4715_vm5 = vcmp.gt.f32.partialorder %v4087_v6, 0.0  ;;  %v4723_v18 = vmul.f32 0.01, %v4087_v6  ;;  %v4075_v32 = vpop.f32.mrf.mxu2 }
 0x2c1   : > { %v6499_v3 = vld [vmem:[%s8736_s24 + $0x690] sm:$0xf] }
 0x2c2   : > { %4338 = vmatpush.bf16.msra.mxu3 %v6628_v12  ;;  %4313 = vmatpush.bf16.msra.mxu1 %v6084_v19  ;;  %v7920_v4 = vld [vmem:[%s8736_s24 + $0x6ac] sm:$0xf0]  ;;  %v6244_v12 = vor.u32 %v7856_v1, %v6243_v0  ;;  %v9411_v23 = vsel %vm4715_vm5, %v4087_v6, %v4723_v18 }
 0x2c3   : > { %v5699_v7 = vld [vmem:[%s8736_s24 + $0x50] sm:$0xf]  ;;  %v6500_v17 = vor.u32 %v7920_v4, %v6499_v3 }
 0x2c4   : > { %4326 = vmatpush.bf16.msra.mxu2 %v6340_v20  ;;  %4301 = vmatpush.bf16.msra.mxu0 %v5796_v31  ;;  %v7720_v9 = vld [vmem:[%s8736_s24 + $0x6c] sm:$0xf0] }
 0x2c5   : > { %v5955_v13 = vld [vmem:[%s8736_s24 + $0x250] sm:$0xf]  ;;  %v5700_v24 = vor.u32 %v7720_v9, %v5699_v7 }
 0x2c6   : > { %4339 = vmatpush.bf16.msra.mxu3 %v6596_v25  ;;  %4314 = vmatpush.bf16.msra.mxu1 %v6052_v33  ;;  %v7784_v14 = vld [vmem:[%s8736_s24 + $0x26c] sm:$0xf0] }
 0x2c7   : > { %v6211_v15 = vld [vmem:[%s8736_s24 + $0x450] sm:$0xf]  ;;  %v5956_v27 = vor.u32 %v7784_v14, %v5955_v13 }
 0x2c8   : > { %4327 = vmatpush.bf16.msra.mxu2 %v6308_v51  ;;  %4302 = vmatpush.bf16.msra.mxu0 %v5764_v8  ;;  %v7848_v19 = vld [vmem:[%s8736_s24 + $0x46c] sm:$0xf0] }
 0x2c9   : > { %v6467_v20 = vld [vmem:[%s8736_s24 + $0x650] sm:$0xf]  ;;  %v6212_v28 = vor.u32 %v7848_v19, %v6211_v15 }
 0x2ca   : > { %4340 = vmatpush.bf16.msra.mxu3 %v6564_v39  ;;  %4315 = vmatpush.bf16.msra.mxu1 %v6020_v48  ;;  %v7912_v21 = vld [vmem:[%s8736_s24 + $0x66c] sm:$0xf0] }
 0x2cb   : > { %v5667_v25 = vld [vmem:[%s8736_s24 + $0x10] sm:$0xf]  ;;  %v6468_v33 = vor.u32 %v7912_v21, %v6467_v20 }
 0x2cc   : > { %4328 = vmatpush.bf16.msra.mxu2 %v6276_v49  ;;  %4303 = vmatpush.bf16.msra.mxu0 %v5732_v5  ;;  %v7712_v26 = vld [vmem:[%s8736_s24 + $0x2c] sm:$0xf0] }
 0x2cd   : > { %v5923_v29 = vld [vmem:[%s8736_s24 + $0x210] sm:$0xf]  ;;  %v5668_v40 = vor.u32 %v7712_v26, %v5667_v25  ;;  %v9453_v26 = vld [vmem:[%s8742_s15] sm:$0xff] }
 0x2ce   : > { %4341 = vmatpush.bf16.msra.mxu3 %v6532_v58  ;;  %4316 = vmatpush.bf16.msra.mxu1 %v5988_v11  ;;  %v7776_v30 = vld [vmem:[%s8736_s24 + $0x22c] sm:$0xf0] }
 0x2cf   : > { %v6179_v31 = vld [vmem:[%s8736_s24 + $0x410] sm:$0xf]  ;;  %v5924_v44 = vor.u32 %v7776_v30, %v5923_v29 }
 0x2d0   : > { %4329 = vmatpush.bf16.msra.mxu2 %v6244_v12  ;;  %v7840_v51 = vld [vmem:[%s8736_s24 + $0x42c] sm:$0xf0]  ;;  %4304 = vmatpush.bf16.msra.mxu0 %v5700_v24 }
 0x2d1   : > { %v6435_v34 = vld [vmem:[%s8736_s24 + $0x610] sm:$0xf]  ;;  %v6180_v45 = vor.u32 %v7840_v51, %v6179_v31 }
 0x2d2   : > { %4342 = vmatpush.bf16.msra.mxu3 %v6500_v17  ;;  %v7904_v35 = vld [vmem:[%s8736_s24 + $0x62c] sm:$0xf0]  ;;  %4317 = vmatpush.bf16.msra.mxu1 %v5956_v27  ;;  %v1308_v27 = vperm.slane %v9453_v26, 2 }
 0x2d3   : > { %v6915_v37 = vld [vmem:[%s8736_s24 + $0x9d0] sm:$0xf]  ;;  %v6436_v49 = vor.u32 %v7904_v35, %v6435_v34  ;;  %v4099_v34 = vpop.f32.mrf.mxu0 }
 0x2d4   : > { %v8024_v38 = vld [vmem:[%s8736_s24 + $0x9ec] sm:$0xf0]  ;;  %4330 = vmatpush.bf16.msra.mxu2 %v6212_v28  ;;  %4305 = vmatpush.bf16.msra.mxu0 %v5668_v40  ;;  %v4100_v40 = vadd.f32 %v4099_v34, %v1308_v27 }
 0x2d5   : > { %v7171_v39 = vld [vmem:[%s8736_s24 + $0xbd0] sm:$0xf]  ;;  %v6916_v50 = vor.u32 %v8024_v38, %v6915_v37 }
 0x2d6   : > { %v8088_v41 = vld [vmem:[%s8736_s24 + $0xbec] sm:$0xf0]  ;;  %4343 = vmatpush.bf16.msra.mxu3 %v6468_v33  ;;  %4318 = vmatpush.bf16.msra.mxu1 %v5924_v44 }
 0x2d7   : > { %v7427_v42 = vld [vmem:[%s8736_s24 + $0xdd0] sm:$0xf]  ;;  %v7172_v55 = vor.u32 %v8088_v41, %v7171_v39  ;;  %4306 = vmatmul.bf16.vlgmr.msra.gmra.mxu0 %v8889_v47  ;;  %v4112_v41 = vpop.f32.mrf.mxu1 }
 0x2d8   : > { %v8152_v43 = vld [vmem:[%s8736_s24 + $0xdec] sm:$0xf0]  ;;  %4331 = vmatpush.bf16.msra.mxu2 %v6180_v45  ;;  %4350 = vmatpush.bf16.msrb.mxu0 %v6916_v50 }
 0x2d9   : > { %v7683_v8 = vld [vmem:[%s8736_s24 + $0xfd0] sm:$0xf]  ;;  %v7428_v56 = vor.u32 %v8152_v43, %v7427_v42  ;;  %4319 = vmatmul.bf16.vlgmr.msra.gmra.mxu1 %v8895_v53 }
 0x2da   : > { %v8216_v48 = vld [vmem:[%s8736_s24 + $0xfec] sm:$0xf0]  ;;  %4344 = vmatpush.bf16.msra.mxu3 %v6436_v49  ;;  %4363 = vmatpush.bf16.msrb.mxu1 %v7172_v55  ;;  %v4113_v49 = vadd.f32 %v4112_v41, %v4100_v40  ;;  %v7764_v40 = vld [vmem:[%s8736_s24 + $0x1d4] sm:$0xf] }
 0x2db   : > { %v6883_v57 = vld [vmem:[%s8736_s24 + $0x990] sm:$0xf]  ;;  %v7684_v62 = vor.u32 %v8216_v48, %v7683_v8  ;;  %4332 = vmatmul.bf16.vlgmr.msra.gmra.mxu2 %v8887_v46  ;;  %v5893_v41 = vld [vmem:[%s8736_s24 + $0x1f0] sm:$0xf0] }
 0x2dc   : > { %v8016_v58 = vld [vmem:[%s8736_s24 + $0x9ac] sm:$0xf0]  ;;  %4376 = vmatpush.bf16.msrb.mxu2 %v7428_v56 }
 0x2dd   : > { %v7139_v59 = vld [vmem:[%s8736_s24 + $0xb90] sm:$0xf]  ;;  %v6884_v5 = vor.u32 %v8016_v58, %v6883_v57  ;;  %4345 = vmatmul.bf16.vlgmr.msra.gmra.mxu3 %v8893_v52 }
 0x2de   : > { %v8080_v0 = vld [vmem:[%s8736_s24 + $0xbac] sm:$0xf0]  ;;  %4389 = vmatpush.bf16.msrb.mxu3 %v7684_v62  ;;  %v4125_v62 = vpop.f32.mrf.mxu2 }
 0x2df   : > { %v7395_v1 = vld [vmem:[%s8736_s24 + $0xd90] sm:$0xf]  ;;  %v7140_v6 = vor.u32 %v8080_v0, %v7139_v59  ;;  %4351 = vmatpush.bf16.msrb.mxu0 %v6884_v5  ;;  %v4138_v5 = vpop.f32.mrf.mxu3 }
 0x2e0   : > { %v8144_v2 = vld [vmem:[%s8736_s24 + $0xdac] sm:$0xf0] }
 0x2e1   : > { %v7651_v3 = vld [vmem:[%s8736_s24 + $0xf90] sm:$0xf]  ;;  %v7396_v7 = vor.u32 %v8144_v2, %v7395_v1  ;;  %4364 = vmatpush.bf16.msrb.mxu1 %v7140_v6 }
 0x2e2   : > { %v8208_v4 = vld [vmem:[%s8736_s24 + $0xfac] sm:$0xf0] }
 0x2e3   : > { %v6851_v9 = vld [vmem:[%s8736_s24 + $0x950] sm:$0xf]  ;;  %v7652_v12 = vor.u32 %v8208_v4, %v7651_v3  ;;  %4377 = vmatpush.bf16.msrb.mxu2 %v7396_v7  ;;  %v4126_v4 = vadd.f32 %v4125_v62, %v4113_v49  ;;  %v7756_v62 = vld [vmem:[%s8736_s24 + $0x194] sm:$0xf] }
 0x2e4   : > { %v8008_v10 = vld [vmem:[%s8736_s24 + $0x96c] sm:$0xf0] }
 0x2e5   : > { %v7107_v11 = vld [vmem:[%s8736_s24 + $0xb50] sm:$0xf]  ;;  %v6852_v18 = vor.u32 %v8008_v10, %v6851_v9  ;;  %4390 = vmatpush.bf16.msrb.mxu3 %v7652_v12  ;;  %v9477_v10 = vadd.f32 %v4138_v5, %v4126_v4  ;;  %v7884_v4 = vld [vmem:[%s8736_s24 + $0x594] sm:$0xf] }
 0x2e6   : > { %v8072_v13 = vld [vmem:[%s8736_s24 + $0xb6c] sm:$0xf0]  ;;  %v4127_v34 = vpop.f32.mrf.mxu2  ;;  %v6373_v5 = vld [vmem:[%s8736_s24 + $0x5b0] sm:$0xf0] }
 0x2e7   : > { %v7363_v14 = vld [vmem:[%s8736_s24 + $0xd50] sm:$0xf]  ;;  %v7108_v20 = vor.u32 %v8072_v13, %v7107_v11  ;;  %4352 = vmatpush.bf16.msrb.mxu0 %v6852_v18  ;;  %v4101_v11 = vpop.f32.mrf.mxu0  ;;  %v7932_v34 = vld [vmem:[%s8736_s24 + $0x714] sm:$0xf] }
 0x2e8   : > { %v8136_v15 = vld [vmem:[%s8736_s24 + $0xd6c] sm:$0xf0] }
 0x2e9   : > { %v7619_v16 = vld [vmem:[%s8736_s24 + $0xf50] sm:$0xf]  ;;  %v7364_v21 = vor.u32 %v8136_v15, %v7363_v14  ;;  %4365 = vmatpush.bf16.msrb.mxu1 %v7108_v20 }
 0x2ea   : > { %v8200_v17 = vld [vmem:[%s8736_s24 + $0xf6c] sm:$0xf0] }
 0x2eb   : > { %v6819_v19 = vld [vmem:[%s8736_s24 + $0x910] sm:$0xf]  ;;  %v7620_v28 = vor.u32 %v8200_v17, %v7619_v16  ;;  %4378 = vmatpush.bf16.msrb.mxu2 %v7364_v21  ;;  %v4114_v17 = vpop.f32.mrf.mxu1 }
 0x2ec   : > { %v8000_v24 = vld [vmem:[%s8736_s24 + $0x92c] sm:$0xf0]  ;;  %v6085_v17 = vld [vmem:[%s8736_s24 + $0x370] sm:$0xf0] }
 0x2ed   : > { %v7075_v25 = vld [vmem:[%s8736_s24 + $0xb10] sm:$0xf]  ;;  %v6820_v51 = vor.u32 %v8000_v24, %v6819_v19  ;;  %4391 = vmatpush.bf16.msrb.mxu3 %v7620_v28 }
 0x2ee   : > { %v8064_v29 = vld [vmem:[%s8736_s24 + $0xb2c] sm:$0xf0] }
 0x2ef   : > { %v7331_v30 = vld [vmem:[%s8736_s24 + $0xd10] sm:$0xf]  ;;  %v7076_v35 = vor.u32 %v8064_v29, %v7075_v25  ;;  %4353 = vmatpush.bf16.msrb.mxu0 %v6820_v51 }
 0x2f0   : > { %v8128_v31 = vld [vmem:[%s8736_s24 + $0xd2c] sm:$0xf0] }
 0x2f1   : > { %v7587_v32 = vld [vmem:[%s8736_s24 + $0xf10] sm:$0xf]  ;;  %v7332_v36 = vor.u32 %v8128_v31, %v7331_v30  ;;  %4366 = vmatpush.bf16.msrb.mxu1 %v7076_v35 }
 0x2f2   : > { %v8192_v33 = vld [vmem:[%s8736_s24 + $0xf2c] sm:$0xf0] }
 0x2f3   : > { %v6787_v37 = vld [vmem:[%s8736_s24 + $0x8d0] sm:$0xf]  ;;  %v7588_v42 = vor.u32 %v8192_v33, %v7587_v32  ;;  %4379 = vmatpush.bf16.msrb.mxu2 %v7332_v36 }
 0x2f4   : > { %v7992_v38 = vld [vmem:[%s8736_s24 + $0x8ec] sm:$0xf0] }
 0x2f5   : > { %v7043_v39 = vld [vmem:[%s8736_s24 + $0xad0] sm:$0xf]  ;;  %v6788_v50 = vor.u32 %v7992_v38, %v6787_v37  ;;  %4392 = vmatpush.bf16.msrb.mxu3 %v7588_v42  ;;  %v7828_v42 = vld [vmem:[%s8736_s24 + $0x3d4] sm:$0xf] }
 0x2f6   : > { %v8056_v43 = vld [vmem:[%s8736_s24 + $0xaec] sm:$0xf0] }
 0x2f7   : > { %v7299_v44 = vld [vmem:[%s8736_s24 + $0xcd0] sm:$0xf]  ;;  %v7044_v55 = vor.u32 %v8056_v43, %v7043_v39  ;;  %4354 = vmatpush.bf16.msrb.mxu0 %v6788_v50  ;;  %v4140_v39 = vpop.f32.mrf.mxu3  ;;  %v7956_v50 = vld [vmem:[%s8736_s24 + $0x7d4] sm:$0xf] }
 0x2f8   : > { %v8120_v45 = vld [vmem:[%s8736_s24 + $0xcec] sm:$0xf0] }
 0x2f9   : > { %v7555_v8 = vld [vmem:[%s8736_s24 + $0xed0] sm:$0xf]  ;;  %v7300_v56 = vor.u32 %v8120_v45, %v7299_v44  ;;  %4367 = vmatpush.bf16.msrb.mxu1 %v7044_v55  ;;  %v6149_v44 = vld [vmem:[%s8736_s24 + $0x3f0] sm:$0xf0] }
 0x2fa   : > { %v8184_v48 = vld [vmem:[%s8736_s24 + $0xeec] sm:$0xf0]  ;;  %v7892_v45 = vld [vmem:[%s8736_s24 + $0x5d4] sm:$0xf] }
 0x2fb   : > { %v6755_v57 = vld [vmem:[%s8736_s24 + $0x890] sm:$0xf]  ;;  %v7556_v0 = vor.u32 %v8184_v48, %v7555_v8  ;;  %4380 = vmatpush.bf16.msrb.mxu2 %v7300_v56  ;;  %v6405_v8 = vld [vmem:[%s8736_s24 + $0x5f0] sm:$0xf0] }
 0x2fc   : > { %v7984_v58 = vld [vmem:[%s8736_s24 + $0x8ac] sm:$0xf0]  ;;  %v6661_v55 = vld [vmem:[%s8736_s24 + $0x7f0] sm:$0xf0] }
 0x2fd   : > { %v7011_v59 = vld [vmem:[%s8736_s24 + $0xa90] sm:$0xf]  ;;  %v6756_v9 = vor.u32 %v7984_v58, %v6755_v57  ;;  %4393 = vmatpush.bf16.msrb.mxu3 %v7556_v0  ;;  %v5896_v57 = vor.u32 %v7764_v40, %v5893_v41  ;;  %v6152_v58 = vor.u32 %v7828_v42, %v6149_v44  ;;  %v5861_v0 = vld [vmem:[%s8736_s24 + $0x1b0] sm:$0xf0]  ;;  %v4164_v44 = vpop.f32.mrf.mxu1 }
 0x2fe   : > { %v8048_v1 = vld [vmem:[%s8736_s24 + $0xaac] sm:$0xf0]  ;;  %v7732_v41 = vld [vmem:[%s8736_s24 + $0xd4] sm:$0xf] }
 0x2ff   : > { %v7267_v2 = vld [vmem:[%s8736_s24 + $0xc90] sm:$0xf]  ;;  %v7012_v12 = vor.u32 %v8048_v1, %v7011_v59  ;;  %4355 = vmatpush.bf16.msrb.mxu0 %v6756_v9  ;;  %v6408_v59 = vor.u32 %v7892_v45, %v6405_v8  ;;  %v7820_v1 = vld [vmem:[%s8736_s24 + $0x394] sm:$0xf]  ;;  %v5864_v9 = vor.u32 %v7756_v62, %v5861_v0 }
 0x300   : > { %v8112_v3 = vld [vmem:[%s8736_s24 + $0xcac] sm:$0xf0]  ;;  %v5765_v42 = vld [vmem:[%s8736_s24 + $0xf0] sm:$0xf0] }
 0x301   : > { %v7523_v6 = vld [vmem:[%s8736_s24 + $0xe90] sm:$0xf]  ;;  %v7268_v13 = vor.u32 %v8112_v3, %v7267_v2  ;;  %4368 = vmatpush.bf16.msrb.mxu1 %v7012_v12  ;;  %v6664_v2 = vor.u32 %v7956_v50, %v6661_v55  ;;  %v6117_v3 = vld [vmem:[%s8736_s24 + $0x3b0] sm:$0xf0]  ;;  %v6376_v12 = vor.u32 %v7884_v4, %v6373_v5 }
 0x302   : > { %v8176_v7 = vld [vmem:[%s8736_s24 + $0xeac] sm:$0xf0]  ;;  %v6120_v11 = vor.u32 %v7820_v1, %v6117_v3  ;;  %v6021_v8 = vld [vmem:[%s8736_s24 + $0x2f0] sm:$0xf0] }
 0x303   : > { %v6723_v14 = vld [vmem:[%s8736_s24 + $0x850] sm:$0xf]  ;;  %v7524_v18 = vor.u32 %v8176_v7, %v7523_v6  ;;  %4381 = vmatpush.bf16.msrb.mxu2 %v7268_v13  ;;  %v7948_v6 = vld [vmem:[%s8736_s24 + $0x794] sm:$0xf] }
 0x304   : > { %v7976_v15 = vld [vmem:[%s8736_s24 + $0x86c] sm:$0xf0]  ;;  %v6629_v7 = vld [vmem:[%s8736_s24 + $0x7b0] sm:$0xf0] }
 0x305   : > { %v6979_v16 = vld [vmem:[%s8736_s24 + $0xa50] sm:$0xf]  ;;  %v6724_v27 = vor.u32 %v7976_v15, %v6723_v14  ;;  %4394 = vmatpush.bf16.msrb.mxu3 %v7524_v18  ;;  %v7748_v13 = vld [vmem:[%s8736_s24 + $0x154] sm:$0xf] }
 0x306   : > { %v8040_v19 = vld [vmem:[%s8736_s24 + $0xa6c] sm:$0xf0]  ;;  %v5829_v14 = vld [vmem:[%s8736_s24 + $0x170] sm:$0xf0] }
 0x307   : > { %v7235_v20 = vld [vmem:[%s8736_s24 + $0xc50] sm:$0xf]  ;;  %v6980_v30 = vor.u32 %v8040_v19, %v6979_v16  ;;  %4356 = vmatpush.bf16.msrb.mxu0 %v6724_v27  ;;  %v7812_v15 = vld [vmem:[%s8736_s24 + $0x354] sm:$0xf]  ;;  %v6632_v16 = vor.u32 %v7948_v6, %v6629_v7  ;;  %v4190_v7 = vpop.f32.mrf.mxu3 }
 0x308   : > { %v8104_v21 = vld [vmem:[%s8736_s24 + $0xc6c] sm:$0xf0]  ;;  %v7876_v18 = vld [vmem:[%s8736_s24 + $0x554] sm:$0xf] }
 0x309   : > { %v7491_v24 = vld [vmem:[%s8736_s24 + $0xe50] sm:$0xf]  ;;  %v7236_v31 = vor.u32 %v8104_v21, %v7235_v20  ;;  %4369 = vmatpush.bf16.msrb.mxu1 %v6980_v30  ;;  %v6341_v19 = vld [vmem:[%s8736_s24 + $0x570] sm:$0xf0] }
 0x30a   : > { %v8168_v25 = vld [vmem:[%s8736_s24 + $0xe6c] sm:$0xf0]  ;;  %v7940_v20 = vld [vmem:[%s8736_s24 + $0x754] sm:$0xf]  ;;  %v6344_v27 = vor.u32 %v7876_v18, %v6341_v19 }
 0x30b   : > { %v6691_v28 = vld [vmem:[%s8736_s24 + $0x810] sm:$0xf]  ;;  %v7492_v35 = vor.u32 %v8168_v25, %v7491_v24  ;;  %4382 = vmatpush.bf16.msrb.mxu2 %v7236_v31  ;;  %v6597_v21 = vld [vmem:[%s8736_s24 + $0x770] sm:$0xf0]  ;;  %v5832_v24 = vor.u32 %v7748_v13, %v5829_v14  ;;  %v6088_v25 = vor.u32 %v7812_v15, %v6085_v17 }
 0x30c   : > { %v7968_v29 = vld [vmem:[%s8736_s24 + $0x82c] sm:$0xf0]  ;;  %v7804_v30 = vld [vmem:[%s8736_s24 + $0x314] sm:$0xf]  ;;  %v6600_v31 = vor.u32 %v7940_v20, %v6597_v21 }
 0x30d   : > { %v6947_v32 = vld [vmem:[%s8736_s24 + $0xa10] sm:$0xf]  ;;  %v6692_v43 = vor.u32 %v7968_v29, %v6691_v28  ;;  %4395 = vmatpush.bf16.msrb.mxu3 %v7492_v35  ;;  %v7740_v28 = vld [vmem:[%s8736_s24 + $0x114] sm:$0xf] }
 0x30e   : > { %v8032_v33 = vld [vmem:[%s8736_s24 + $0xa2c] sm:$0xf0]  ;;  %v5797_v29 = vld [vmem:[%s8736_s24 + $0x130] sm:$0xf0] }
 0x30f   : > { %v7203_v51 = vld [vmem:[%s8736_s24 + $0xc10] sm:$0xf]  ;;  %v6948_v48 = vor.u32 %v8032_v33, %v6947_v32  ;;  %4357 = vmatpush.bf16.msrb.mxu0 %v6692_v43  ;;  %v6053_v32 = vld [vmem:[%s8736_s24 + $0x330] sm:$0xf0] }
 0x310   : > { %v8096_v36 = vld [vmem:[%s8736_s24 + $0xc2c] sm:$0xf0]  ;;  %v7868_v33 = vld [vmem:[%s8736_s24 + $0x514] sm:$0xf] }
 0x311   : > { %v7459_v37 = vld [vmem:[%s8736_s24 + $0xe10] sm:$0xf]  ;;  %v7204_v49 = vor.u32 %v8096_v36, %v7203_v51  ;;  %4370 = vmatpush.bf16.msrb.mxu1 %v6948_v48  ;;  %v6309_v51 = vld [vmem:[%s8736_s24 + $0x530] sm:$0xf0]  ;;  %v5800_v36 = vor.u32 %v7740_v28, %v5797_v29 }
 0x312   : > { %v8160_v38 = vld [vmem:[%s8736_s24 + $0xe2c] sm:$0xf0]  ;;  %4358 = vmatmul.bf16.vlgmr.msrb.gmra.mxu0 %v8943_v60  ;;  %v6565_v35 = vld [vmem:[%s8736_s24 + $0x730] sm:$0xf0]  ;;  %v6312_v39 = vor.u32 %v7868_v33, %v6309_v51 }
 0x313   : > { %v7460_v56 = vor.u32 %v8160_v38, %v7459_v37  ;;  %4383 = vmatpush.bf16.msrb.mxu2 %v7204_v49  ;;  %4402 = vmatpush.bf16.msra.mxu0 %v5896_v57  ;;  %v4151_v37 = vpop.f32.mrf.mxu0  ;;  %v6056_v38 = vor.u32 %v7804_v30, %v6053_v32  ;;  %v7796_v43 = vld [vmem:[%s8736_s24 + $0x2d4] sm:$0xf]  ;;  %v6568_v45 = vor.u32 %v7932_v34, %v6565_v35 }
 0x314   : > { %4371 = vmatmul.bf16.vlgmr.msrb.gmra.mxu1 %v8947_v63  ;;  %v4152_v40 = vadd.f32 %v4151_v37, %v9477_v10  ;;  %v7860_v48 = vld [vmem:[%s8736_s24 + $0x4d4] sm:$0xf]  ;;  %v5768_v10 = vor.u32 %v7732_v41, %v5765_v42  ;;  %v6024_v57 = vor.u32 %v7796_v43, %v6021_v8 }
 0x315   : > { %4396 = vmatpush.bf16.msrb.mxu3 %v7460_v56  ;;  %4415 = vmatpush.bf16.msra.mxu1 %v6152_v58  ;;  %v6277_v49 = vld [vmem:[%s8736_s24 + $0x4f0] sm:$0xf0] }
 0x316   : > { %4384 = vmatmul.bf16.vlgmr.msrb.gmra.mxu2 %v8936_v54  ;;  %v7924_v50 = vld [vmem:[%s8736_s24 + $0x6d4] sm:$0xf]  ;;  %v4165_v56 = vadd.f32 %v4164_v44, %v4152_v40  ;;  %v6280_v58 = vor.u32 %v7860_v48, %v6277_v49  ;;  %v4192_v44 = vpop.f32.mrf.mxu3 }
 0x317   : > { %4428 = vmatpush.bf16.msra.mxu2 %v6408_v59  ;;  %4403 = vmatpush.bf16.msra.mxu0 %v5864_v9  ;;  %v6533_v55 = vld [vmem:[%s8736_s24 + $0x6f0] sm:$0xf0]  ;;  %v4177_v59 = vpop.f32.mrf.mxu2 }
 0x318   : > { %4397 = vmatmul.bf16.vlgmr.msrb.gmra.mxu3 %v8945_v61  ;;  %v7724_v62 = vld [vmem:[%s8736_s24 + $0x94] sm:$0xf]  ;;  %v4178_v3 = vadd.f32 %v4177_v59, %v4165_v56 }
 0x319   : > { %4441 = vmatpush.bf16.msra.mxu3 %v6664_v2  ;;  %4416 = vmatpush.bf16.msra.mxu1 %v6120_v11  ;;  %v5733_v0 = vld [vmem:[%s8736_s24 + $0xb0] sm:$0xf0]  ;;  %v6536_v2 = vor.u32 %v7924_v50, %v6533_v55 }
 0x31a   : > { %v7788_v1 = vld [vmem:[%s8736_s24 + $0x294] sm:$0xf]  ;;  %v4191_v13 = vadd.f32 %v4190_v7, %v4178_v3 }
 0x31b   : > { %4429 = vmatpush.bf16.msra.mxu2 %v6376_v12  ;;  %4404 = vmatpush.bf16.msra.mxu0 %v5832_v24  ;;  %v5989_v4 = vld [vmem:[%s8736_s24 + $0x2b0] sm:$0xf0]  ;;  %v5736_v12 = vor.u32 %v7724_v62, %v5733_v0  ;;  %v4166_v24 = vpop.f32.mrf.mxu1 }
 0x31c   : > { %v7852_v5 = vld [vmem:[%s8736_s24 + $0x494] sm:$0xf]  ;;  %v5992_v17 = vor.u32 %v7788_v1, %v5989_v4  ;;  %vm4716_vm6 = vcmp.gt.f32.partialorder %v4191_v13, 0.0 }
 0x31d   : > { %4442 = vmatpush.bf16.msra.mxu3 %v6632_v16  ;;  %4417 = vmatpush.bf16.msra.mxu1 %v6088_v25  ;;  %v6245_v6 = vld [vmem:[%s8736_s24 + $0x4b0] sm:$0xf0]  ;;  %v4153_v16 = vpop.f32.mrf.mxu0 }
 0x31e   : > { %v7916_v9 = vld [vmem:[%s8736_s24 + $0x694] sm:$0xf]  ;;  %v6248_v18 = vor.u32 %v7852_v5, %v6245_v6 }
 0x31f   : > { %4430 = vmatpush.bf16.msra.mxu2 %v6344_v27  ;;  %4405 = vmatpush.bf16.msra.mxu0 %v5800_v36  ;;  %v6501_v11 = vld [vmem:[%s8736_s24 + $0x6b0] sm:$0xf0]  ;;  %v4724_v27 = vmul.f32 0.01, %v4191_v13 }
 0x320   : > { %v7716_v14 = vld [vmem:[%s8736_s24 + $0x54] sm:$0xf]  ;;  %v6504_v25 = vor.u32 %v7916_v9, %v6501_v11 }
 0x321   : > { %4443 = vmatpush.bf16.msra.mxu3 %v6600_v31  ;;  %4418 = vmatpush.bf16.msra.mxu1 %v6056_v38  ;;  %v5701_v15 = vld [vmem:[%s8736_s24 + $0x70] sm:$0xf0]  ;;  %v9556_v31 = vsel %vm4716_vm6, %v4191_v13, %v4724_v27 }
 0x322   : > { %v7780_v19 = vld [vmem:[%s8736_s24 + $0x254] sm:$0xf]  ;;  %v5704_v32 = vor.u32 %v7716_v14, %v5701_v15 }
 0x323   : > { %4431 = vmatpush.bf16.msra.mxu2 %v6312_v39  ;;  %4406 = vmatpush.bf16.msra.mxu0 %v5768_v10  ;;  %v5957_v20 = vld [vmem:[%s8736_s24 + $0x270] sm:$0xf0]  ;;  %v4179_v39 = vpop.f32.mrf.mxu2 }
 0x324   : > { %v7844_v21 = vld [vmem:[%s8736_s24 + $0x454] sm:$0xf]  ;;  %v5960_v34 = vor.u32 %v7780_v19, %v5957_v20 }
 0x325   : > { %4444 = vmatpush.bf16.msra.mxu3 %v6568_v45  ;;  %4419 = vmatpush.bf16.msra.mxu1 %v6024_v57  ;;  %v6213_v28 = vld [vmem:[%s8736_s24 + $0x470] sm:$0xf0] }
 0x326   : > { %v7908_v29 = vld [vmem:[%s8736_s24 + $0x654] sm:$0xf]  ;;  %v6216_v35 = vor.u32 %v7844_v21, %v6213_v28 }
 0x327   : > { %4432 = vmatpush.bf16.msra.mxu2 %v6280_v58  ;;  %v6469_v30 = vld [vmem:[%s8736_s24 + $0x670] sm:$0xf0]  ;;  %4407 = vmatpush.bf16.msra.mxu0 %v5736_v12 }
 0x328   : > { %v7708_v33 = vld [vmem:[%s8736_s24 + $0x14] sm:$0xf]  ;;  %v6472_v40 = vor.u32 %v7908_v29, %v6469_v30 }
 0x329   : > { %4445 = vmatpush.bf16.msra.mxu3 %v6536_v2  ;;  %v5669_v51 = vld [vmem:[%s8736_s24 + $0x30] sm:$0xf0]  ;;  %4420 = vmatpush.bf16.msra.mxu1 %v5992_v17 }
 0x32a   : > { %v7772_v36 = vld [vmem:[%s8736_s24 + $0x214] sm:$0xf]  ;;  %v5672_v49 = vor.u32 %v7708_v33, %v5669_v51 }
 0x32b   : > { %4433 = vmatpush.bf16.msra.mxu2 %v6248_v18  ;;  %v5925_v37 = vld [vmem:[%s8736_s24 + $0x230] sm:$0xf0]  ;;  %4408 = vmatpush.bf16.msra.mxu0 %v5704_v32 }
 0x32c   : > { %v7836_v38 = vld [vmem:[%s8736_s24 + $0x414] sm:$0xf]  ;;  %v5928_v10 = vor.u32 %v7772_v36, %v5925_v37 }
 0x32d   : > { %4446 = vmatpush.bf16.msra.mxu3 %v6504_v25  ;;  %v6181_v41 = vld [vmem:[%s8736_s24 + $0x430] sm:$0xf0]  ;;  %4421 = vmatpush.bf16.msra.mxu1 %v5960_v34 }
 0x32e   : > { %v7900_v42 = vld [vmem:[%s8736_s24 + $0x614] sm:$0xf]  ;;  %v6184_v57 = vor.u32 %v7836_v38, %v6181_v41 }
 0x32f   : > { %v6437_v43 = vld [vmem:[%s8736_s24 + $0x630] sm:$0xf0]  ;;  %4434 = vmatpush.bf16.msra.mxu2 %v6216_v35  ;;  %4409 = vmatpush.bf16.msra.mxu0 %v5672_v49  ;;  %v1309_v35 = vperm.slane %v9453_v26, 3 }
 0x330   : > { %v8020_v45 = vld [vmem:[%s8736_s24 + $0x9d4] sm:$0xf]  ;;  %v6440_v62 = vor.u32 %v7900_v42, %v6437_v43  ;;  %v4203_v43 = vpop.f32.mrf.mxu0 }
 0x331   : > { %v6917_v8 = vld [vmem:[%s8736_s24 + $0x9f0] sm:$0xf0]  ;;  %4447 = vmatpush.bf16.msra.mxu3 %v6472_v40  ;;  %4422 = vmatpush.bf16.msra.mxu1 %v5928_v10  ;;  %v4204_v49 = vadd.f32 %v4203_v43, %v1309_v35 }
 0x332   : > { %v8084_v48 = vld [vmem:[%s8736_s24 + $0xbd4] sm:$0xf]  ;;  %v6920_v0 = vor.u32 %v8020_v45, %v6917_v8  ;;  %4410 = vmatmul.bf16.vlgmr.msra.gmra.mxu0 %v8889_v47 }
 0x333   : > { %v7173_v50 = vld [vmem:[%s8736_s24 + $0xbf0] sm:$0xf0]  ;;  %4435 = vmatpush.bf16.msra.mxu2 %v6184_v57 }
 0x334   : > { %v8148_v55 = vld [vmem:[%s8736_s24 + $0xdd4] sm:$0xf]  ;;  %v7176_v1 = vor.u32 %v8084_v48, %v7173_v50  ;;  %4454 = vmatpush.bf16.msrb.mxu0 %v6920_v0  ;;  %4423 = vmatmul.bf16.vlgmr.msra.gmra.mxu1 %v8895_v53  ;;  %v4216_v50 = vpop.f32.mrf.mxu1 }
 0x335   : > { %v7429_v56 = vld [vmem:[%s8736_s24 + $0xdf0] sm:$0xf0]  ;;  %4448 = vmatpush.bf16.msra.mxu3 %v6440_v62  ;;  %v4217_v62 = vadd.f32 %v4216_v50, %v4204_v49  ;;  %v5899_v49 = vld [vmem:[%s8736_s24 + $0x1d8] sm:$0xf] }
 0x336   : > { %v8212_v58 = vld [vmem:[%s8736_s24 + $0xfd4] sm:$0xf]  ;;  %v7432_v2 = vor.u32 %v8148_v55, %v7429_v56  ;;  %4467 = vmatpush.bf16.msrb.mxu1 %v7176_v1  ;;  %4436 = vmatmul.bf16.vlgmr.msra.gmra.mxu2 %v8887_v46  ;;  %v7769_v50 = vld [vmem:[%s8736_s24 + $0x1f4] sm:$0xf0] }
 0x337   : > { %v7685_v59 = vld [vmem:[%s8736_s24 + $0xff0] sm:$0xf0] }
 0x338   : > { %v8012_v3 = vld [vmem:[%s8736_s24 + $0x994] sm:$0xf]  ;;  %v7688_v6 = vor.u32 %v8212_v58, %v7685_v59  ;;  %4480 = vmatpush.bf16.msrb.mxu2 %v7432_v2  ;;  %4449 = vmatmul.bf16.vlgmr.msra.gmra.mxu3 %v8893_v52 }
 0x339   : > { %v6885_v4 = vld [vmem:[%s8736_s24 + $0x9b0] sm:$0xf0] }
 0x33a   : > { %v8076_v5 = vld [vmem:[%s8736_s24 + $0xb94] sm:$0xf]  ;;  %v6888_v14 = vor.u32 %v8012_v3, %v6885_v4  ;;  %4493 = vmatpush.bf16.msrb.mxu3 %v7688_v6  ;;  %v4229_v6 = vpop.f32.mrf.mxu2 }
 0x33b   : > { %v7141_v7 = vld [vmem:[%s8736_s24 + $0xbb0] sm:$0xf0] }
 0x33c   : > { %v8140_v9 = vld [vmem:[%s8736_s24 + $0xd94] sm:$0xf]  ;;  %v7144_v15 = vor.u32 %v8076_v5, %v7141_v7  ;;  %4455 = vmatpush.bf16.msrb.mxu0 %v6888_v14  ;;  %v4242_v14 = vpop.f32.mrf.mxu3 }
 0x33d   : > { %v7397_v11 = vld [vmem:[%s8736_s24 + $0xdb0] sm:$0xf0] }
 0x33e   : > { %v8204_v12 = vld [vmem:[%s8736_s24 + $0xf94] sm:$0xf]  ;;  %v7400_v16 = vor.u32 %v8140_v9, %v7397_v11  ;;  %4468 = vmatpush.bf16.msrb.mxu1 %v7144_v15 }
 0x33f   : > { %v7653_v13 = vld [vmem:[%s8736_s24 + $0xfb0] sm:$0xf0] }
 0x340   : > { %v8004_v17 = vld [vmem:[%s8736_s24 + $0x954] sm:$0xf]  ;;  %v7656_v20 = vor.u32 %v8204_v12, %v7653_v13  ;;  %4481 = vmatpush.bf16.msrb.mxu2 %v7400_v16  ;;  %v4230_v13 = vadd.f32 %v4229_v6, %v4217_v62  ;;  %v5867_v6 = vld [vmem:[%s8736_s24 + $0x198] sm:$0xf] }
 0x341   : > { %v6853_v18 = vld [vmem:[%s8736_s24 + $0x970] sm:$0xf0] }
 0x342   : > { %v8068_v19 = vld [vmem:[%s8736_s24 + $0xb54] sm:$0xf]  ;;  %v6856_v29 = vor.u32 %v8004_v17, %v6853_v18  ;;  %4494 = vmatpush.bf16.msrb.mxu3 %v7656_v20  ;;  %v9619_v18 = vadd.f32 %v4242_v14, %v4230_v13  ;;  %v4231_v43 = vpop.f32.mrf.mxu2  ;;  %v6379_v13 = vld [vmem:[%s8736_s24 + $0x598] sm:$0xf] }
 0x343   : > { %v7109_v21 = vld [vmem:[%s8736_s24 + $0xb70] sm:$0xf0]  ;;  %v7889_v14 = vld [vmem:[%s8736_s24 + $0x5b4] sm:$0xf0] }
 0x344   : > { %v8132_v24 = vld [vmem:[%s8736_s24 + $0xd54] sm:$0xf]  ;;  %v7112_v32 = vor.u32 %v8068_v19, %v7109_v21  ;;  %4456 = vmatpush.bf16.msrb.mxu0 %v6856_v29  ;;  %v4205_v19 = vpop.f32.mrf.mxu0  ;;  %v6571_v43 = vld [vmem:[%s8736_s24 + $0x718] sm:$0xf] }
 0x345   : > { %v7365_v25 = vld [vmem:[%s8736_s24 + $0xd70] sm:$0xf0] }
 0x346   : > { %v8196_v27 = vld [vmem:[%s8736_s24 + $0xf54] sm:$0xf]  ;;  %v7368_v33 = vor.u32 %v8132_v24, %v7365_v25  ;;  %4469 = vmatpush.bf16.msrb.mxu1 %v7112_v32 }
 0x347   : > { %v7621_v28 = vld [vmem:[%s8736_s24 + $0xf70] sm:$0xf0] }
 0x348   : > { %v7996_v30 = vld [vmem:[%s8736_s24 + $0x914] sm:$0xf]  ;;  %v7624_v36 = vor.u32 %v8196_v27, %v7621_v28  ;;  %4482 = vmatpush.bf16.msrb.mxu2 %v7368_v33  ;;  %v4218_v28 = vpop.f32.mrf.mxu1 }
 0x349   : > { %v6821_v51 = vld [vmem:[%s8736_s24 + $0x930] sm:$0xf0]  ;;  %v7817_v28 = vld [vmem:[%s8736_s24 + $0x374] sm:$0xf0] }
 0x34a   : > { %v8060_v34 = vld [vmem:[%s8736_s24 + $0xb14] sm:$0xf]  ;;  %v6824_v42 = vor.u32 %v7996_v30, %v6821_v51  ;;  %4495 = vmatpush.bf16.msrb.mxu3 %v7624_v36 }
 0x34b   : > { %v7077_v37 = vld [vmem:[%s8736_s24 + $0xb30] sm:$0xf0] }
 0x34c   : > { %v8124_v38 = vld [vmem:[%s8736_s24 + $0xd14] sm:$0xf]  ;;  %v7080_v26 = vor.u32 %v8060_v34, %v7077_v37  ;;  %4457 = vmatpush.bf16.msrb.mxu0 %v6824_v42 }
 0x34d   : > { %v7333_v39 = vld [vmem:[%s8736_s24 + $0xd30] sm:$0xf0] }
 0x34e   : > { %v8188_v40 = vld [vmem:[%s8736_s24 + $0xf14] sm:$0xf]  ;;  %v7336_v44 = vor.u32 %v8124_v38, %v7333_v39  ;;  %4470 = vmatpush.bf16.msrb.mxu1 %v7080_v26 }
 0x34f   : > { %v7589_v41 = vld [vmem:[%s8736_s24 + $0xf30] sm:$0xf0] }
 0x350   : > { %v7988_v45 = vld [vmem:[%s8736_s24 + $0x8d4] sm:$0xf]  ;;  %v7592_v55 = vor.u32 %v8188_v40, %v7589_v41  ;;  %4483 = vmatpush.bf16.msrb.mxu2 %v7336_v44 }
 0x351   : > { %v6789_v8 = vld [vmem:[%s8736_s24 + $0x8f0] sm:$0xf0] }
 0x352   : > { %v8052_v48 = vld [vmem:[%s8736_s24 + $0xad4] sm:$0xf]  ;;  %v6792_v0 = vor.u32 %v7988_v45, %v6789_v8  ;;  %4496 = vmatpush.bf16.msrb.mxu3 %v7592_v55  ;;  %v6155_v55 = vld [vmem:[%s8736_s24 + $0x3d8] sm:$0xf] }
 0x353   : > { %v7045_v56 = vld [vmem:[%s8736_s24 + $0xaf0] sm:$0xf0] }
 0x354   : > { %v8116_v10 = vld [vmem:[%s8736_s24 + $0xcd4] sm:$0xf]  ;;  %v7048_v1 = vor.u32 %v8052_v48, %v7045_v56  ;;  %4458 = vmatpush.bf16.msrb.mxu0 %v6792_v0  ;;  %v4244_v48 = vpop.f32.mrf.mxu3  ;;  %v6667_v0 = vld [vmem:[%s8736_s24 + $0x7d8] sm:$0xf] }
 0x355   : > { %v7301_v57 = vld [vmem:[%s8736_s24 + $0xcf0] sm:$0xf0] }
 0x356   : > { %v8180_v58 = vld [vmem:[%s8736_s24 + $0xed4] sm:$0xf]  ;;  %v7304_v2 = vor.u32 %v8116_v10, %v7301_v57  ;;  %4471 = vmatpush.bf16.msrb.mxu1 %v7048_v1  ;;  %v7833_v10 = vld [vmem:[%s8736_s24 + $0x3f4] sm:$0xf0] }
 0x357   : > { %v7557_v59 = vld [vmem:[%s8736_s24 + $0xef0] sm:$0xf0]  ;;  %v6411_v57 = vld [vmem:[%s8736_s24 + $0x5d8] sm:$0xf] }
 0x358   : > { %v7980_v3 = vld [vmem:[%s8736_s24 + $0x894] sm:$0xf]  ;;  %v7560_v7 = vor.u32 %v8180_v58, %v7557_v59  ;;  %4484 = vmatpush.bf16.msrb.mxu2 %v7304_v2  ;;  %v7897_v58 = vld [vmem:[%s8736_s24 + $0x5f4] sm:$0xf0] }
 0x359   : > { %v6757_v4 = vld [vmem:[%s8736_s24 + $0x8b0] sm:$0xf0]  ;;  %v7961_v1 = vld [vmem:[%s8736_s24 + $0x7f4] sm:$0xf0] }
 0x35a   : > { %v8044_v5 = vld [vmem:[%s8736_s24 + $0xa94] sm:$0xf]  ;;  %v6760_v17 = vor.u32 %v7980_v3, %v6757_v4  ;;  %4497 = vmatpush.bf16.msrb.mxu3 %v7560_v7  ;;  %v5900_v3 = vor.u32 %v7769_v50, %v5899_v49  ;;  %v6156_v4 = vor.u32 %v7833_v10, %v6155_v55  ;;  %v7761_v7 = vld [vmem:[%s8736_s24 + $0x1b4] sm:$0xf0]  ;;  %v4268_v10 = vpop.f32.mrf.mxu1 }
 0x35b   : > { %v7013_v9 = vld [vmem:[%s8736_s24 + $0xab0] sm:$0xf0]  ;;  %v5771_v50 = vld [vmem:[%s8736_s24 + $0xd8] sm:$0xf] }
 0x35c   : > { %v8108_v11 = vld [vmem:[%s8736_s24 + $0xc94] sm:$0xf]  ;;  %v7016_v20 = vor.u32 %v8044_v5, %v7013_v9  ;;  %4459 = vmatpush.bf16.msrb.mxu0 %v6760_v17  ;;  %v6412_v5 = vor.u32 %v7897_v58, %v6411_v57  ;;  %v6123_v9 = vld [vmem:[%s8736_s24 + $0x398] sm:$0xf]  ;;  %v5868_v17 = vor.u32 %v7761_v7, %v5867_v6 }
 0x35d   : > { %v7269_v12 = vld [vmem:[%s8736_s24 + $0xcb0] sm:$0xf0]  ;;  %v7737_v55 = vld [vmem:[%s8736_s24 + $0xf4] sm:$0xf0] }
 0x35e   : > { %v8172_v15 = vld [vmem:[%s8736_s24 + $0xe94] sm:$0xf]  ;;  %v7272_v21 = vor.u32 %v8108_v11, %v7269_v12  ;;  %4472 = vmatpush.bf16.msrb.mxu1 %v7016_v20  ;;  %v6668_v11 = vor.u32 %v7961_v1, %v6667_v0  ;;  %v7825_v12 = vld [vmem:[%s8736_s24 + $0x3b4] sm:$0xf0]  ;;  %v6380_v20 = vor.u32 %v7889_v14, %v6379_v13 }
 0x35f   : > { %v7525_v16 = vld [vmem:[%s8736_s24 + $0xeb0] sm:$0xf0]  ;;  %v6124_v19 = vor.u32 %v7825_v12, %v6123_v9  ;;  %v7801_v58 = vld [vmem:[%s8736_s24 + $0x2f4] sm:$0xf0] }
 0x360   : > { %v7972_v24 = vld [vmem:[%s8736_s24 + $0x854] sm:$0xf]  ;;  %v7528_v29 = vor.u32 %v8172_v15, %v7525_v16  ;;  %4485 = vmatpush.bf16.msrb.mxu2 %v7272_v21  ;;  %v6635_v15 = vld [vmem:[%s8736_s24 + $0x798] sm:$0xf] }
 0x361   : > { %v6725_v25 = vld [vmem:[%s8736_s24 + $0x870] sm:$0xf0]  ;;  %v7953_v16 = vld [vmem:[%s8736_s24 + $0x7b4] sm:$0xf0] }
 0x362   : > { %v8036_v27 = vld [vmem:[%s8736_s24 + $0xa54] sm:$0xf]  ;;  %v6728_v35 = vor.u32 %v7972_v24, %v6725_v25  ;;  %4498 = vmatpush.bf16.msrb.mxu3 %v7528_v29  ;;  %v5835_v21 = vld [vmem:[%s8736_s24 + $0x158] sm:$0xf] }
 0x363   : > { %v6981_v30 = vld [vmem:[%s8736_s24 + $0xa70] sm:$0xf0]  ;;  %v7753_v24 = vld [vmem:[%s8736_s24 + $0x174] sm:$0xf0] }
 0x364   : > { %v8100_v32 = vld [vmem:[%s8736_s24 + $0xc54] sm:$0xf]  ;;  %v6984_v38 = vor.u32 %v8036_v27, %v6981_v30  ;;  %4460 = vmatpush.bf16.msrb.mxu0 %v6728_v35  ;;  %v6091_v25 = vld [vmem:[%s8736_s24 + $0x358] sm:$0xf]  ;;  %v6636_v27 = vor.u32 %v7953_v16, %v6635_v15  ;;  %v4294_v16 = vpop.f32.mrf.mxu3 }
 0x365   : > { %v7237_v33 = vld [vmem:[%s8736_s24 + $0xc70] sm:$0xf0]  ;;  %v6347_v29 = vld [vmem:[%s8736_s24 + $0x558] sm:$0xf] }
 0x366   : > { %v8164_v51 = vld [vmem:[%s8736_s24 + $0xe54] sm:$0xf]  ;;  %v7240_v39 = vor.u32 %v8100_v32, %v7237_v33  ;;  %4473 = vmatpush.bf16.msrb.mxu1 %v6984_v38  ;;  %v7881_v30 = vld [vmem:[%s8736_s24 + $0x574] sm:$0xf0] }
 0x367   : > { %v7493_v34 = vld [vmem:[%s8736_s24 + $0xe70] sm:$0xf0]  ;;  %v6603_v32 = vld [vmem:[%s8736_s24 + $0x758] sm:$0xf]  ;;  %v6348_v35 = vor.u32 %v7881_v30, %v6347_v29 }
 0x368   : > { %v7964_v36 = vld [vmem:[%s8736_s24 + $0x814] sm:$0xf]  ;;  %v7496_v26 = vor.u32 %v8164_v51, %v7493_v34  ;;  %4486 = vmatpush.bf16.msrb.mxu2 %v7240_v39  ;;  %v7945_v33 = vld [vmem:[%s8736_s24 + $0x774] sm:$0xf0]  ;;  %v5836_v51 = vor.u32 %v7753_v24, %v5835_v21  ;;  %v6092_v34 = vor.u32 %v7817_v28, %v6091_v25 }
 0x369   : > { %v6693_v37 = vld [vmem:[%s8736_s24 + $0x830] sm:$0xf0]  ;;  %v6059_v38 = vld [vmem:[%s8736_s24 + $0x318] sm:$0xf]  ;;  %v6604_v39 = vor.u32 %v7945_v33, %v6603_v32 }
 0x36a   : > { %v8028_v40 = vld [vmem:[%s8736_s24 + $0xa14] sm:$0xf]  ;;  %v6696_v56 = vor.u32 %v7964_v36, %v6693_v37  ;;  %4499 = vmatpush.bf16.msrb.mxu3 %v7496_v26  ;;  %v5803_v36 = vld [vmem:[%s8736_s24 + $0x118] sm:$0xf] }
 0x36b   : > { %v6949_v41 = vld [vmem:[%s8736_s24 + $0xa30] sm:$0xf0]  ;;  %v7745_v37 = vld [vmem:[%s8736_s24 + $0x134] sm:$0xf0] }
 0x36c   : > { %v8092_v42 = vld [vmem:[%s8736_s24 + $0xc14] sm:$0xf]  ;;  %v6952_v59 = vor.u32 %v8028_v40, %v6949_v41  ;;  %4461 = vmatpush.bf16.msrb.mxu0 %v6696_v56  ;;  %v7809_v40 = vld [vmem:[%s8736_s24 + $0x334] sm:$0xf0] }
 0x36d   : > { %v7205_v44 = vld [vmem:[%s8736_s24 + $0xc30] sm:$0xf0]  ;;  %v6315_v41 = vld [vmem:[%s8736_s24 + $0x518] sm:$0xf] }
 0x36e   : > { %v8156_v45 = vld [vmem:[%s8736_s24 + $0xe14] sm:$0xf]  ;;  %v7208_v62 = vor.u32 %v8092_v42, %v7205_v44  ;;  %4474 = vmatpush.bf16.msrb.mxu1 %v6952_v59  ;;  %v7873_v42 = vld [vmem:[%s8736_s24 + $0x534] sm:$0xf0]  ;;  %v5804_v44 = vor.u32 %v7745_v37, %v5803_v36 }
 0x36f   : > { %v7461_v8 = vld [vmem:[%s8736_s24 + $0xe30] sm:$0xf0]  ;;  %4462 = vmatmul.bf16.vlgmr.msrb.gmra.mxu0 %v8943_v60  ;;  %v7937_v26 = vld [vmem:[%s8736_s24 + $0x734] sm:$0xf0]  ;;  %v6316_v48 = vor.u32 %v7873_v42, %v6315_v41 }
 0x370   : > { %v7464_v2 = vor.u32 %v8156_v45, %v7461_v8  ;;  %4487 = vmatpush.bf16.msrb.mxu2 %v7208_v62  ;;  %4506 = vmatpush.bf16.msra.mxu0 %v5900_v3  ;;  %v4255_v45 = vpop.f32.mrf.mxu0  ;;  %v6060_v8 = vor.u32 %v7809_v40, %v6059_v38  ;;  %v6027_v56 = vld [vmem:[%s8736_s24 + $0x2d8] sm:$0xf]  ;;  %v6572_v57 = vor.u32 %v7937_v26, %v6571_v43 }
 0x371   : > { %4475 = vmatmul.bf16.vlgmr.msrb.gmra.mxu1 %v8947_v63  ;;  %v4256_v49 = vadd.f32 %v4255_v45, %v9619_v18  ;;  %v6283_v59 = vld [vmem:[%s8736_s24 + $0x4d8] sm:$0xf]  ;;  %v5772_v18 = vor.u32 %v7737_v55, %v5771_v50  ;;  %v6028_v3 = vor.u32 %v7801_v58, %v6027_v56 }
 0x372   : > { %4500 = vmatpush.bf16.msrb.mxu3 %v7464_v2  ;;  %4519 = vmatpush.bf16.msra.mxu1 %v6156_v4  ;;  %v7865_v62 = vld [vmem:[%s8736_s24 + $0x4f4] sm:$0xf0] }
 0x373   : > { %4488 = vmatmul.bf16.vlgmr.msrb.gmra.mxu2 %v8936_v54  ;;  %v6539_v0 = vld [vmem:[%s8736_s24 + $0x6d8] sm:$0xf]  ;;  %v4269_v2 = vadd.f32 %v4268_v10, %v4256_v49  ;;  %v6284_v4 = vor.u32 %v7865_v62, %v6283_v59  ;;  %v4296_v10 = vpop.f32.mrf.mxu3 }
 0x374   : > { %4532 = vmatpush.bf16.msra.mxu2 %v6412_v5  ;;  %4507 = vmatpush.bf16.msra.mxu0 %v5868_v17  ;;  %v7929_v1 = vld [vmem:[%s8736_s24 + $0x6f4] sm:$0xf0]  ;;  %v4281_v5 = vpop.f32.mrf.mxu2 }
 0x375   : > { %4501 = vmatmul.bf16.vlgmr.msrb.gmra.mxu3 %v8945_v61  ;;  %v5739_v6 = vld [vmem:[%s8736_s24 + $0x98] sm:$0xf]  ;;  %v4282_v12 = vadd.f32 %v4281_v5, %v4269_v2 }
 0x376   : > { %4545 = vmatpush.bf16.msra.mxu3 %v6668_v11  ;;  %4520 = vmatpush.bf16.msra.mxu1 %v6124_v19  ;;  %v7729_v7 = vld [vmem:[%s8736_s24 + $0xb4] sm:$0xf0]  ;;  %v6540_v11 = vor.u32 %v7929_v1, %v6539_v0 }
 0x377   : > { %v5995_v9 = vld [vmem:[%s8736_s24 + $0x298] sm:$0xf]  ;;  %v4295_v21 = vadd.f32 %v4294_v16, %v4282_v12 }
 0x378   : > { %4533 = vmatpush.bf16.msra.mxu2 %v6380_v20  ;;  %4508 = vmatpush.bf16.msra.mxu0 %v5836_v51  ;;  %v7793_v13 = vld [vmem:[%s8736_s24 + $0x2b4] sm:$0xf0]  ;;  %v5740_v20 = vor.u32 %v7729_v7, %v5739_v6  ;;  %v4270_v51 = vpop.f32.mrf.mxu1 }
 0x379   : > { %v6251_v14 = vld [vmem:[%s8736_s24 + $0x498] sm:$0xf]  ;;  %v5996_v28 = vor.u32 %v7793_v13, %v5995_v9  ;;  %vm4717_vm7 = vcmp.gt.f32.partialorder %v4295_v21, 0.0 }
 0x37a   : > { %4546 = vmatpush.bf16.msra.mxu3 %v6636_v27  ;;  %4521 = vmatpush.bf16.msra.mxu1 %v6092_v34  ;;  %v7857_v15 = vld [vmem:[%s8736_s24 + $0x4b4] sm:$0xf0]  ;;  %v4257_v27 = vpop.f32.mrf.mxu0 }
 0x37b   : > { %v6507_v17 = vld [vmem:[%s8736_s24 + $0x698] sm:$0xf]  ;;  %v6252_v29 = vor.u32 %v7857_v15, %v6251_v14 }
 0x37c   : > { %4534 = vmatpush.bf16.msra.mxu2 %v6348_v35  ;;  %4509 = vmatpush.bf16.msra.mxu0 %v5804_v44  ;;  %v7921_v19 = vld [vmem:[%s8736_s24 + $0x6b4] sm:$0xf0]  ;;  %v4725_v35 = vmul.f32 0.01, %v4295_v21 }
 0x37d   : > { %v5707_v24 = vld [vmem:[%s8736_s24 + $0x58] sm:$0xf]  ;;  %v6508_v34 = vor.u32 %v7921_v19, %v6507_v17 }
 0x37e   : > { %4547 = vmatpush.bf16.msra.mxu3 %v6604_v39  ;;  %4522 = vmatpush.bf16.msra.mxu1 %v6060_v8  ;;  %v7721_v25 = vld [vmem:[%s8736_s24 + $0x74] sm:$0xf0]  ;;  %v9698_v39 = vsel %vm4717_vm7, %v4295_v21, %v4725_v35 }
 0x37f   : > { %v5963_v30 = vld [vmem:[%s8736_s24 + $0x258] sm:$0xf]  ;;  %v5708_v40 = vor.u32 %v7721_v25, %v5707_v24 }
 0x380   : > { %4535 = vmatpush.bf16.msra.mxu2 %v6316_v48  ;;  %4510 = vmatpush.bf16.msra.mxu0 %v5772_v18  ;;  %v7785_v32 = vld [vmem:[%s8736_s24 + $0x274] sm:$0xf0]  ;;  %v4283_v48 = vpop.f32.mrf.mxu2 }
 0x381   : > { %v6219_v33 = vld [vmem:[%s8736_s24 + $0x458] sm:$0xf]  ;;  %v5964_v43 = vor.u32 %v7785_v32, %v5963_v30 }
 0x382   : > { %4548 = vmatpush.bf16.msra.mxu3 %v6572_v57  ;;  %4523 = vmatpush.bf16.msra.mxu1 %v6028_v3  ;;  %v7849_v36 = vld [vmem:[%s8736_s24 + $0x474] sm:$0xf0]  ;;  %v4307_v10 = vpop.f32.mrf.mxu0 }
 0x383   : > { %v6475_v37 = vld [vmem:[%s8736_s24 + $0x658] sm:$0xf]  ;;  %v6220_v26 = vor.u32 %v7849_v36, %v6219_v33 }
 0x384   : > { %4536 = vmatpush.bf16.msra.mxu2 %v6284_v4  ;;  %v7913_v38 = vld [vmem:[%s8736_s24 + $0x674] sm:$0xf0]  ;;  %4511 = vmatpush.bf16.msra.mxu0 %v5740_v20 }
 0x385   : > { %v5675_v41 = vld [vmem:[%s8736_s24 + $0x18] sm:$0xf]  ;;  %v6476_v49 = vor.u32 %v7913_v38, %v6475_v37 }
 0x386   : > { %4549 = vmatpush.bf16.msra.mxu3 %v6540_v11  ;;  %v7713_v42 = vld [vmem:[%s8736_s24 + $0x34] sm:$0xf0]  ;;  %4524 = vmatpush.bf16.msra.mxu1 %v5996_v28 }
 0x387   : > { %v5931_v44 = vld [vmem:[%s8736_s24 + $0x218] sm:$0xf]  ;;  %v5676_v62 = vor.u32 %v7713_v42, %v5675_v41 }
 0x388   : > { %4537 = vmatpush.bf16.msra.mxu2 %v6252_v29  ;;  %v7777_v45 = vld [vmem:[%s8736_s24 + $0x234] sm:$0xf0]  ;;  %4512 = vmatpush.bf16.msra.mxu0 %v5708_v40 }
 0x389   : > { %v6187_v8 = vld [vmem:[%s8736_s24 + $0x418] sm:$0xf]  ;;  %v5932_v18 = vor.u32 %v7777_v45, %v5931_v44 }
 0x38a   : > { %4550 = vmatpush.bf16.msra.mxu3 %v6508_v34  ;;  %v7841_v50 = vld [vmem:[%s8736_s24 + $0x434] sm:$0xf0]  ;;  %4525 = vmatpush.bf16.msra.mxu1 %v5964_v43 }
 0x38b   : > { %v6443_v55 = vld [vmem:[%s8736_s24 + $0x618] sm:$0xf]  ;;  %v6188_v3 = vor.u32 %v7841_v50, %v6187_v8 }
 0x38c   : > { %v7905_v56 = vld [vmem:[%s8736_s24 + $0x634] sm:$0xf0]  ;;  %4538 = vmatpush.bf16.msra.mxu2 %v6220_v26  ;;  %4513 = vmatpush.bf16.msra.mxu0 %v5676_v62  ;;  %v9740_v26 = vld [vmem:[%s8742_s15] sm:$0xff] }
 0x38d   : > { %v6923_v57 = vld [vmem:[%s8736_s24 + $0x9d8] sm:$0xf]  ;;  %v6444_v6 = vor.u32 %v7905_v56, %v6443_v55  ;;  %v1310_v44 = vperm.slane %v9740_v26, 4 }
 0x38e   : > { %v8025_v58 = vld [vmem:[%s8736_s24 + $0x9f4] sm:$0xf0]  ;;  %4551 = vmatpush.bf16.msra.mxu3 %v6476_v49  ;;  %4526 = vmatpush.bf16.msra.mxu1 %v5932_v18 }
 0x38f   : > { %v7179_v59 = vld [vmem:[%s8736_s24 + $0xbd8] sm:$0xf]  ;;  %v6924_v7 = vor.u32 %v8025_v58, %v6923_v57  ;;  %4514 = vmatmul.bf16.vlgmr.msra.gmra.mxu0 %v8889_v47 }
 0x390   : > { %v8089_v0 = vld [vmem:[%s8736_s24 + $0xbf4] sm:$0xf0]  ;;  %4539 = vmatpush.bf16.msra.mxu2 %v6188_v3 }
 0x391   : > { %v7435_v1 = vld [vmem:[%s8736_s24 + $0xdd8] sm:$0xf]  ;;  %v7180_v9 = vor.u32 %v8089_v0, %v7179_v59  ;;  %4558 = vmatpush.bf16.msrb.mxu0 %v6924_v7  ;;  %4527 = vmatmul.bf16.vlgmr.msra.gmra.mxu1 %v8895_v53 }
 0x392   : > { %v8153_v2 = vld [vmem:[%s8736_s24 + $0xdf4] sm:$0xf0]  ;;  %4552 = vmatpush.bf16.msra.mxu3 %v6444_v6 }
 0x393   : > { %v7691_v4 = vld [vmem:[%s8736_s24 + $0xfd8] sm:$0xf]  ;;  %v7436_v11 = vor.u32 %v8153_v2, %v7435_v1  ;;  %4571 = vmatpush.bf16.msrb.mxu1 %v7180_v9  ;;  %4540 = vmatmul.bf16.vlgmr.msra.gmra.mxu2 %v8887_v46  ;;  %v4308_v1 = vadd.f32 %v4307_v10, %v1310_v44  ;;  %v4320_v2 = vpop.f32.mrf.mxu1 }
 0x394   : > { %v8217_v5 = vld [vmem:[%s8736_s24 + $0xff4] sm:$0xf0] }
 0x395   : > { %v6891_v12 = vld [vmem:[%s8736_s24 + $0x998] sm:$0xf]  ;;  %v7692_v15 = vor.u32 %v8217_v5, %v7691_v4  ;;  %4584 = vmatpush.bf16.msrb.mxu2 %v7436_v11  ;;  %4553 = vmatmul.bf16.vlgmr.msra.gmra.mxu3 %v8893_v52  ;;  %v4321_v9 = vadd.f32 %v4320_v2, %v4308_v1 }
 0x396   : > { %v8017_v13 = vld [vmem:[%s8736_s24 + $0x9b4] sm:$0xf0] }
 0x397   : > { %v7147_v14 = vld [vmem:[%s8736_s24 + $0xb98] sm:$0xf]  ;;  %v6892_v24 = vor.u32 %v8017_v13, %v6891_v12  ;;  %4597 = vmatpush.bf16.msrb.mxu3 %v7692_v15 }
 0x398   : > { %v8081_v16 = vld [vmem:[%s8736_s24 + $0xbb4] sm:$0xf0] }
 0x399   : > { %v7403_v17 = vld [vmem:[%s8736_s24 + $0xd98] sm:$0xf]  ;;  %v7148_v25 = vor.u32 %v8081_v16, %v7147_v14  ;;  %4559 = vmatpush.bf16.msrb.mxu0 %v6892_v24 }
 0x39a   : > { %v8145_v19 = vld [vmem:[%s8736_s24 + $0xdb4] sm:$0xf0] }
 0x39b   : > { %v7659_v20 = vld [vmem:[%s8736_s24 + $0xf98] sm:$0xf]  ;;  %v7404_v27 = vor.u32 %v8145_v19, %v7403_v17  ;;  %4572 = vmatpush.bf16.msrb.mxu1 %v7148_v25  ;;  %v4333_v17 = vpop.f32.mrf.mxu2 }
 0x39c   : > { %v8209_v21 = vld [vmem:[%s8736_s24 + $0xfb4] sm:$0xf0]  ;;  %v4334_v25 = vadd.f32 %v4333_v17, %v4321_v9  ;;  %v6413_v9 = vld [vmem:[%s8736_s24 + $0x5f8] sm:$0xf0] }
 0x39d   : > { %v6859_v28 = vld [vmem:[%s8736_s24 + $0x958] sm:$0xf]  ;;  %v7660_v32 = vor.u32 %v8209_v21, %v7659_v20  ;;  %4585 = vmatpush.bf16.msrb.mxu2 %v7404_v27  ;;  %v4346_v27 = vpop.f32.mrf.mxu3 }
 0x39e   : > { %v8009_v29 = vld [vmem:[%s8736_s24 + $0x974] sm:$0xf0] }
 0x39f   : > { %v7115_v30 = vld [vmem:[%s8736_s24 + $0xb58] sm:$0xf]  ;;  %v6860_v37 = vor.u32 %v8009_v29, %v6859_v28  ;;  %4598 = vmatpush.bf16.msrb.mxu3 %v7660_v32  ;;  %v9764_v32 = vadd.f32 %v4346_v27, %v4334_v25  ;;  %v6125_v27 = vld [vmem:[%s8736_s24 + $0x3b8] sm:$0xf0] }
 0x3a0   : > { %v8073_v33 = vld [vmem:[%s8736_s24 + $0xb74] sm:$0xf0] }
 0x3a1   : > { %v7371_v51 = vld [vmem:[%s8736_s24 + $0xd58] sm:$0xf]  ;;  %v7116_v40 = vor.u32 %v8073_v33, %v7115_v30  ;;  %4560 = vmatpush.bf16.msrb.mxu0 %v6860_v37  ;;  %v4309_v33 = vpop.f32.mrf.mxu0 }
 0x3a2   : > { %v8137_v34 = vld [vmem:[%s8736_s24 + $0xd74] sm:$0xf0]  ;;  %v6637_v33 = vld [vmem:[%s8736_s24 + $0x7b8] sm:$0xf0] }
 0x3a3   : > { %v7627_v35 = vld [vmem:[%s8736_s24 + $0xf58] sm:$0xf]  ;;  %v7372_v41 = vor.u32 %v8137_v34, %v7371_v51  ;;  %4573 = vmatpush.bf16.msrb.mxu1 %v7116_v40 }
 0x3a4   : > { %v8201_v36 = vld [vmem:[%s8736_s24 + $0xf74] sm:$0xf0] }
 0x3a5   : > { %v6827_v38 = vld [vmem:[%s8736_s24 + $0x918] sm:$0xf]  ;;  %v7628_v45 = vor.u32 %v8201_v36, %v7627_v35  ;;  %4586 = vmatpush.bf16.msrb.mxu2 %v7372_v41  ;;  %v4348_v2 = vpop.f32.mrf.mxu3 }
 0x3a6   : > { %v8001_v42 = vld [vmem:[%s8736_s24 + $0x934] sm:$0xf0] }
 0x3a7   : > { %v7083_v43 = vld [vmem:[%s8736_s24 + $0xb18] sm:$0xf]  ;;  %v6828_v56 = vor.u32 %v8001_v42, %v6827_v38  ;;  %4599 = vmatpush.bf16.msrb.mxu3 %v7628_v45  ;;  %v4322_v38 = vpop.f32.mrf.mxu1 }
 0x3a8   : > { %v8065_v8 = vld [vmem:[%s8736_s24 + $0xb34] sm:$0xf0]  ;;  %v7813_v38 = vld [vmem:[%s8736_s24 + $0x35c] sm:$0xf] }
 0x3a9   : > { %v7339_v48 = vld [vmem:[%s8736_s24 + $0xd18] sm:$0xf]  ;;  %v7084_v57 = vor.u32 %v8065_v8, %v7083_v43  ;;  %4561 = vmatpush.bf16.msrb.mxu0 %v6828_v56  ;;  %v4359_v2 = vpop.f32.mrf.mxu0 }
 0x3aa   : > { %v8129_v49 = vld [vmem:[%s8736_s24 + $0xd34] sm:$0xf0] }
 0x3ab   : > { %v7595_v50 = vld [vmem:[%s8736_s24 + $0xf18] sm:$0xf]  ;;  %v7340_v58 = vor.u32 %v8129_v49, %v7339_v48  ;;  %4574 = vmatpush.bf16.msrb.mxu1 %v7084_v57 }
 0x3ac   : > { %v8193_v55 = vld [vmem:[%s8736_s24 + $0xf34] sm:$0xf0] }
 0x3ad   : > { %v6795_v59 = vld [vmem:[%s8736_s24 + $0x8d8] sm:$0xf]  ;;  %v7596_v18 = vor.u32 %v8193_v55, %v7595_v50  ;;  %4587 = vmatpush.bf16.msrb.mxu2 %v7340_v58  ;;  %v4335_v58 = vpop.f32.mrf.mxu2 }
 0x3ae   : > { %v7993_v62 = vld [vmem:[%s8736_s24 + $0x8f4] sm:$0xf0]  ;;  %v7869_v58 = vld [vmem:[%s8736_s24 + $0x51c] sm:$0xf] }
 0x3af   : > { %v7051_v0 = vld [vmem:[%s8736_s24 + $0xad8] sm:$0xf]  ;;  %v6796_v11 = vor.u32 %v7993_v62, %v6795_v59  ;;  %4600 = vmatpush.bf16.msrb.mxu3 %v7596_v18  ;;  %v7765_v18 = vld [vmem:[%s8736_s24 + $0x1dc] sm:$0xf] }
 0x3b0   : > { %v8057_v3 = vld [vmem:[%s8736_s24 + $0xaf4] sm:$0xf0] }
 0x3b1   : > { %v7307_v4 = vld [vmem:[%s8736_s24 + $0xcd8] sm:$0xf]  ;;  %v7052_v12 = vor.u32 %v8057_v3, %v7051_v0  ;;  %4562 = vmatpush.bf16.msrb.mxu0 %v6796_v11  ;;  %v5901_v3 = vld [vmem:[%s8736_s24 + $0x1f8] sm:$0xf0] }
 0x3b2   : > { %v8121_v5 = vld [vmem:[%s8736_s24 + $0xcf4] sm:$0xf0] }
 0x3b3   : > { %v7563_v6 = vld [vmem:[%s8736_s24 + $0xed8] sm:$0xf]  ;;  %v7308_v13 = vor.u32 %v8121_v5, %v7307_v4  ;;  %4575 = vmatpush.bf16.msrb.mxu1 %v7052_v12  ;;  %v7829_v4 = vld [vmem:[%s8736_s24 + $0x3dc] sm:$0xf] }
 0x3b4   : > { %v8185_v7 = vld [vmem:[%s8736_s24 + $0xef4] sm:$0xf0] }
 0x3b5   : > { %v6763_v14 = vld [vmem:[%s8736_s24 + $0x898] sm:$0xf]  ;;  %v7564_v19 = vor.u32 %v8185_v7, %v7563_v6  ;;  %4588 = vmatpush.bf16.msrb.mxu2 %v7308_v13  ;;  %v6157_v6 = vld [vmem:[%s8736_s24 + $0x3f8] sm:$0xf0] }
 0x3b6   : > { %v7985_v15 = vld [vmem:[%s8736_s24 + $0x8b4] sm:$0xf0]  ;;  %v7893_v7 = vld [vmem:[%s8736_s24 + $0x5dc] sm:$0xf]  ;;  %v6160_v17 = vor.u32 %v7829_v4, %v6157_v6  ;;  %v4360_v4 = vadd.f32 %v4359_v2, %v9764_v32 }
 0x3b7   : > { %v7019_v16 = vld [vmem:[%s8736_s24 + $0xa98] sm:$0xf]  ;;  %v6764_v30 = vor.u32 %v7985_v15, %v6763_v14  ;;  %4601 = vmatpush.bf16.msrb.mxu3 %v7564_v19  ;;  %v7957_v13 = vld [vmem:[%s8736_s24 + $0x7dc] sm:$0xf]  ;;  %v6416_v19 = vor.u32 %v7893_v7, %v6413_v9  ;;  %v4372_v9 = vpop.f32.mrf.mxu1 }
 0x3b8   : > { %v8049_v20 = vld [vmem:[%s8736_s24 + $0xab4] sm:$0xf0]  ;;  %v6669_v14 = vld [vmem:[%s8736_s24 + $0x7f8] sm:$0xf0] }
 0x3b9   : > { %v7275_v21 = vld [vmem:[%s8736_s24 + $0xc98] sm:$0xf]  ;;  %v7020_v51 = vor.u32 %v8049_v20, %v7019_v16  ;;  %4563 = vmatpush.bf16.msrb.mxu0 %v6764_v30  ;;  %v5904_v16 = vor.u32 %v7765_v18, %v5901_v3  ;;  %v7757_v20 = vld [vmem:[%s8736_s24 + $0x19c] sm:$0xf]  ;;  %v6672_v25 = vor.u32 %v7957_v13, %v6669_v14 }
 0x3ba   : > { %v8113_v24 = vld [vmem:[%s8736_s24 + $0xcb4] sm:$0xf0]  ;;  %v7949_v30 = vld [vmem:[%s8736_s24 + $0x79c] sm:$0xf] }
 0x3bb   : > { %v7531_v28 = vld [vmem:[%s8736_s24 + $0xe98] sm:$0xf]  ;;  %v7276_v34 = vor.u32 %v8113_v24, %v7275_v21  ;;  %4576 = vmatpush.bf16.msrb.mxu1 %v7020_v51  ;;  %v5869_v21 = vld [vmem:[%s8736_s24 + $0x1b8] sm:$0xf0] }
 0x3bc   : > { %v8177_v29 = vld [vmem:[%s8736_s24 + $0xeb4] sm:$0xf0]  ;;  %v7821_v24 = vld [vmem:[%s8736_s24 + $0x39c] sm:$0xf]  ;;  %v5872_v51 = vor.u32 %v7757_v20, %v5869_v21  ;;  %v4385_v21 = vpop.f32.mrf.mxu2 }
 0x3bd   : > { %v6731_v35 = vld [vmem:[%s8736_s24 + $0x858] sm:$0xf]  ;;  %v7532_v40 = vor.u32 %v8177_v29, %v7531_v28  ;;  %4589 = vmatpush.bf16.msrb.mxu2 %v7276_v34  ;;  %v7885_v28 = vld [vmem:[%s8736_s24 + $0x59c] sm:$0xf]  ;;  %v6128_v34 = vor.u32 %v7821_v24, %v6125_v27 }
 0x3be   : > { %v7977_v36 = vld [vmem:[%s8736_s24 + $0x874] sm:$0xf0]  ;;  %v6381_v29 = vld [vmem:[%s8736_s24 + $0x5b8] sm:$0xf0] }
 0x3bf   : > { %v6987_v37 = vld [vmem:[%s8736_s24 + $0xa58] sm:$0xf]  ;;  %v6732_v8 = vor.u32 %v7977_v36, %v6731_v35  ;;  %4602 = vmatpush.bf16.msrb.mxu3 %v7532_v40  ;;  %v6384_v35 = vor.u32 %v7885_v28, %v6381_v29  ;;  %v7749_v36 = vld [vmem:[%s8736_s24 + $0x15c] sm:$0xf]  ;;  %v6640_v40 = vor.u32 %v7949_v30, %v6637_v33 }
 0x3c0   : > { %v8041_v41 = vld [vmem:[%s8736_s24 + $0xa74] sm:$0xf0]  ;;  %v5773_v6 = vld [vmem:[%s8736_s24 + $0xf8] sm:$0xf0] }
 0x3c1   : > { %v7243_v42 = vld [vmem:[%s8736_s24 + $0xc58] sm:$0xf]  ;;  %v6988_v50 = vor.u32 %v8041_v41, %v6987_v37  ;;  %4564 = vmatpush.bf16.msrb.mxu0 %v6732_v8  ;;  %v5837_v37 = vld [vmem:[%s8736_s24 + $0x178] sm:$0xf0] }
 0x3c2   : > { %v8105_v43 = vld [vmem:[%s8736_s24 + $0xc74] sm:$0xf0]  ;;  %v6093_v41 = vld [vmem:[%s8736_s24 + $0x378] sm:$0xf0]  ;;  %v5840_v8 = vor.u32 %v7749_v36, %v5837_v37 }
 0x3c3   : > { %v7499_v44 = vld [vmem:[%s8736_s24 + $0xe58] sm:$0xf]  ;;  %v7244_v55 = vor.u32 %v8105_v43, %v7243_v42  ;;  %4577 = vmatpush.bf16.msrb.mxu1 %v6988_v50  ;;  %v7877_v42 = vld [vmem:[%s8736_s24 + $0x55c] sm:$0xf] }
 0x3c4   : > { %v8169_v45 = vld [vmem:[%s8736_s24 + $0xe74] sm:$0xf0]  ;;  %v6349_v43 = vld [vmem:[%s8736_s24 + $0x578] sm:$0xf0] }
 0x3c5   : > { %v6699_v48 = vld [vmem:[%s8736_s24 + $0x818] sm:$0xf]  ;;  %v7500_v59 = vor.u32 %v8169_v45, %v7499_v44  ;;  %4590 = vmatpush.bf16.msrb.mxu2 %v7244_v55  ;;  %v7941_v44 = vld [vmem:[%s8736_s24 + $0x75c] sm:$0xf] }
 0x3c6   : > { %v7969_v49 = vld [vmem:[%s8736_s24 + $0x834] sm:$0xf0]  ;;  %v6605_v45 = vld [vmem:[%s8736_s24 + $0x778] sm:$0xf0] }
 0x3c7   : > { %v6955_v56 = vld [vmem:[%s8736_s24 + $0xa18] sm:$0xf]  ;;  %v6700_v5 = vor.u32 %v7969_v49, %v6699_v48  ;;  %4603 = vmatpush.bf16.msrb.mxu3 %v7500_v59  ;;  %v6096_v48 = vor.u32 %v7813_v38, %v6093_v41  ;;  %v6352_v49 = vor.u32 %v7877_v42, %v6349_v43  ;;  %v7741_v50 = vld [vmem:[%s8736_s24 + $0x11c] sm:$0xf]  ;;  %v4361_v42 = vpop.f32.mrf.mxu0 }
 0x3c8   : > { %v8033_v10 = vld [vmem:[%s8736_s24 + $0xa34] sm:$0xf0]  ;;  %v5805_v55 = vld [vmem:[%s8736_s24 + $0x138] sm:$0xf0] }
 0x3c9   : > { %v7211_v57 = vld [vmem:[%s8736_s24 + $0xc18] sm:$0xf]  ;;  %v6956_v11 = vor.u32 %v8033_v10, %v6955_v56  ;;  %4565 = vmatpush.bf16.msrb.mxu0 %v6700_v5  ;;  %v7805_v56 = vld [vmem:[%s8736_s24 + $0x31c] sm:$0xf]  ;;  %v6608_v10 = vor.u32 %v7941_v44, %v6605_v45 }
 0x3ca   : > { %v8097_v62 = vld [vmem:[%s8736_s24 + $0xc34] sm:$0xf0]  ;;  %v6317_v59 = vld [vmem:[%s8736_s24 + $0x538] sm:$0xf0] }
 0x3cb   : > { %v7467_v0 = vld [vmem:[%s8736_s24 + $0xe18] sm:$0xf]  ;;  %v7212_v12 = vor.u32 %v8097_v62, %v7211_v57  ;;  %4578 = vmatpush.bf16.msrb.mxu1 %v6956_v11  ;;  %v6061_v57 = vld [vmem:[%s8736_s24 + $0x338] sm:$0xf0]  ;;  %v6320_v3 = vor.u32 %v7869_v58, %v6317_v59 }
 0x3cc   : > { %v8161_v1 = vld [vmem:[%s8736_s24 + $0xe34] sm:$0xf0]  ;;  %4566 = vmatmul.bf16.vlgmr.msrb.gmra.mxu0 %v8943_v60  ;;  %v7933_v62 = vld [vmem:[%s8736_s24 + $0x71c] sm:$0xf]  ;;  %v6064_v18 = vor.u32 %v7805_v56, %v6061_v57 }
 0x3cd   : > { %v7468_v15 = vor.u32 %v8161_v1, %v7467_v0  ;;  %4591 = vmatpush.bf16.msrb.mxu2 %v7212_v12  ;;  %4610 = vmatpush.bf16.msra.mxu0 %v5904_v16  ;;  %v6573_v0 = vld [vmem:[%s8736_s24 + $0x738] sm:$0xf0]  ;;  %v5808_v1 = vor.u32 %v7741_v50, %v5805_v55 }
 0x3ce   : > { %4579 = vmatmul.bf16.vlgmr.msrb.gmra.mxu1 %v8947_v63  ;;  %v7733_v5 = vld [vmem:[%s8736_s24 + $0xdc] sm:$0xf]  ;;  %v6576_v11 = vor.u32 %v7933_v62, %v6573_v0 }
 0x3cf   : > { %4604 = vmatpush.bf16.msrb.mxu3 %v7468_v15  ;;  %4623 = vmatpush.bf16.msra.mxu1 %v6160_v17  ;;  %v7797_v7 = vld [vmem:[%s8736_s24 + $0x2dc] sm:$0xf]  ;;  %v4373_v17 = vadd.f32 %v4372_v9, %v4360_v4  ;;  %v5776_v32 = vor.u32 %v7733_v5, %v5773_v6  ;;  %v4387_v5 = vpop.f32.mrf.mxu2 }
 0x3d0   : > { %4592 = vmatmul.bf16.vlgmr.msrb.gmra.mxu2 %v8936_v54  ;;  %v6029_v12 = vld [vmem:[%s8736_s24 + $0x2f8] sm:$0xf0] }
 0x3d1   : > { %4636 = vmatpush.bf16.msra.mxu2 %v6416_v19  ;;  %4611 = vmatpush.bf16.msra.mxu0 %v5872_v51  ;;  %v7861_v13 = vld [vmem:[%s8736_s24 + $0x4dc] sm:$0xf]  ;;  %v6032_v19 = vor.u32 %v7797_v7, %v6029_v12  ;;  %v4386_v29 = vadd.f32 %v4385_v21, %v4373_v17 }
 0x3d2   : > { %4605 = vmatmul.bf16.vlgmr.msrb.gmra.mxu3 %v8945_v61  ;;  %v6285_v14 = vld [vmem:[%s8736_s24 + $0x4f8] sm:$0xf0] }
 0x3d3   : > { %4649 = vmatpush.bf16.msra.mxu3 %v6672_v25  ;;  %4624 = vmatpush.bf16.msra.mxu1 %v6128_v34  ;;  %v7925_v15 = vld [vmem:[%s8736_s24 + $0x6dc] sm:$0xf]  ;;  %v6288_v20 = vor.u32 %v7861_v13, %v6285_v14  ;;  %v4398_v34 = vpop.f32.mrf.mxu3 }
 0x3d4   : > { %v6541_v16 = vld [vmem:[%s8736_s24 + $0x6f8] sm:$0xf0]  ;;  %v4399_v38 = vadd.f32 %v4398_v34, %v4386_v29 }
 0x3d5   : > { %4637 = vmatpush.bf16.msra.mxu2 %v6384_v35  ;;  %4612 = vmatpush.bf16.msra.mxu0 %v5840_v8  ;;  %v7725_v24 = vld [vmem:[%s8736_s24 + $0x9c] sm:$0xf]  ;;  %v6544_v28 = vor.u32 %v7925_v15, %v6541_v16 }
 0x3d6   : > { %v5741_v25 = vld [vmem:[%s8736_s24 + $0xb8] sm:$0xf0]  ;;  %vm4718_vm8 = vcmp.gt.f32.partialorder %v4399_v38, 0.0  ;;  %v4726_v55 = vmul.f32 0.01, %v4399_v38 }
 0x3d7   : > { %4650 = vmatpush.bf16.msra.mxu3 %v6640_v40  ;;  %4625 = vmatpush.bf16.msra.mxu1 %v6096_v48  ;;  %v7789_v27 = vld [vmem:[%s8736_s24 + $0x29c] sm:$0xf]  ;;  %v5744_v37 = vor.u32 %v7725_v24, %v5741_v25 }
 0x3d8   : > { %v5997_v30 = vld [vmem:[%s8736_s24 + $0x2b8] sm:$0xf0]  ;;  %v9843_v58 = vsel %vm4718_vm8, %v4399_v38, %v4726_v55 }
 0x3d9   : > { %4638 = vmatpush.bf16.msra.mxu2 %v6352_v49  ;;  %4613 = vmatpush.bf16.msra.mxu0 %v5808_v1  ;;  %v7853_v33 = vld [vmem:[%s8736_s24 + $0x49c] sm:$0xf]  ;;  %v6000_v43 = vor.u32 %v7789_v27, %v5997_v30  ;;  %v4374_v49 = vpop.f32.mrf.mxu1 }
 0x3da   : > { %v6253_v51 = vld [vmem:[%s8736_s24 + $0x4b8] sm:$0xf0] }
 0x3db   : > { %4651 = vmatpush.bf16.msra.mxu3 %v6608_v10  ;;  %4626 = vmatpush.bf16.msra.mxu1 %v6064_v18  ;;  %v7917_v35 = vld [vmem:[%s8736_s24 + $0x69c] sm:$0xf]  ;;  %v6256_v44 = vor.u32 %v7853_v33, %v6253_v51  ;;  %v4400_v12 = vpop.f32.mrf.mxu3 }
 0x3dc   : > { %v6509_v36 = vld [vmem:[%s8736_s24 + $0x6b8] sm:$0xf0] }
 0x3dd   : > { %4639 = vmatpush.bf16.msra.mxu2 %v6320_v3  ;;  %4614 = vmatpush.bf16.msra.mxu0 %v5776_v32  ;;  %v7717_v40 = vld [vmem:[%s8736_s24 + $0x5c] sm:$0xf]  ;;  %v6512_v50 = vor.u32 %v7917_v35, %v6509_v36 }
 0x3de   : > { %v5709_v41 = vld [vmem:[%s8736_s24 + $0x78] sm:$0xf0] }
 0x3df   : > { %4652 = vmatpush.bf16.msra.mxu3 %v6576_v11  ;;  %4627 = vmatpush.bf16.msra.mxu1 %v6032_v19  ;;  %v7781_v45 = vld [vmem:[%s8736_s24 + $0x25c] sm:$0xf]  ;;  %v5712_v59 = vor.u32 %v7717_v40, %v5709_v41 }
 0x3e0   : > { %v5965_v8 = vld [vmem:[%s8736_s24 + $0x278] sm:$0xf0] }
 0x3e1   : > { %4640 = vmatpush.bf16.msra.mxu2 %v6288_v20  ;;  %v7845_v48 = vld [vmem:[%s8736_s24 + $0x45c] sm:$0xf]  ;;  %4615 = vmatpush.bf16.msra.mxu0 %v5744_v37  ;;  %v5968_v1 = vor.u32 %v7781_v45, %v5965_v8 }
 0x3e2   : > { %v6221_v56 = vld [vmem:[%s8736_s24 + $0x478] sm:$0xf0] }
 0x3e3   : > { %4653 = vmatpush.bf16.msra.mxu3 %v6544_v28  ;;  %v7909_v10 = vld [vmem:[%s8736_s24 + $0x65c] sm:$0xf]  ;;  %4628 = vmatpush.bf16.msra.mxu1 %v6000_v43  ;;  %v6224_v2 = vor.u32 %v7845_v48, %v6221_v56 }
 0x3e4   : > { %v6477_v57 = vld [vmem:[%s8736_s24 + $0x678] sm:$0xf0] }
 0x3e5   : > { %v7709_v62 = vld [vmem:[%s8736_s24 + $0x1c] sm:$0xf]  ;;  %4641 = vmatpush.bf16.msra.mxu2 %v6256_v44  ;;  %v6480_v6 = vor.u32 %v7909_v10, %v6477_v57  ;;  %4616 = vmatpush.bf16.msra.mxu0 %v5712_v59 }
 0x3e6   : > { %v5677_v0 = vld [vmem:[%s8736_s24 + $0x38] sm:$0xf0] }
 0x3e7   : > { %v7773_v18 = vld [vmem:[%s8736_s24 + $0x21c] sm:$0xf]  ;;  %4654 = vmatpush.bf16.msra.mxu3 %v6512_v50  ;;  %v5680_v16 = vor.u32 %v7709_v62, %v5677_v0  ;;  %4629 = vmatpush.bf16.msra.mxu1 %v5968_v1 }
 0x3e8   : > { %v5933_v3 = vld [vmem:[%s8736_s24 + $0x238] sm:$0xf0] }
 0x3e9   : > { %v7837_v4 = vld [vmem:[%s8736_s24 + $0x41c] sm:$0xf]  ;;  %4642 = vmatpush.bf16.msra.mxu2 %v6224_v2  ;;  %v5936_v20 = vor.u32 %v7773_v18, %v5933_v3  ;;  %4617 = vmatpush.bf16.msra.mxu0 %v5680_v16  ;;  %v1311_v2 = vperm.slane %v9740_v26, 5  ;;  %v4424_v16 = vpop.f32.mrf.mxu1 }
 0x3ea   : > { %v6189_v7 = vld [vmem:[%s8736_s24 + $0x438] sm:$0xf0] }
 0x3eb   : > { %v7901_v9 = vld [vmem:[%s8736_s24 + $0x61c] sm:$0xf]  ;;  %v6192_v21 = vor.u32 %v7837_v4, %v6189_v7  ;;  %4655 = vmatpush.bf16.msra.mxu3 %v6480_v6  ;;  %4630 = vmatpush.bf16.msra.mxu1 %v5936_v20  ;;  %v4411_v7 = vpop.f32.mrf.mxu0 }
 0x3ec   : > { %v6445_v11 = vld [vmem:[%s8736_s24 + $0x638] sm:$0xf0]  ;;  %4618 = vmatmul.bf16.vlgmr.msra.gmra.mxu0 %v8889_v47 }
 0x3ed   : > { %v8021_v13 = vld [vmem:[%s8736_s24 + $0x9dc] sm:$0xf]  ;;  %v6448_v27 = vor.u32 %v7901_v9, %v6445_v11  ;;  %4643 = vmatpush.bf16.msra.mxu2 %v6192_v21 }
 0x3ee   : > { %v6925_v14 = vld [vmem:[%s8736_s24 + $0x9f8] sm:$0xf0]  ;;  %4631 = vmatmul.bf16.vlgmr.msra.gmra.mxu1 %v8895_v53 }
 0x3ef   : > { %v8085_v15 = vld [vmem:[%s8736_s24 + $0xbdc] sm:$0xf]  ;;  %v6928_v28 = vor.u32 %v8021_v13, %v6925_v14  ;;  %4656 = vmatpush.bf16.msra.mxu3 %v6448_v27 }
 0x3f0   : > { %v7181_v17 = vld [vmem:[%s8736_s24 + $0xbf8] sm:$0xf0]  ;;  %4644 = vmatmul.bf16.vlgmr.msra.gmra.mxu2 %v8887_v46 }
 0x3f1   : > { %v8149_v32 = vld [vmem:[%s8736_s24 + $0xddc] sm:$0xf]  ;;  %v7184_v29 = vor.u32 %v8085_v15, %v7181_v17  ;;  %4662 = vmatpush.bf16.msrb.mxu0 %v6928_v28  ;;  %v4412_v15 = vadd.f32 %v4411_v7, %v1311_v2 }
 0x3f2   : > { %v7437_v19 = vld [vmem:[%s8736_s24 + $0xdf8] sm:$0xf0]  ;;  %4657 = vmatmul.bf16.vlgmr.msra.gmra.mxu3 %v8893_v52 }
 0x3f3   : > { %v8213_v24 = vld [vmem:[%s8736_s24 + $0xfdc] sm:$0xf]  ;;  %v7440_v30 = vor.u32 %v8149_v32, %v7437_v19  ;;  %4675 = vmatpush.bf16.msrb.mxu1 %v7184_v29 }
 0x3f4   : > { %v7693_v25 = vld [vmem:[%s8736_s24 + $0xff8] sm:$0xf0] }
 0x3f5   : > { %v8013_v33 = vld [vmem:[%s8736_s24 + $0x99c] sm:$0xf]  ;;  %v7696_v35 = vor.u32 %v8213_v24, %v7693_v25  ;;  %4688 = vmatpush.bf16.msrb.mxu2 %v7440_v30  ;;  %v4425_v25 = vadd.f32 %v4424_v16, %v4412_v15 }
 0x3f6   : > { %v6893_v51 = vld [vmem:[%s8736_s24 + $0x9b8] sm:$0xf0] }
 0x3f7   : > { %v8077_v34 = vld [vmem:[%s8736_s24 + $0xb9c] sm:$0xf]  ;;  %v6896_v42 = vor.u32 %v8013_v33, %v6893_v51  ;;  %4701 = vmatpush.bf16.msrb.mxu3 %v7696_v35 }
 0x3f8   : > { %v7149_v36 = vld [vmem:[%s8736_s24 + $0xbb8] sm:$0xf0] }
 0x3f9   : > { %v8141_v37 = vld [vmem:[%s8736_s24 + $0xd9c] sm:$0xf]  ;;  %v7152_v43 = vor.u32 %v8077_v34, %v7149_v36  ;;  %4663 = vmatpush.bf16.msrb.mxu0 %v6896_v42  ;;  %v4437_v34 = vpop.f32.mrf.mxu2 }
 0x3fa   : > { %v7405_v38 = vld [vmem:[%s8736_s24 + $0xdb8] sm:$0xf0] }
 0x3fb   : > { %v8205_v40 = vld [vmem:[%s8736_s24 + $0xf9c] sm:$0xf]  ;;  %v7408_v44 = vor.u32 %v8141_v37, %v7405_v38  ;;  %4676 = vmatpush.bf16.msrb.mxu1 %v7152_v43 }
 0x3fc   : > { %v7661_v41 = vld [vmem:[%s8736_s24 + $0xfb8] sm:$0xf0] }
 0x3fd   : > { %v8005_v45 = vld [vmem:[%s8736_s24 + $0x95c] sm:$0xf]  ;;  %v7664_v49 = vor.u32 %v8205_v40, %v7661_v41  ;;  %4689 = vmatpush.bf16.msrb.mxu2 %v7408_v44  ;;  %v4438_v40 = vadd.f32 %v4437_v34, %v4425_v25  ;;  %v4450_v41 = vpop.f32.mrf.mxu3 }
 0x3fe   : > { %v6861_v8 = vld [vmem:[%s8736_s24 + $0x978] sm:$0xf0] }
 0x3ff   : > { %v8069_v48 = vld [vmem:[%s8736_s24 + $0xb5c] sm:$0xf]  ;;  %v6864_v59 = vor.u32 %v8005_v45, %v6861_v8  ;;  %4702 = vmatpush.bf16.msrb.mxu3 %v7664_v49  ;;  %v4451_v45 = vadd.f32 %v4450_v41, %v4438_v40  ;;  %v4413_v8 = vpop.f32.mrf.mxu0 }
 0x400   : > { %v7117_v50 = vld [vmem:[%s8736_s24 + $0xb78] sm:$0xf0] }
 0x401   : > { %v8133_v55 = vld [vmem:[%s8736_s24 + $0xd5c] sm:$0xf]  ;;  %v7120_v62 = vor.u32 %v8069_v48, %v7117_v50  ;;  %4664 = vmatpush.bf16.msrb.mxu0 %v6864_v59 }
 0x402   : > { %v7373_v56 = vld [vmem:[%s8736_s24 + $0xd78] sm:$0xf0] }
 0x403   : > { %v8197_v10 = vld [vmem:[%s8736_s24 + $0xf5c] sm:$0xf]  ;;  %v7376_v0 = vor.u32 %v8133_v55, %v7373_v56  ;;  %4677 = vmatpush.bf16.msrb.mxu1 %v7120_v62 }
 0x404   : > { %v7629_v57 = vld [vmem:[%s8736_s24 + $0xf78] sm:$0xf0] }
 0x405   : > { %v7997_v46 = vld [vmem:[%s8736_s24 + $0x91c] sm:$0xf]  ;;  %v7632_v47 = vor.u32 %v8197_v10, %v7629_v57  ;;  %4690 = vmatpush.bf16.msrb.mxu2 %v7376_v0  ;;  %v4426_v10 = vpop.f32.mrf.mxu1 }
 0x406   : > { %v6829_v1 = vld [vmem:[%s8736_s24 + $0x938] sm:$0xf0] }
 0x407   : > { %v8061_v52 = vld [vmem:[%s8736_s24 + $0xb1c] sm:$0xf]  ;;  %v6832_v6 = vor.u32 %v7997_v46, %v6829_v1  ;;  %4703 = vmatpush.bf16.msrb.mxu3 %v7632_v47 }
 0x408   : > { %v7085_v18 = vld [vmem:[%s8736_s24 + $0xb38] sm:$0xf0] }
 0x409   : > { %v8125_v3 = vld [vmem:[%s8736_s24 + $0xd1c] sm:$0xf]  ;;  %v7088_v9 = vor.u32 %v8061_v52, %v7085_v18  ;;  %4665 = vmatpush.bf16.msrb.mxu0 %v6832_v6 }
 0x40a   : > { %v7341_v4 = vld [vmem:[%s8736_s24 + $0xd38] sm:$0xf0] }
 0x40b   : > { %v8189_v5 = vld [vmem:[%s8736_s24 + $0xf1c] sm:$0xf]  ;;  %v7344_v11 = vor.u32 %v8125_v3, %v7341_v4  ;;  %4678 = vmatpush.bf16.msrb.mxu1 %v7088_v9 }
 0x40c   : > { %v7597_v53 = vld [vmem:[%s8736_s24 + $0xf38] sm:$0xf0] }
 0x40d   : > { %v7989_v12 = vld [vmem:[%s8736_s24 + $0x8dc] sm:$0xf]  ;;  %v7600_v17 = vor.u32 %v8189_v5, %v7597_v53  ;;  %4691 = vmatpush.bf16.msrb.mxu2 %v7344_v11  ;;  %v4439_v5 = vpop.f32.mrf.mxu2  ;;  %v4452_v11 = vpop.f32.mrf.mxu3 }
 0x40e   : > { %v6797_v13 = vld [vmem:[%s8736_s24 + $0x8f8] sm:$0xf0] }
 0x40f   : > { %v8053_v14 = vld [vmem:[%s8736_s24 + $0xadc] sm:$0xf]  ;;  %v6800_v27 = vor.u32 %v7989_v12, %v6797_v13  ;;  %4704 = vmatpush.bf16.msrb.mxu3 %v7600_v17 }
 0x410   : > { %v7053_v32 = vld [vmem:[%s8736_s24 + $0xaf8] sm:$0xf0] }
 0x411   : > { %v8117_v19 = vld [vmem:[%s8736_s24 + $0xcdc] sm:$0xf]  ;;  %v7056_v28 = vor.u32 %v8053_v14, %v7053_v32  ;;  %4666 = vmatpush.bf16.msrb.mxu0 %v6800_v27  ;;  %v4463_v32 = vpop.f32.mrf.mxu0 }
 0x412   : > { %v7309_v20 = vld [vmem:[%s8736_s24 + $0xcf8] sm:$0xf0] }
 0x413   : > { %v8181_v21 = vld [vmem:[%s8736_s24 + $0xedc] sm:$0xf]  ;;  %v7312_v29 = vor.u32 %v8117_v19, %v7309_v20  ;;  %4679 = vmatpush.bf16.msrb.mxu1 %v7056_v28  ;;  %v4464_v19 = vadd.f32 %v4463_v32, %v4451_v45  ;;  %v4476_v20 = vpop.f32.mrf.mxu1 }
 0x414   : > { %v7565_v24 = vld [vmem:[%s8736_s24 + $0xef8] sm:$0xf0] }
 0x415   : > { %v7981_v30 = vld [vmem:[%s8736_s24 + $0x89c] sm:$0xf]  ;;  %v7568_v35 = vor.u32 %v8181_v21, %v7565_v24  ;;  %4692 = vmatpush.bf16.msrb.mxu2 %v7312_v29  ;;  %v4477_v21 = vadd.f32 %v4476_v20, %v4464_v19  ;;  %v4489_v24 = vpop.f32.mrf.mxu2  ;;  %v4502_v27 = vpop.f32.mrf.mxu3 }
 0x416   : > { %v6765_v33 = vld [vmem:[%s8736_s24 + $0x8b8] sm:$0xf0] }
 0x417   : > { %v8045_v51 = vld [vmem:[%s8736_s24 + $0xa9c] sm:$0xf]  ;;  %v6768_v44 = vor.u32 %v7981_v30, %v6765_v33  ;;  %4705 = vmatpush.bf16.msrb.mxu3 %v7568_v35  ;;  %v4490_v25 = vadd.f32 %v4489_v24, %v4477_v21 }
 0x418   : > { %v7021_v36 = vld [vmem:[%s8736_s24 + $0xab8] sm:$0xf0] }
 0x419   : > { %v8109_v37 = vld [vmem:[%s8736_s24 + $0xc9c] sm:$0xf]  ;;  %v7024_v48 = vor.u32 %v8045_v51, %v7021_v36  ;;  %4667 = vmatpush.bf16.msrb.mxu0 %v6768_v44  ;;  %v4503_v28 = vadd.f32 %v4502_v27, %v4490_v25  ;;  %v4465_v29 = vpop.f32.mrf.mxu0 }
 0x41a   : > { %v7277_v38 = vld [vmem:[%s8736_s24 + $0xcb8] sm:$0xf0] }
 0x41b   : > { %v8173_v42 = vld [vmem:[%s8736_s24 + $0xe9c] sm:$0xf]  ;;  %v7280_v49 = vor.u32 %v8109_v37, %v7277_v38  ;;  %4680 = vmatpush.bf16.msrb.mxu1 %v7024_v48  ;;  %v4478_v30 = vpop.f32.mrf.mxu1  ;;  %vm4719_vm9 = vcmp.gt.f32.partialorder %v4503_v28, 0.0  ;;  %v4727_v33 = vmul.f32 0.01, %v4503_v28 }
 0x41c   : > { %v7533_v43 = vld [vmem:[%s8736_s24 + $0xeb8] sm:$0xf0] }
 0x41d   : > { %v7973_v50 = vld [vmem:[%s8736_s24 + $0x85c] sm:$0xf]  ;;  %v7536_v57 = vor.u32 %v8173_v42, %v7533_v43  ;;  %4693 = vmatpush.bf16.msrb.mxu2 %v7280_v49  ;;  %v9926_v51 = vsel %vm4719_vm9, %v4503_v28, %v4727_v33 }
 0x41e   : > { %v6733_v55 = vld [vmem:[%s8736_s24 + $0x878] sm:$0xf0] }
 0x41f   : > { %v8037_v56 = vld [vmem:[%s8736_s24 + $0xa5c] sm:$0xf]  ;;  %v6736_v52 = vor.u32 %v7973_v50, %v6733_v55  ;;  %4706 = vmatpush.bf16.msrb.mxu3 %v7536_v57 }
 0x420   : > { %v6989_v59 = vld [vmem:[%s8736_s24 + $0xa78] sm:$0xf0] }
 0x421   : > { %v8101_v46 = vld [vmem:[%s8736_s24 + $0xc5c] sm:$0xf]  ;;  %v6992_v2 = vor.u32 %v8037_v56, %v6989_v59  ;;  %4668 = vmatpush.bf16.msrb.mxu0 %v6736_v52  ;;  %v4515_v34 = vpop.f32.mrf.mxu0 }
 0x422   : > { %v7245_v62 = vld [vmem:[%s8736_s24 + $0xc78] sm:$0xf0] }
 0x423   : > { %v8165_v0 = vld [vmem:[%s8736_s24 + $0xe5c] sm:$0xf]  ;;  %v7248_v47 = vor.u32 %v8101_v46, %v7245_v62  ;;  %4681 = vmatpush.bf16.msrb.mxu1 %v6992_v2  ;;  %v4528_v35 = vpop.f32.mrf.mxu1 }
 0x424   : > { %v7501_v1 = vld [vmem:[%s8736_s24 + $0xe78] sm:$0xf0] }
 0x425   : > { %v7965_v18 = vld [vmem:[%s8736_s24 + $0x81c] sm:$0xf]  ;;  %v7504_v53 = vor.u32 %v8165_v0, %v7501_v1  ;;  %4694 = vmatpush.bf16.msrb.mxu2 %v7248_v47 }
 0x426   : > { %v6701_v3 = vld [vmem:[%s8736_s24 + $0x838] sm:$0xf0] }
 0x427   : > { %v8029_v4 = vld [vmem:[%s8736_s24 + $0xa1c] sm:$0xf]  ;;  %v6704_v14 = vor.u32 %v7965_v18, %v6701_v3  ;;  %4707 = vmatpush.bf16.msrb.mxu3 %v7504_v53  ;;  %v1313_v53 = vperm.slane %v9740_v26, 7 }
 0x428   : > { %v6957_v6 = vld [vmem:[%s8736_s24 + $0xa38] sm:$0xf0] }
 0x429   : > { %v8093_v7 = vld [vmem:[%s8736_s24 + $0xc1c] sm:$0xf]  ;;  %v6960_v15 = vor.u32 %v8029_v4, %v6957_v6  ;;  %4669 = vmatpush.bf16.msrb.mxu0 %v6704_v14  ;;  %v4517_v42 = vpop.f32.mrf.mxu0 }
 0x42a   : > { %v7213_v9 = vld [vmem:[%s8736_s24 + $0xc38] sm:$0xf0] }
 0x42b   : > { %v8157_v12 = vld [vmem:[%s8736_s24 + $0xe1c] sm:$0xf]  ;;  %v7216_v16 = vor.u32 %v8093_v7, %v7213_v9  ;;  %4682 = vmatpush.bf16.msrb.mxu1 %v6960_v15  ;;  %v4530_v43 = vpop.f32.mrf.mxu1 }
 0x42c   : > { %v7469_v13 = vld [vmem:[%s8736_s24 + $0xe38] sm:$0xf0]  ;;  %4670 = vmatmul.bf16.vlgmr.msrb.gmra.mxu0 %v8943_v60  ;;  %v4491_v60 = vpop.f32.mrf.mxu2 }
 0x42d   : > { %v7472_v17 = vor.u32 %v8157_v12, %v7469_v13  ;;  %4695 = vmatpush.bf16.msrb.mxu2 %v7216_v16 }
 0x42e   : > { %4683 = vmatmul.bf16.vlgmr.msrb.gmra.mxu1 %v8947_v63  ;;  %v4504_v63 = vpop.f32.mrf.mxu3 }
 0x42f   : > { %4708 = vmatpush.bf16.msrb.mxu3 %v7472_v17 }
 0x430   : > { %4696 = vmatmul.bf16.vlgmr.msrb.gmra.mxu2 %v8936_v54  ;;  %v1312_v54 = vperm.slane %v9740_v26, 6 }
 0x432   : > { %4709 = vmatmul.bf16.vlgmr.msrb.gmra.mxu3 %v8945_v61  ;;  %v4516_v61 = vadd.f32 %v4515_v34, %v1312_v54 }
 0x434   : > { %v4529_v36 = vadd.f32 %v4528_v35, %v4516_v61  ;;  %v4541_v37 = vpop.f32.mrf.mxu2 }
 0x436   : > { %v4542_v38 = vadd.f32 %v4541_v37, %v4529_v36  ;;  %v4554_v40 = vpop.f32.mrf.mxu3 }
 0x438   : > { %v4555_v41 = vadd.f32 %v4554_v40, %v4542_v38 }
 0x43c   : > { %v4543_v44 = vpop.f32.mrf.mxu2 }
 0x43e   : > { %v4556_v45 = vpop.f32.mrf.mxu3 }
 0x449   : > { %v4567_v8 = vpop.f32.mrf.mxu0 }
 0x44a   : > { %v4568_v48 = vadd.f32 %v4567_v8, %v4555_v41 }
 0x44b   : > { %v4580_v49 = vpop.f32.mrf.mxu1 }
 0x44c   : > { %v4581_v50 = vadd.f32 %v4580_v49, %v4568_v48 }
 0x451   : > { %v4569_v59 = vpop.f32.mrf.mxu0 }
 0x453   : > { %v4593_v55 = vpop.f32.mrf.mxu2  ;;  %v4582_v46 = vpop.f32.mrf.mxu1 }
 0x454   : > { %v4594_v56 = vadd.f32 %v4593_v55, %v4581_v50 }
 0x455   : > { %v4606_v10 = vpop.f32.mrf.mxu3 }
 0x456   : > { %v4607_v57 = vadd.f32 %v4606_v10, %v4594_v56 }
 0x458   : > { %vm4720_vm10 = vcmp.gt.f32.partialorder %v4607_v57, 0.0  ;;  %v4728_v62 = vmul.f32 0.01, %v4607_v57 }
 0x45a   : > { %v9929_v0 = vsel %vm4720_vm10, %v4607_v57, %v4728_v62 }
 0x45b   : > { %v4595_v1 = vpop.f32.mrf.mxu2 }
 0x45d   : > { %v4608_v52 = vpop.f32.mrf.mxu3 }
 0x469   : > { %v4619_v2 = vpop.f32.mrf.mxu0 }
 0x46a   : > { %v4620_v9 = vadd.f32 %v4619_v2, %v1313_v53 }
 0x46b   : > { %v4632_v47 = vpop.f32.mrf.mxu1 }
 0x46c   : > { %v4633_v11 = vadd.f32 %v4632_v47, %v4620_v9 }
 0x471   : > { %v4621_v4 = vpop.f32.mrf.mxu0 }
 0x473   : > { %v4645_v18 = vpop.f32.mrf.mxu2  ;;  %v4634_v5 = vpop.f32.mrf.mxu1 }
 0x474   : > { %v4646_v12 = vadd.f32 %v4645_v18, %v4633_v11 }
 0x475   : > { %v4658_v3 = vpop.f32.mrf.mxu3 }
 0x476   : > { %v4659_v13 = vadd.f32 %v4658_v3, %v4646_v12 }
 0x47b   : > { %v4647_v6 = vpop.f32.mrf.mxu2 }
 0x47d   : > { %v4660_v7 = vpop.f32.mrf.mxu3 }
 0x4a9   : > { %v4671_v14 = vpop.f32.mrf.mxu0 }
 0x4aa   : > { %v4672_v16 = vadd.f32 %v4671_v14, %v4659_v13 }
 0x4ab   : > { %v4684_v15 = vpop.f32.mrf.mxu1 }
 0x4ac   : > { %v4685_v17 = vadd.f32 %v4684_v15, %v4672_v16 }
 0x4b1   : > { %v4673_v21 = vpop.f32.mrf.mxu0 }
 0x4b3   : > { %v4697_v32 = vpop.f32.mrf.mxu2  ;;  %v4686_v24 = vpop.f32.mrf.mxu1 }
 0x4b4   : > { %v4698_v19 = vadd.f32 %v4697_v32, %v4685_v17 }
 0x4b5   : > { %v4710_v20 = vpop.f32.mrf.mxu3 }
 0x4b6   : > { %v4711_v25 = vadd.f32 %v4710_v20, %v4698_v19 }
 0x4b8   : > { %vm4721_vm11 = vcmp.gt.f32.partialorder %v4711_v25, 0.0  ;;  %v4729_v27 = vmul.f32 0.01, %v4711_v25 }
 0x4b9   : > { %4740 = sbr.rel (%p5648_p0) target bundleno = 1221 (0x4c5), region = 96 }
 0x4ba   : > { %v4737_v28 = vsel %vm4721_vm11, %v4711_v25, %v4729_v27 }
 0x4bb   : > { %v4699_v26 = vpop.f32.mrf.mxu2 }
 0x4bd   : > { %v4712_v29 = vpop.f32.mrf.mxu3 }
 0x4be   : > { %v4749_v30 = vrot.slane %v9411_v23, 6  ;;  %v4750_v33 = vrot.slane %v9556_v31, 4  ;;  %v4751_v60 = vrot.slane %v9698_v39, 2  ;;  %vm4755_vm12 = vcmask 1041408  }
 0x4bf   : > { %vm4757_vm13 = vcmask 1045508   ;;  %vm4759_vm14 = vcmask 1043456   ;;  %v4752_v63 = vrot.slane %v9926_v51, 6  ;;  %v4753_v54 = vrot.slane %v9929_v0, 4 }
 0x4c0   : > { %v4756_v34 = vsel %vm4755_vm12, %v9269_v22, %v4749_v30  ;;  %v4758_v61 = vsel %vm4757_vm13, %v4750_v33, %v4751_v60  ;;  %v4754_v35 = vrot.slane %v4737_v28, 2 }
 0x4c1   : > { %v4760_v36 = vsel %vm4759_vm14, %v4756_v34, %v4758_v61  ;;  %v4761_v37 = vsel %vm4755_vm12, %v9843_v58, %v4752_v63 }
 0x4c2   : > { %4766 = vst [vmem:[#allocation2] sm:$0xff] %v4760_v36  ;;  %v4762_v38 = vsel %vm4757_vm13, %v4753_v54, %v4754_v35 }
 0x4c3   : > { %v4763_v40 = vsel %vm4759_vm14, %v4761_v37, %v4762_v38 }
 0x4c4   : > { %4767 = vst [vmem:[#allocation2 + $0x8] sm:$0xff] %v4763_v40 }
 0x4c5 PF: > { %p7698_p3 = scmp.eq.s32.totalorder %s10783_s30, 0 }
 0x4c7   : > { %4771 = sbr.rel (%p7698_p3) target bundleno = 1254 (0x4e6), region = 100 }
 0x4cc   : > { %v4772_v41 = vld [vmem:[#allocation3 + $0x8] sm:$0xff]  ;;  %v4773_v42 = vld [vmem:[#allocation3] sm:$0xff]  ;;  %vm4841_vm15 = vcmask 1041408   ;;  %vm4843_vm0 = vcmask 1045508   ;;  %vm4845_vm1 = vcmask 1043456  }
 0x4cd   : > { %4776 = vst [vmem:[#allocation1] ss:$4 sm:$0xff] %v4772_v41 }
 0x4ce   : > { %4778 = vst [vmem:[#allocation1 + $0x20] ss:$4 sm:$0xff] %v4773_v42 }
 0x4d4   : > { %v4779_v43 = vld.sshfl [vmem:[#allocation1] sm:$0xff pattern:$0x73625140]  ;;  %v4780_v44 = vld.sshfl [vmem:[#allocation1 + $0x8] sm:$0xff pattern:$0x73625140] }
 0x4d5   : > { %v4781_v45 = vld.sshfl [vmem:[#allocation1 + $0x10] sm:$0xff pattern:$0x73625140]  ;;  %v4782_v8 = vld.sshfl [vmem:[#allocation1 + $0x18] sm:$0xff pattern:$0x73625140]  ;;  %v4795_v48 = vadd.f32 %v4779_v43, %v9269_v22  ;;  %v4796_v49 = vadd.f32 %v4780_v44, %v9411_v23 }
 0x4d6   : > { %v4797_v50 = vadd.f32 %v4781_v45, %v9556_v31  ;;  %v4798_v55 = vadd.f32 %v4782_v8, %v9698_v39  ;;  %v4783_v56 = vld.sshfl [vmem:[#allocation1 + $0x20] sm:$0xff pattern:$0x73625140]  ;;  %v4784_v10 = vld.sshfl [vmem:[#allocation1 + $0x28] sm:$0xff pattern:$0x73625140] }
 0x4d7   : > { %vm4803_vm2 = vcmp.gt.f32.partialorder %v4795_v48, 0.0  ;;  %vm4804_vm3 = vcmp.gt.f32.partialorder %v4796_v49, 0.0  ;;  %v4811_v57 = vmul.f32 0.01, %v4795_v48  ;;  %v4812_v59 = vmul.f32 0.01, %v4796_v49 }
 0x4d8   : > { %vm4805_vm4 = vcmp.gt.f32.partialorder %v4797_v50, 0.0  ;;  %vm4806_vm5 = vcmp.gt.f32.partialorder %v4798_v55, 0.0  ;;  %v4813_v46 = vmul.f32 0.01, %v4797_v50  ;;  %v4814_v62 = vmul.f32 0.01, %v4798_v55 }
 0x4d9   : > { %v4820_v1 = vsel %vm4804_vm3, %v4796_v49, %v4812_v59  ;;  %v4785_v52 = vld.sshfl [vmem:[#allocation1 + $0x30] sm:$0xff pattern:$0x73625140]  ;;  %v4786_v2 = vld.sshfl [vmem:[#allocation1 + $0x38] sm:$0xff pattern:$0x73625140]  ;;  %v4799_v22 = vadd.f32 %v4783_v56, %v9843_v58  ;;  %v4800_v23 = vadd.f32 %v4784_v10, %v9926_v51  ;;  %v4819_v3 = vsel %vm4803_vm2, %v4795_v48, %v4811_v57 }
 0x4da   : > { %v4821_v31 = vsel %vm4805_vm4, %v4797_v50, %v4813_v46  ;;  %v4822_v47 = vsel %vm4806_vm5, %v4798_v55, %v4814_v62  ;;  %v4835_v39 = vrot.slane %v4820_v1, 6  ;;  %v4801_v18 = vadd.f32 %v4785_v52, %v9929_v0 }
 0x4db   : > { %v4836_v4 = vrot.slane %v4821_v31, 4  ;;  %v4837_v5 = vrot.slane %v4822_v47, 2  ;;  %v4802_v53 = vadd.f32 %v4786_v2, %v4737_v28  ;;  %vm4808_vm6 = vcmp.gt.f32.partialorder %v4800_v23, 0.0 }
 0x4dc   : > { %v4842_v6 = vsel %vm4841_vm15, %v4819_v3, %v4835_v39  ;;  %vm4809_vm7 = vcmp.gt.f32.partialorder %v4801_v18, 0.0  ;;  %v4815_v7 = vmul.f32 0.01, %v4799_v22  ;;  %v4816_v58 = vmul.f32 0.01, %v4800_v23 }
 0x4dd   : > { %v4844_v9 = vsel %vm4843_vm0, %v4836_v4, %v4837_v5  ;;  %vm4810_vm8 = vcmp.gt.f32.partialorder %v4802_v53, 0.0  ;;  %v4817_v51 = vmul.f32 0.01, %v4801_v18  ;;  %vm4807_vm9 = vcmp.gt.f32.partialorder %v4799_v22, 0.0 }
 0x4de   : > { %v4846_v11 = vsel %vm4845_vm1, %v4842_v6, %v4844_v9  ;;  %v4818_v12 = vmul.f32 0.01, %v4802_v53  ;;  %v4824_v0 = vsel %vm4808_vm6, %v4800_v23, %v4816_v58  ;;  %v4823_v17 = vsel %vm4807_vm9, %v4799_v22, %v4815_v7 }
 0x4df   : > { %4852 = vst [vmem:[#allocation2] sm:$0xff] %v4846_v11  ;;  %v4825_v13 = vsel %vm4809_vm7, %v4801_v18, %v4817_v51  ;;  %v4838_v15 = vrot.slane %v4824_v0, 6 }
 0x4e0   : > { %v4826_v14 = vsel %vm4810_vm8, %v4802_v53, %v4818_v12  ;;  %v4839_v16 = vrot.slane %v4825_v13, 4 }
 0x4e1   : > { %v4840_v32 = vrot.slane %v4826_v14, 2  ;;  %v4847_v19 = vsel %vm4841_vm15, %v4823_v17, %v4838_v15 }
 0x4e3   : > { %v4848_v20 = vsel %vm4843_vm0, %v4839_v16, %v4840_v32 }
 0x4e4   : > { %v4849_v21 = vsel %vm4845_vm1, %v4847_v19, %v4848_v20 }
 0x4e5   : > { %4853 = vst [vmem:[#allocation2 + $0x8] sm:$0xff] %v4849_v21 }
 0x4e6 PF: > { %p7699_p13 = scmp.ne.s32.totalorder %s8623_s8, 5 }
 0x4e8   : > { %4857 = sbr.rel (%p7699_p13) target bundleno = 1464 (0x5b8), region = 104 }
 0x4ed   : > { %v4907_v24 = vld [vmem:[%s10751_s5 + $0x178] sm:$0xff]  ;;  %v4906_v27 = vld [vmem:[%s10751_s5 + $0x170] sm:$0xff]  ;;  %v4905_v30 = vld [vmem:[%s10751_s5 + $0x168] sm:$0xff]  ;;  %vm5173_vm10 = vcmask 132096  }
 0x4ee   : > { %v4875_v25 = vld [vmem:[%s10751_s5 + $0x78] sm:$0xff]  ;;  %5053 = vmatpush.msra.mxu2 %v4907_v24  ;;  %v4874_v26 = vld [vmem:[%s10751_s5 + $0x70] sm:$0xff]  ;;  %v4873_v60 = vld [vmem:[%s10751_s5 + $0x68] sm:$0xff] }
 0x4ef   : > { %5013 = vmatpush.msra.mxu0 %v4875_v25  ;;  %v4923_v28 = vld [vmem:[%s10751_s5 + $0x1f8] sm:$0xff]  ;;  %v4922_v33 = vld [vmem:[%s10751_s5 + $0x1f0] sm:$0xff]  ;;  %v4921_v54 = vld [vmem:[%s10751_s5 + $0x1e8] sm:$0xff] }
 0x4f0   : > { %v4891_v29 = vld [vmem:[%s10751_s5 + $0xf8] sm:$0xff]  ;;  %5073 = vmatpush.msra.mxu3 %v4923_v28  ;;  %5054 = vmatpush.msra.mxu2 %v4906_v27  ;;  %v4890_v63 = vld [vmem:[%s10751_s5 + $0xf0] sm:$0xff]  ;;  %v4904_v34 = vld [vmem:[%s10751_s5 + $0x160] sm:$0xff] }
 0x4f1   : > { %5033 = vmatpush.msra.mxu1 %v4891_v29  ;;  %5014 = vmatpush.msra.mxu0 %v4874_v26  ;;  %v4872_v61 = vld [vmem:[%s10751_s5 + $0x60] sm:$0xff]  ;;  %v4889_v35 = vld [vmem:[%s10751_s5 + $0xe8] sm:$0xff]  ;;  %v4903_v38 = vld [vmem:[%s10751_s5 + $0x158] sm:$0xff] }
 0x4f2   : > { %5074 = vmatpush.msra.mxu3 %v4922_v33  ;;  %5055 = vmatpush.msra.mxu2 %v4905_v30  ;;  %v4920_v36 = vld [vmem:[%s10751_s5 + $0x1e0] sm:$0xff]  ;;  %v4871_v40 = vld [vmem:[%s10751_s5 + $0x58] sm:$0xff]  ;;  %v4902_v43 = vld [vmem:[%s10751_s5 + $0x150] sm:$0xff] }
 0x4f3   : > { %5034 = vmatpush.msra.mxu1 %v4890_v63  ;;  %5015 = vmatpush.msra.mxu0 %v4873_v60  ;;  %v4888_v37 = vld [vmem:[%s10751_s5 + $0xe0] sm:$0xff]  ;;  %v4919_v41 = vld [vmem:[%s10751_s5 + $0x1d8] sm:$0xff]  ;;  %v4870_v44 = vld [vmem:[%s10751_s5 + $0x50] sm:$0xff] }
 0x4f4   : > { %5075 = vmatpush.msra.mxu3 %v4921_v54  ;;  %5056 = vmatpush.msra.mxu2 %v4904_v34  ;;  %v4887_v42 = vld [vmem:[%s10751_s5 + $0xd8] sm:$0xff]  ;;  %v4918_v45 = vld [vmem:[%s10751_s5 + $0x1d0] sm:$0xff]  ;;  %v4901_v48 = vld [vmem:[%s10751_s5 + $0x148] sm:$0xff] }
 0x4f5   : > { %5035 = vmatpush.msra.mxu1 %v4889_v35  ;;  %5016 = vmatpush.msra.mxu0 %v4872_v61  ;;  %v4886_v8 = vld [vmem:[%s10751_s5 + $0xd0] sm:$0xff]  ;;  %v4869_v49 = vld [vmem:[%s10751_s5 + $0x48] sm:$0xff]  ;;  %v4900_v56 = vld [vmem:[%s10751_s5 + $0x140] sm:$0xff] }
 0x4f6   : > { %5076 = vmatpush.msra.mxu3 %v4920_v36  ;;  %5057 = vmatpush.msra.mxu2 %v4903_v38  ;;  %v4917_v50 = vld [vmem:[%s10751_s5 + $0x1c8] sm:$0xff]  ;;  %v4868_v10 = vld [vmem:[%s10751_s5 + $0x40] sm:$0xff]  ;;  %v4899_v46 = vld [vmem:[%s10751_s5 + $0x138] sm:$0xff] }
 0x4f7   : > { %5036 = vmatpush.msra.mxu1 %v4888_v37  ;;  %5017 = vmatpush.msra.mxu0 %v4871_v40  ;;  %v4885_v55 = vld [vmem:[%s10751_s5 + $0xc8] sm:$0xff]  ;;  %v4916_v57 = vld [vmem:[%s10751_s5 + $0x1c0] sm:$0xff]  ;;  %v4867_v62 = vld [vmem:[%s10751_s5 + $0x38] sm:$0xff] }
 0x4f8   : > { %5077 = vmatpush.msra.mxu3 %v4919_v41  ;;  %5058 = vmatpush.msra.mxu2 %v4902_v43  ;;  %v4884_v59 = vld [vmem:[%s10751_s5 + $0xc0] sm:$0xff]  ;;  %v4915_v1 = vld [vmem:[%s10751_s5 + $0x1b8] sm:$0xff]  ;;  %v4898_v2 = vld [vmem:[%s10751_s5 + $0x130] sm:$0xff] }
 0x4f9   : > { %5037 = vmatpush.msra.mxu1 %v4887_v42  ;;  %5018 = vmatpush.msra.mxu0 %v4870_v44  ;;  %v4883_v52 = vld [vmem:[%s10751_s5 + $0xb8] sm:$0xff]  ;;  %v4866_v22 = vld [vmem:[%s10751_s5 + $0x30] sm:$0xff]  ;;  %v4897_v47 = vld [vmem:[%s10751_s5 + $0x128] sm:$0xff] }
 0x4fa   : > { %5078 = vmatpush.msra.mxu3 %v4918_v45  ;;  %5059 = vmatpush.msra.mxu2 %v4901_v48  ;;  %v4914_v23 = vld [vmem:[%s10751_s5 + $0x1b0] sm:$0xff]  ;;  %v4865_v39 = vld [vmem:[%s10751_s5 + $0x28] sm:$0xff]  ;;  %v4896_v4 = vld [vmem:[%s10751_s5 + $0x120] sm:$0xff] }
 0x4fb   : > { %5038 = vmatpush.msra.mxu1 %v4886_v8  ;;  %5019 = vmatpush.msra.mxu0 %v4869_v49  ;;  %v4882_v31 = vld [vmem:[%s10751_s5 + $0xb0] sm:$0xff]  ;;  %v4913_v18 = vld [vmem:[%s10751_s5 + $0x1a8] sm:$0xff]  ;;  %v4864_v5 = vld [vmem:[%s10751_s5 + $0x20] sm:$0xff] }
 0x4fc   : > { %5079 = vmatpush.msra.mxu3 %v4917_v50  ;;  %5060 = vmatpush.msra.mxu2 %v4900_v56  ;;  %v4881_v3 = vld [vmem:[%s10751_s5 + $0xa8] sm:$0xff]  ;;  %v4912_v53 = vld [vmem:[%s10751_s5 + $0x1a0] sm:$0xff]  ;;  %v4895_v7 = vld [vmem:[%s10751_s5 + $0x118] sm:$0xff] }
 0x4fd   : > { %5039 = vmatpush.msra.mxu1 %v4885_v55  ;;  %5020 = vmatpush.msra.mxu0 %v4868_v10  ;;  %v4880_v6 = vld [vmem:[%s10751_s5 + $0xa0] sm:$0xff]  ;;  %v4863_v9 = vld [vmem:[%s10751_s5 + $0x18] sm:$0xff]  ;;  %v4894_v11 = vld [vmem:[%s10751_s5 + $0x110] sm:$0xff] }
 0x4fe   : > { %5080 = vmatpush.msra.mxu3 %v4916_v57  ;;  %5061 = vmatpush.msra.mxu2 %v4899_v46  ;;  %v4911_v58 = vld [vmem:[%s10751_s5 + $0x198] sm:$0xff]  ;;  %v4862_v12 = vld [vmem:[%s10751_s5 + $0x10] sm:$0xff]  ;;  %v4893_v14 = vld [vmem:[%s10751_s5 + $0x108] sm:$0xff] }
 0x4ff   : > { %5040 = vmatpush.msra.mxu1 %v4884_v59  ;;  %5021 = vmatpush.msra.mxu0 %v4867_v62  ;;  %v4879_v51 = vld [vmem:[%s10751_s5 + $0x98] sm:$0xff]  ;;  %v4910_v0 = vld [vmem:[%s10751_s5 + $0x190] sm:$0xff]  ;;  %v4861_v15 = vld [vmem:[%s10751_s5 + $0x8] sm:$0xff] }
 0x500   : > { %5081 = vmatpush.msra.mxu3 %v4915_v1  ;;  %5062 = vmatpush.msra.mxu2 %v4898_v2  ;;  %v4878_v13 = vld [vmem:[%s10751_s5 + $0x90] sm:$0xff]  ;;  %v4909_v16 = vld [vmem:[%s10751_s5 + $0x188] sm:$0xff]  ;;  %v4892_v32 = vld [vmem:[%s10751_s5 + $0x100] sm:$0xff] }
 0x501   : > { %5041 = vmatpush.msra.mxu1 %v4883_v52  ;;  %5022 = vmatpush.msra.mxu0 %v4866_v22  ;;  %v4877_v17 = vld [vmem:[%s10751_s5 + $0x88] sm:$0xff]  ;;  %v4860_v19 = vld [vmem:[%s10751_s5] sm:$0xff]  ;;  %v4971_v20 = vld [vmem:[%s10751_s5 + $0x378] sm:$0xff] }
 0x502   : > { %5082 = vmatpush.msra.mxu3 %v4914_v23  ;;  %5063 = vmatpush.msra.mxu2 %v4897_v47  ;;  %v4908_v21 = vld [vmem:[%s10751_s5 + $0x180] sm:$0xff]  ;;  %v4939_v24 = vld [vmem:[%s10751_s5 + $0x278] sm:$0xff]  ;;  %v4970_v27 = vld [vmem:[%s10751_s5 + $0x370] sm:$0xff] }
 0x503   : > { %5042 = vmatpush.msra.mxu1 %v4882_v31  ;;  %5023 = vmatpush.msra.mxu0 %v4865_v39  ;;  %v4987_v25 = vld [vmem:[%s10751_s5 + $0x3f8] sm:$0xff]  ;;  %v4876_v28 = vld [vmem:[%s10751_s5 + $0x80] sm:$0xff]  ;;  %v4938_v26 = vld [vmem:[%s10751_s5 + $0x270] sm:$0xff] }
 0x504   : > { %5083 = vmatpush.msra.mxu3 %v4913_v18  ;;  %5064 = vmatpush.msra.mxu2 %v4896_v4  ;;  %v4955_v29 = vld [vmem:[%s10751_s5 + $0x2f8] sm:$0xff]  ;;  %v4969_v30 = vld [vmem:[%s10751_s5 + $0x368] sm:$0xff]  ;;  %v4986_v33 = vld [vmem:[%s10751_s5 + $0x3f0] sm:$0xff] }
 0x505   : > { %5043 = vmatpush.msra.mxu1 %v4881_v3  ;;  %5024 = vmatpush.msra.mxu0 %v4864_v5  ;;  %v4937_v60 = vld [vmem:[%s10751_s5 + $0x268] sm:$0xff]  ;;  %v4954_v63 = vld [vmem:[%s10751_s5 + $0x2f0] sm:$0xff]  ;;  %v4968_v54 = vld [vmem:[%s10751_s5 + $0x360] sm:$0xff] }
 0x506   : > { %5084 = vmatpush.msra.mxu3 %v4912_v53  ;;  %5065 = vmatpush.msra.mxu2 %v4895_v7  ;;  %v4985_v34 = vld [vmem:[%s10751_s5 + $0x3e8] sm:$0xff]  ;;  %v4936_v61 = vld [vmem:[%s10751_s5 + $0x260] sm:$0xff]  ;;  %v4967_v37 = vld [vmem:[%s10751_s5 + $0x358] sm:$0xff] }
 0x507   : > { %5044 = vmatpush.msra.mxu1 %v4880_v6  ;;  %5025 = vmatpush.msra.mxu0 %v4863_v9  ;;  %v4953_v35 = vld [vmem:[%s10751_s5 + $0x2e8] sm:$0xff]  ;;  %v4984_v38 = vld [vmem:[%s10751_s5 + $0x3e0] sm:$0xff]  ;;  %v4935_v40 = vld [vmem:[%s10751_s5 + $0x258] sm:$0xff] }
 0x508   : > { %5085 = vmatpush.msra.mxu3 %v4911_v58  ;;  %5066 = vmatpush.msra.mxu2 %v4894_v11  ;;  %v4858_v36 = vld [vmem:[#allocation2] sm:$0xff]  ;;  %v4952_v41 = vld [vmem:[%s10751_s5 + $0x2e0] sm:$0xff]  ;;  %v4966_v42 = vld [vmem:[%s10751_s5 + $0x350] sm:$0xff] }
 0x509   : > { %5045 = vmatpush.msra.mxu1 %v4879_v51  ;;  %5026 = vmatpush.msra.mxu0 %v4862_v12  ;;  %4994 = vst [vmem:[#allocation1] ss:$4 sm:$0xff] %v4858_v36  ;;  %v4983_v43 = vld [vmem:[%s10751_s5 + $0x3d8] sm:$0xff]  ;;  %v4934_v44 = vld [vmem:[%s10751_s5 + $0x250] sm:$0xff]  ;;  %v4965_v8 = vld [vmem:[%s10751_s5 + $0x348] sm:$0xff] }
 0x50a   : > { %5086 = vmatpush.msra.mxu3 %v4910_v0  ;;  %5067 = vmatpush.msra.mxu2 %v4893_v14  ;;  %v4951_v45 = vld [vmem:[%s10751_s5 + $0x2d8] sm:$0xff]  ;;  %v4982_v48 = vld [vmem:[%s10751_s5 + $0x3d0] sm:$0xff]  ;;  %v4933_v50 = vld [vmem:[%s10751_s5 + $0x248] sm:$0xff] }
 0x50b   : > { %5046 = vmatpush.msra.mxu1 %v4878_v13  ;;  %5027 = vmatpush.msra.mxu0 %v4861_v15  ;;  %v4859_v49 = vld [vmem:[#allocation2 + $0x8] sm:$0xff]  ;;  %v4964_v56 = vld [vmem:[%s10751_s5 + $0x340] sm:$0xff]  ;;  %v4981_v10 = vld [vmem:[%s10751_s5 + $0x3c8] sm:$0xff] }
 0x50c   : > { %5087 = vmatpush.msra.mxu3 %v4909_v16  ;;  %5068 = vmatpush.msra.mxu2 %v4892_v32  ;;  %v4950_v55 = vld [vmem:[%s10751_s5 + $0x2d0] sm:$0xff]  ;;  %4996 = vst [vmem:[#allocation1 + $0x20] ss:$4 sm:$0xff] %v4859_v49  ;;  %v4932_v57 = vld [vmem:[%s10751_s5 + $0x240] sm:$0xff]  ;;  %v4949_v59 = vld [vmem:[%s10751_s5 + $0x2c8] sm:$0xff] }
 0x50d   : > { %5047 = vmatpush.msra.mxu1 %v4877_v17  ;;  %5028 = vmatpush.msra.mxu0 %v4860_v19  ;;  %v4963_v46 = vld [vmem:[%s10751_s5 + $0x338] sm:$0xff]  ;;  %v4980_v62 = vld [vmem:[%s10751_s5 + $0x3c0] sm:$0xff]  ;;  %v4962_v2 = vld [vmem:[%s10751_s5 + $0x330] sm:$0xff] }
 0x50e   : > { %5133 = vmatpush.msrb.mxu2 %v4971_v20  ;;  %5088 = vmatpush.msra.mxu3 %v4908_v21  ;;  %v4931_v1 = vld [vmem:[%s10751_s5 + $0x238] sm:$0xff]  ;;  %v4948_v52 = vld [vmem:[%s10751_s5 + $0x2c0] sm:$0xff]  ;;  %v4930_v23 = vld [vmem:[%s10751_s5 + $0x230] sm:$0xff] }
 0x50f   : > { %5093 = vmatpush.msrb.mxu0 %v4939_v24  ;;  %5048 = vmatpush.msra.mxu1 %v4876_v28  ;;  %v4979_v22 = vld [vmem:[%s10751_s5 + $0x3b8] sm:$0xff]  ;;  %v4961_v47 = vld [vmem:[%s10751_s5 + $0x328] sm:$0xff]  ;;  %v4978_v39 = vld [vmem:[%s10751_s5 + $0x3b0] sm:$0xff] }
 0x510   : > { %5153 = vmatpush.msrb.mxu3 %v4987_v25  ;;  %5134 = vmatpush.msrb.mxu2 %v4970_v27  ;;  %v4947_v31 = vld [vmem:[%s10751_s5 + $0x2b8] sm:$0xff]  ;;  %v4929_v18 = vld [vmem:[%s10751_s5 + $0x228] sm:$0xff]  ;;  %v4946_v3 = vld [vmem:[%s10751_s5 + $0x2b0] sm:$0xff] }
 0x511   : > { %5094 = vmatpush.msrb.mxu0 %v4938_v26  ;;  %5113 = vmatpush.msrb.mxu1 %v4955_v29  ;;  %v4960_v4 = vld [vmem:[%s10751_s5 + $0x320] sm:$0xff]  ;;  %v4977_v5 = vld [vmem:[%s10751_s5 + $0x3a8] sm:$0xff]  ;;  %v4999_v53 = vld.sshfl [vmem:[#allocation1 + $0x10] sm:$0xff pattern:$0x73625140] }
 0x512   : > { %5135 = vmatpush.msrb.mxu2 %v4969_v30  ;;  %5154 = vmatpush.msrb.mxu3 %v4986_v33  ;;  %v4928_v6 = vld [vmem:[%s10751_s5 + $0x220] sm:$0xff]  ;;  %v4945_v7 = vld [vmem:[%s10751_s5 + $0x2a8] sm:$0xff]  ;;  %v4959_v9 = vld [vmem:[%s10751_s5 + $0x318] sm:$0xff] }
 0x513   : > { %5095 = vmatpush.msrb.mxu0 %v4937_v60  ;;  %5114 = vmatpush.msrb.mxu1 %v4954_v63  ;;  %v4976_v58 = vld [vmem:[%s10751_s5 + $0x3a0] sm:$0xff]  ;;  %v5000_v11 = vld.sshfl [vmem:[#allocation1 + $0x18] sm:$0xff pattern:$0x73625140]  ;;  %v4958_v13 = vld [vmem:[%s10751_s5 + $0x310] sm:$0xff] }
 0x514   : > { %5136 = vmatpush.msrb.mxu2 %v4968_v54  ;;  %5155 = vmatpush.msrb.mxu3 %v4985_v34  ;;  %v4997_v51 = vld.sshfl [vmem:[#allocation1] sm:$0xff pattern:$0x73625140]  ;;  %v4927_v12 = vld [vmem:[%s10751_s5 + $0x218] sm:$0xff]  ;;  %v4926_v16 = vld [vmem:[%s10751_s5 + $0x210] sm:$0xff] }
 0x515   : > { %5096 = vmatpush.msrb.mxu0 %v4936_v61  ;;  %5115 = vmatpush.msrb.mxu1 %v4953_v35  ;;  %v4944_v0 = vld [vmem:[%s10751_s5 + $0x2a0] sm:$0xff]  ;;  %v4975_v14 = vld [vmem:[%s10751_s5 + $0x398] sm:$0xff]  ;;  %v4998_v15 = vld.sshfl [vmem:[#allocation1 + $0x8] sm:$0xff pattern:$0x73625140] }
 0x516   : > { %5137 = vmatpush.msrb.mxu2 %v4967_v37  ;;  %5156 = vmatpush.msrb.mxu3 %v4984_v38  ;;  %v4943_v17 = vld [vmem:[%s10751_s5 + $0x298] sm:$0xff]  ;;  %v4957_v32 = vld [vmem:[%s10751_s5 + $0x308] sm:$0xff]  ;;  %v4974_v19 = vld [vmem:[%s10751_s5 + $0x390] sm:$0xff] }
 0x517   : > { %5097 = vmatpush.msrb.mxu0 %v4935_v40  ;;  %5116 = vmatpush.msrb.mxu1 %v4952_v41  ;;  %v4925_v20 = vld [vmem:[%s10751_s5 + $0x208] sm:$0xff]  ;;  %v4942_v21 = vld [vmem:[%s10751_s5 + $0x290] sm:$0xff]  ;;  %v4956_v24 = vld [vmem:[%s10751_s5 + $0x300] sm:$0xff] }
 0x518   : > { %5138 = vmatpush.msrb.mxu2 %v4966_v42  ;;  %5157 = vmatpush.msrb.mxu3 %v4983_v43  ;;  %v4973_v25 = vld [vmem:[%s10751_s5 + $0x388] sm:$0xff]  ;;  %v5003_v27 = vld.sshfl [vmem:[#allocation1 + $0x30] sm:$0xff pattern:$0x73625140]  ;;  %v4924_v28 = vld [vmem:[%s10751_s5 + $0x200] sm:$0xff] }
 0x519   : > { %5098 = vmatpush.msrb.mxu0 %v4934_v44  ;;  %5117 = vmatpush.msrb.mxu1 %v4951_v45  ;;  %v4941_v26 = vld [vmem:[%s10751_s5 + $0x288] sm:$0xff]  ;;  %v4972_v29 = vld [vmem:[%s10751_s5 + $0x380] sm:$0xff]  ;;  %v5004_v33 = vld.sshfl [vmem:[#allocation1 + $0x38] sm:$0xff pattern:$0x73625140] }
 0x51a   : > { %5139 = vmatpush.msrb.mxu2 %v4965_v8  ;;  %5158 = vmatpush.msrb.mxu3 %v4982_v48  ;;  %v5001_v30 = vld.sshfl [vmem:[#allocation1 + $0x20] sm:$0xff pattern:$0x73625140]  ;;  %v5002_v63 = vld.sshfl [vmem:[#allocation1 + $0x28] sm:$0xff pattern:$0x73625140] }
 0x51b   : > { %5099 = vmatpush.msrb.mxu0 %v4933_v50  ;;  %5118 = vmatpush.msrb.mxu1 %v4950_v55  ;;  %v4940_v60 = vld [vmem:[%s10751_s5 + $0x280] sm:$0xff]  ;;  %v8306_v54 = vld [vmem:[#allocation13] ss:$0 sm:$0xff] }
 0x51c   : > { %5140 = vmatpush.msrb.mxu2 %v4964_v56  ;;  %5159 = vmatpush.msrb.mxu3 %v4981_v10 }
 0x51d   : > { %5100 = vmatpush.msrb.mxu0 %v4932_v57  ;;  %5119 = vmatpush.msrb.mxu1 %v4949_v59 }
 0x51e   : > { %5141 = vmatpush.msrb.mxu2 %v4963_v46  ;;  %5160 = vmatpush.msrb.mxu3 %v4980_v62 }
 0x51f   : > { %5101 = vmatpush.msrb.mxu0 %v4931_v1  ;;  %5120 = vmatpush.msrb.mxu1 %v4948_v52 }
 0x520   : > { %5142 = vmatpush.msrb.mxu2 %v4962_v2  ;;  %5161 = vmatpush.msrb.mxu3 %v4979_v22 }
 0x521   : > { %5102 = vmatpush.msrb.mxu0 %v4930_v23  ;;  %5121 = vmatpush.msrb.mxu1 %v4947_v31 }
 0x522   : > { %5143 = vmatpush.msrb.mxu2 %v4961_v47  ;;  %5162 = vmatpush.msrb.mxu3 %v4978_v39 }
 0x523   : > { %5103 = vmatpush.msrb.mxu0 %v4929_v18  ;;  %5122 = vmatpush.msrb.mxu1 %v4946_v3 }
 0x524   : > { %5144 = vmatpush.msrb.mxu2 %v4960_v4  ;;  %5163 = vmatpush.msrb.mxu3 %v4977_v5 }
 0x525   : > { %5069 = vmatmul.f32.vlgmr.msra.gmra.mxu2 %v4999_v53  ;;  %5104 = vmatpush.msrb.mxu0 %v4928_v6 }
 0x526   : > { %5123 = vmatpush.msrb.mxu1 %v4945_v7  ;;  %5145 = vmatpush.msrb.mxu2 %v4959_v9 }
 0x527   : > { %5164 = vmatpush.msrb.mxu3 %v4976_v58  ;;  %5029 = vmatmul.f32.vlgmr.msra.gmra.mxu0 %v4997_v51 }
 0x528   : > { %5089 = vmatmul.f32.vlgmr.msra.gmra.mxu3 %v5000_v11  ;;  %5105 = vmatpush.msrb.mxu0 %v4927_v12 }
 0x529   : > { %5124 = vmatpush.msrb.mxu1 %v4944_v0  ;;  %5146 = vmatpush.msrb.mxu2 %v4958_v13 }
 0x52a   : > { %5165 = vmatpush.msrb.mxu3 %v4975_v14  ;;  %5049 = vmatmul.f32.vlgmr.msra.gmra.mxu1 %v4998_v15 }
 0x52b   : > { %5106 = vmatpush.msrb.mxu0 %v4926_v16  ;;  %5125 = vmatpush.msrb.mxu1 %v4943_v17 }
 0x52c   : > { %5147 = vmatpush.msrb.mxu2 %v4957_v32  ;;  %5166 = vmatpush.msrb.mxu3 %v4974_v19 }
 0x52d   : > { %5107 = vmatpush.msrb.mxu0 %v4925_v20  ;;  %5126 = vmatpush.msrb.mxu1 %v4942_v21 }
 0x52e   : > { %5148 = vmatpush.msrb.mxu2 %v4956_v24  ;;  %5167 = vmatpush.msrb.mxu3 %v4973_v25 }
 0x52f   : > { %5149 = vmatmul.f32.vlgmr.msrb.gmra.mxu2 %v5003_v27  ;;  %5108 = vmatpush.msrb.mxu0 %v4924_v28 }
 0x530   : > { %5127 = vmatpush.msrb.mxu1 %v4941_v26  ;;  %5168 = vmatpush.msrb.mxu3 %v4972_v29 }
 0x531   : > { %5109 = vmatmul.f32.vlgmr.msrb.gmra.mxu0 %v5001_v30  ;;  %5169 = vmatmul.f32.vlgmr.msrb.gmra.mxu3 %v5004_v33 }
 0x532   : > { %5128 = vmatpush.msrb.mxu1 %v4940_v60 }
 0x533   : > { %5129 = vmatmul.f32.vlgmr.msrb.gmra.mxu1 %v5002_v63 }
 0x5a4   : > { %v5030_v34 = vpop.f32.mrf.mxu0 }
 0x5a5   : > { %v5031_v61 = vadd.f32 %v8306_v54, %v5030_v34 }
 0x5a7   : > { %v5050_v35 = vpop.f32.mrf.mxu1 }
 0x5a8   : > { %v5051_v36 = vadd.f32 %v5050_v35, %v5031_v61  ;;  %v5070_v37 = vpop.f32.mrf.mxu2 }
 0x5aa   : > { %v5071_v38 = vadd.f32 %v5070_v37, %v5051_v36 }
 0x5ab   : > { %v5090_v40 = vpop.f32.mrf.mxu3 }
 0x5ac   : > { %v5091_v41 = vadd.f32 %v5090_v40, %v5071_v38 }
 0x5ae   : > { %v5110_v42 = vpop.f32.mrf.mxu0 }
 0x5af   : > { %v5111_v43 = vadd.f32 %v5110_v42, %v5091_v41 }
 0x5b0   : > { %v5130_v44 = vpop.f32.mrf.mxu1 }
 0x5b1   : > { %v5131_v45 = vadd.f32 %v5130_v44, %v5111_v43 }
 0x5b2   : > { %v5150_v8 = vpop.f32.mrf.mxu2 }
 0x5b3   : > { %v5151_v48 = vadd.f32 %v5150_v8, %v5131_v45 }
 0x5b4   : > { %v5170_v49 = vpop.f32.mrf.mxu3 }
 0x5b5   : > { %v5171_v50 = vadd.f32 %v5170_v49, %v5151_v48 }
 0x5b7   : > { %5174 = vst.msk [vmem:[#allocation14] sm:$0x3] %vm5173_vm10, %v5171_v50 }
 0x5b8 PF: > { %p7700_p2 = scmp.ne.s32.totalorder %s8623_s8, 9 }
 0x5ba   : > { %5178 = sbr.rel (%p7700_p2) target bundleno = 1674 (0x68a), region = 108 }
 0x5bf   : > { %v5228_v55 = vld [vmem:[%s10753_s7 + $0x178] sm:$0xff]  ;;  %v5227_v10 = vld [vmem:[%s10753_s7 + $0x170] sm:$0xff]  ;;  %v5226_v62 = vld [vmem:[%s10753_s7 + $0x168] sm:$0xff]  ;;  %vm5494_vm11 = vcmask 1024  }
 0x5c0   : > { %v5196_v56 = vld [vmem:[%s10753_s7 + $0x78] sm:$0xff]  ;;  %5374 = vmatpush.msra.mxu2 %v5228_v55  ;;  %v5195_v59 = vld [vmem:[%s10753_s7 + $0x70] sm:$0xff]  ;;  %v5194_v52 = vld [vmem:[%s10753_s7 + $0x68] sm:$0xff] }
 0x5c1   : > { %5334 = vmatpush.msra.mxu0 %v5196_v56  ;;  %v5244_v57 = vld [vmem:[%s10753_s7 + $0x1f8] sm:$0xff]  ;;  %v5243_v1 = vld [vmem:[%s10753_s7 + $0x1f0] sm:$0xff]  ;;  %v5242_v22 = vld [vmem:[%s10753_s7 + $0x1e8] sm:$0xff] }
 0x5c2   : > { %v5212_v46 = vld [vmem:[%s10753_s7 + $0xf8] sm:$0xff]  ;;  %5394 = vmatpush.msra.mxu3 %v5244_v57  ;;  %5375 = vmatpush.msra.mxu2 %v5227_v10  ;;  %v5211_v2 = vld [vmem:[%s10753_s7 + $0xf0] sm:$0xff]  ;;  %v5225_v23 = vld [vmem:[%s10753_s7 + $0x160] sm:$0xff] }
 0x5c3   : > { %5354 = vmatpush.msra.mxu1 %v5212_v46  ;;  %5335 = vmatpush.msra.mxu0 %v5195_v59  ;;  %v5193_v31 = vld [vmem:[%s10753_s7 + $0x60] sm:$0xff]  ;;  %v5210_v47 = vld [vmem:[%s10753_s7 + $0xe8] sm:$0xff]  ;;  %v5224_v3 = vld [vmem:[%s10753_s7 + $0x158] sm:$0xff] }
 0x5c4   : > { %5395 = vmatpush.msra.mxu3 %v5243_v1  ;;  %5376 = vmatpush.msra.mxu2 %v5226_v62  ;;  %v5241_v39 = vld [vmem:[%s10753_s7 + $0x1e0] sm:$0xff]  ;;  %v5192_v4 = vld [vmem:[%s10753_s7 + $0x58] sm:$0xff]  ;;  %v5223_v6 = vld [vmem:[%s10753_s7 + $0x150] sm:$0xff] }
 0x5c5   : > { %5355 = vmatpush.msra.mxu1 %v5211_v2  ;;  %5336 = vmatpush.msra.mxu0 %v5194_v52  ;;  %v5209_v18 = vld [vmem:[%s10753_s7 + $0xe0] sm:$0xff]  ;;  %v5240_v5 = vld [vmem:[%s10753_s7 + $0x1d8] sm:$0xff]  ;;  %v5191_v7 = vld [vmem:[%s10753_s7 + $0x50] sm:$0xff] }
 0x5c6   : > { %5396 = vmatpush.msra.mxu3 %v5242_v22  ;;  %5377 = vmatpush.msra.mxu2 %v5225_v23  ;;  %v5208_v53 = vld [vmem:[%s10753_s7 + $0xd8] sm:$0xff]  ;;  %v5239_v9 = vld [vmem:[%s10753_s7 + $0x1d0] sm:$0xff]  ;;  %v5222_v51 = vld [vmem:[%s10753_s7 + $0x148] sm:$0xff] }
 0x5c7   : > { %5356 = vmatpush.msra.mxu1 %v5210_v47  ;;  %5337 = vmatpush.msra.mxu0 %v5193_v31  ;;  %v5207_v58 = vld [vmem:[%s10753_s7 + $0xd0] sm:$0xff]  ;;  %v5190_v11 = vld [vmem:[%s10753_s7 + $0x48] sm:$0xff]  ;;  %v5221_v13 = vld [vmem:[%s10753_s7 + $0x140] sm:$0xff] }
 0x5c8   : > { %5397 = vmatpush.msra.mxu3 %v5241_v39  ;;  %5378 = vmatpush.msra.mxu2 %v5224_v3  ;;  %v5238_v12 = vld [vmem:[%s10753_s7 + $0x1c8] sm:$0xff]  ;;  %v5189_v14 = vld [vmem:[%s10753_s7 + $0x40] sm:$0xff]  ;;  %v5220_v17 = vld [vmem:[%s10753_s7 + $0x138] sm:$0xff] }
 0x5c9   : > { %5357 = vmatpush.msra.mxu1 %v5209_v18  ;;  %5338 = vmatpush.msra.mxu0 %v5192_v4  ;;  %v5206_v0 = vld [vmem:[%s10753_s7 + $0xc8] sm:$0xff]  ;;  %v5237_v15 = vld [vmem:[%s10753_s7 + $0x1c0] sm:$0xff]  ;;  %v5188_v32 = vld [vmem:[%s10753_s7 + $0x38] sm:$0xff] }
 0x5ca   : > { %5398 = vmatpush.msra.mxu3 %v5240_v5  ;;  %5379 = vmatpush.msra.mxu2 %v5223_v6  ;;  %v5205_v16 = vld [vmem:[%s10753_s7 + $0xc0] sm:$0xff]  ;;  %v5236_v19 = vld [vmem:[%s10753_s7 + $0x1b8] sm:$0xff]  ;;  %v5219_v21 = vld [vmem:[%s10753_s7 + $0x130] sm:$0xff] }
 0x5cb   : > { %5358 = vmatpush.msra.mxu1 %v5208_v53  ;;  %5339 = vmatpush.msra.mxu0 %v5191_v7  ;;  %v5204_v20 = vld [vmem:[%s10753_s7 + $0xb8] sm:$0xff]  ;;  %v5187_v24 = vld [vmem:[%s10753_s7 + $0x30] sm:$0xff]  ;;  %v5218_v28 = vld [vmem:[%s10753_s7 + $0x128] sm:$0xff] }
 0x5cc   : > { %5399 = vmatpush.msra.mxu3 %v5239_v9  ;;  %5380 = vmatpush.msra.mxu2 %v5222_v51  ;;  %v5235_v25 = vld [vmem:[%s10753_s7 + $0x1b0] sm:$0xff]  ;;  %v5186_v26 = vld [vmem:[%s10753_s7 + $0x28] sm:$0xff]  ;;  %v5217_v33 = vld [vmem:[%s10753_s7 + $0x120] sm:$0xff] }
 0x5cd   : > { %5359 = vmatpush.msra.mxu1 %v5207_v58  ;;  %5340 = vmatpush.msra.mxu0 %v5190_v11  ;;  %v5203_v27 = vld [vmem:[%s10753_s7 + $0xb0] sm:$0xff]  ;;  %v5234_v29 = vld [vmem:[%s10753_s7 + $0x1a8] sm:$0xff]  ;;  %v5185_v60 = vld [vmem:[%s10753_s7 + $0x20] sm:$0xff] }
 0x5ce   : > { %5400 = vmatpush.msra.mxu3 %v5238_v12  ;;  %5381 = vmatpush.msra.mxu2 %v5221_v13  ;;  %v5202_v30 = vld [vmem:[%s10753_s7 + $0xa8] sm:$0xff]  ;;  %v5233_v63 = vld [vmem:[%s10753_s7 + $0x1a0] sm:$0xff]  ;;  %v5216_v34 = vld [vmem:[%s10753_s7 + $0x118] sm:$0xff] }
 0x5cf   : > { %5360 = vmatpush.msra.mxu1 %v5206_v0  ;;  %5341 = vmatpush.msra.mxu0 %v5189_v14  ;;  %v5201_v54 = vld [vmem:[%s10753_s7 + $0xa0] sm:$0xff]  ;;  %v5184_v61 = vld [vmem:[%s10753_s7 + $0x18] sm:$0xff]  ;;  %v5215_v37 = vld [vmem:[%s10753_s7 + $0x110] sm:$0xff] }
 0x5d0   : > { %5401 = vmatpush.msra.mxu3 %v5237_v15  ;;  %5382 = vmatpush.msra.mxu2 %v5220_v17  ;;  %v5232_v35 = vld [vmem:[%s10753_s7 + $0x198] sm:$0xff]  ;;  %v5183_v38 = vld [vmem:[%s10753_s7 + $0x10] sm:$0xff]  ;;  %v5214_v42 = vld [vmem:[%s10753_s7 + $0x108] sm:$0xff] }
 0x5d1   : > { %5361 = vmatpush.msra.mxu1 %v5205_v16  ;;  %5342 = vmatpush.msra.mxu0 %v5188_v32  ;;  %v5200_v36 = vld [vmem:[%s10753_s7 + $0x98] sm:$0xff]  ;;  %v5231_v40 = vld [vmem:[%s10753_s7 + $0x190] sm:$0xff]  ;;  %v5182_v43 = vld [vmem:[%s10753_s7 + $0x8] sm:$0xff] }
 0x5d2   : > { %5402 = vmatpush.msra.mxu3 %v5236_v19  ;;  %5383 = vmatpush.msra.mxu2 %v5219_v21  ;;  %v5199_v41 = vld [vmem:[%s10753_s7 + $0x90] sm:$0xff]  ;;  %v5230_v44 = vld [vmem:[%s10753_s7 + $0x188] sm:$0xff]  ;;  %v5213_v8 = vld [vmem:[%s10753_s7 + $0x100] sm:$0xff] }
 0x5d3   : > { %5362 = vmatpush.msra.mxu1 %v5204_v20  ;;  %5343 = vmatpush.msra.mxu0 %v5187_v24  ;;  %v5198_v45 = vld [vmem:[%s10753_s7 + $0x88] sm:$0xff]  ;;  %v5181_v48 = vld [vmem:[%s10753_s7] sm:$0xff]  ;;  %v5292_v49 = vld [vmem:[%s10753_s7 + $0x378] sm:$0xff] }
 0x5d4   : > { %5403 = vmatpush.msra.mxu3 %v5235_v25  ;;  %5384 = vmatpush.msra.mxu2 %v5218_v28  ;;  %v5229_v50 = vld [vmem:[%s10753_s7 + $0x180] sm:$0xff]  ;;  %v5260_v55 = vld [vmem:[%s10753_s7 + $0x278] sm:$0xff]  ;;  %v5291_v10 = vld [vmem:[%s10753_s7 + $0x370] sm:$0xff] }
 0x5d5   : > { %5363 = vmatpush.msra.mxu1 %v5203_v27  ;;  %5344 = vmatpush.msra.mxu0 %v5186_v26  ;;  %v5308_v56 = vld [vmem:[%s10753_s7 + $0x3f8] sm:$0xff]  ;;  %v5197_v57 = vld [vmem:[%s10753_s7 + $0x80] sm:$0xff]  ;;  %v5259_v59 = vld [vmem:[%s10753_s7 + $0x270] sm:$0xff] }
 0x5d6   : > { %5404 = vmatpush.msra.mxu3 %v5234_v29  ;;  %5385 = vmatpush.msra.mxu2 %v5217_v33  ;;  %v5276_v46 = vld [vmem:[%s10753_s7 + $0x2f8] sm:$0xff]  ;;  %v5290_v62 = vld [vmem:[%s10753_s7 + $0x368] sm:$0xff]  ;;  %v5307_v1 = vld [vmem:[%s10753_s7 + $0x3f0] sm:$0xff] }
 0x5d7   : > { %5364 = vmatpush.msra.mxu1 %v5202_v30  ;;  %5345 = vmatpush.msra.mxu0 %v5185_v60  ;;  %v5258_v52 = vld [vmem:[%s10753_s7 + $0x268] sm:$0xff]  ;;  %v5275_v2 = vld [vmem:[%s10753_s7 + $0x2f0] sm:$0xff]  ;;  %v5289_v22 = vld [vmem:[%s10753_s7 + $0x360] sm:$0xff] }
 0x5d8   : > { %5405 = vmatpush.msra.mxu3 %v5233_v63  ;;  %5386 = vmatpush.msra.mxu2 %v5216_v34  ;;  %v5306_v23 = vld [vmem:[%s10753_s7 + $0x3e8] sm:$0xff]  ;;  %v5257_v31 = vld [vmem:[%s10753_s7 + $0x260] sm:$0xff]  ;;  %v5288_v18 = vld [vmem:[%s10753_s7 + $0x358] sm:$0xff] }
 0x5d9   : > { %5365 = vmatpush.msra.mxu1 %v5201_v54  ;;  %5346 = vmatpush.msra.mxu0 %v5184_v61  ;;  %v5274_v47 = vld [vmem:[%s10753_s7 + $0x2e8] sm:$0xff]  ;;  %v5305_v3 = vld [vmem:[%s10753_s7 + $0x3e0] sm:$0xff]  ;;  %v5256_v4 = vld [vmem:[%s10753_s7 + $0x258] sm:$0xff] }
 0x5da   : > { %5406 = vmatpush.msra.mxu3 %v5232_v35  ;;  %5387 = vmatpush.msra.mxu2 %v5215_v37  ;;  %v5179_v39 = vld [vmem:[#allocation2] sm:$0xff]  ;;  %v5273_v5 = vld [vmem:[%s10753_s7 + $0x2e0] sm:$0xff]  ;;  %v5287_v53 = vld [vmem:[%s10753_s7 + $0x350] sm:$0xff] }
 0x5db   : > { %5366 = vmatpush.msra.mxu1 %v5200_v36  ;;  %5347 = vmatpush.msra.mxu0 %v5183_v38  ;;  %5315 = vst [vmem:[#allocation1] ss:$4 sm:$0xff] %v5179_v39  ;;  %v5304_v6 = vld [vmem:[%s10753_s7 + $0x3d8] sm:$0xff]  ;;  %v5255_v7 = vld [vmem:[%s10753_s7 + $0x250] sm:$0xff]  ;;  %v5286_v58 = vld [vmem:[%s10753_s7 + $0x348] sm:$0xff] }
 0x5dc   : > { %5407 = vmatpush.msra.mxu3 %v5231_v40  ;;  %5388 = vmatpush.msra.mxu2 %v5214_v42  ;;  %v5272_v9 = vld [vmem:[%s10753_s7 + $0x2d8] sm:$0xff]  ;;  %v5303_v51 = vld [vmem:[%s10753_s7 + $0x3d0] sm:$0xff]  ;;  %v5254_v12 = vld [vmem:[%s10753_s7 + $0x248] sm:$0xff] }
 0x5dd   : > { %5367 = vmatpush.msra.mxu1 %v5199_v41  ;;  %5348 = vmatpush.msra.mxu0 %v5182_v43  ;;  %v5180_v11 = vld [vmem:[#allocation2 + $0x8] sm:$0xff]  ;;  %v5285_v13 = vld [vmem:[%s10753_s7 + $0x340] sm:$0xff]  ;;  %v5302_v14 = vld [vmem:[%s10753_s7 + $0x3c8] sm:$0xff] }
 0x5de   : > { %5408 = vmatpush.msra.mxu3 %v5230_v44  ;;  %5389 = vmatpush.msra.mxu2 %v5213_v8  ;;  %v5271_v0 = vld [vmem:[%s10753_s7 + $0x2d0] sm:$0xff]  ;;  %5317 = vst [vmem:[#allocation1 + $0x20] ss:$4 sm:$0xff] %v5180_v11  ;;  %v5253_v15 = vld [vmem:[%s10753_s7 + $0x240] sm:$0xff]  ;;  %v5270_v16 = vld [vmem:[%s10753_s7 + $0x2c8] sm:$0xff] }
 0x5df   : > { %5368 = vmatpush.msra.mxu1 %v5198_v45  ;;  %5349 = vmatpush.msra.mxu0 %v5181_v48  ;;  %v5284_v17 = vld [vmem:[%s10753_s7 + $0x338] sm:$0xff]  ;;  %v5301_v32 = vld [vmem:[%s10753_s7 + $0x3c0] sm:$0xff]  ;;  %v5283_v21 = vld [vmem:[%s10753_s7 + $0x330] sm:$0xff] }
 0x5e0   : > { %5454 = vmatpush.msrb.mxu2 %v5292_v49  ;;  %5409 = vmatpush.msra.mxu3 %v5229_v50  ;;  %v5252_v19 = vld [vmem:[%s10753_s7 + $0x238] sm:$0xff]  ;;  %v5269_v20 = vld [vmem:[%s10753_s7 + $0x2c0] sm:$0xff]  ;;  %v5251_v25 = vld [vmem:[%s10753_s7 + $0x230] sm:$0xff] }
 0x5e1   : > { %5414 = vmatpush.msrb.mxu0 %v5260_v55  ;;  %5369 = vmatpush.msra.mxu1 %v5197_v57  ;;  %v5300_v24 = vld [vmem:[%s10753_s7 + $0x3b8] sm:$0xff]  ;;  %v5282_v28 = vld [vmem:[%s10753_s7 + $0x328] sm:$0xff]  ;;  %v5299_v26 = vld [vmem:[%s10753_s7 + $0x3b0] sm:$0xff] }
 0x5e2   : > { %5474 = vmatpush.msrb.mxu3 %v5308_v56  ;;  %5455 = vmatpush.msrb.mxu2 %v5291_v10  ;;  %v5268_v27 = vld [vmem:[%s10753_s7 + $0x2b8] sm:$0xff]  ;;  %v5250_v29 = vld [vmem:[%s10753_s7 + $0x228] sm:$0xff]  ;;  %v5267_v30 = vld [vmem:[%s10753_s7 + $0x2b0] sm:$0xff] }
 0x5e3   : > { %5415 = vmatpush.msrb.mxu0 %v5259_v59  ;;  %5434 = vmatpush.msrb.mxu1 %v5276_v46  ;;  %v5281_v33 = vld [vmem:[%s10753_s7 + $0x320] sm:$0xff]  ;;  %v5298_v60 = vld [vmem:[%s10753_s7 + $0x3a8] sm:$0xff]  ;;  %v5320_v63 = vld.sshfl [vmem:[#allocation1 + $0x10] sm:$0xff pattern:$0x73625140] }
 0x5e4   : > { %5456 = vmatpush.msrb.mxu2 %v5290_v62  ;;  %5475 = vmatpush.msrb.mxu3 %v5307_v1  ;;  %v5249_v54 = vld [vmem:[%s10753_s7 + $0x220] sm:$0xff]  ;;  %v5266_v34 = vld [vmem:[%s10753_s7 + $0x2a8] sm:$0xff]  ;;  %v5280_v61 = vld [vmem:[%s10753_s7 + $0x318] sm:$0xff] }
 0x5e5   : > { %5416 = vmatpush.msrb.mxu0 %v5258_v52  ;;  %5435 = vmatpush.msrb.mxu1 %v5275_v2  ;;  %v5297_v35 = vld [vmem:[%s10753_s7 + $0x3a0] sm:$0xff]  ;;  %v5321_v37 = vld.sshfl [vmem:[#allocation1 + $0x18] sm:$0xff pattern:$0x73625140]  ;;  %v5279_v41 = vld [vmem:[%s10753_s7 + $0x310] sm:$0xff] }
 0x5e6   : > { %5457 = vmatpush.msrb.mxu2 %v5289_v22  ;;  %5476 = vmatpush.msrb.mxu3 %v5306_v23  ;;  %v5318_v36 = vld.sshfl [vmem:[#allocation1] sm:$0xff pattern:$0x73625140]  ;;  %v5248_v38 = vld [vmem:[%s10753_s7 + $0x218] sm:$0xff]  ;;  %v5247_v44 = vld [vmem:[%s10753_s7 + $0x210] sm:$0xff] }
 0x5e7   : > { %5417 = vmatpush.msrb.mxu0 %v5257_v31  ;;  %5436 = vmatpush.msrb.mxu1 %v5274_v47  ;;  %v5265_v40 = vld [vmem:[%s10753_s7 + $0x2a0] sm:$0xff]  ;;  %v5296_v42 = vld [vmem:[%s10753_s7 + $0x398] sm:$0xff]  ;;  %v5319_v43 = vld.sshfl [vmem:[#allocation1 + $0x8] sm:$0xff pattern:$0x73625140] }
 0x5e8   : > { %5458 = vmatpush.msrb.mxu2 %v5288_v18  ;;  %5477 = vmatpush.msrb.mxu3 %v5305_v3  ;;  %v5264_v45 = vld [vmem:[%s10753_s7 + $0x298] sm:$0xff]  ;;  %v5278_v8 = vld [vmem:[%s10753_s7 + $0x308] sm:$0xff]  ;;  %v5295_v48 = vld [vmem:[%s10753_s7 + $0x390] sm:$0xff] }
 0x5e9   : > { %5418 = vmatpush.msrb.mxu0 %v5256_v4  ;;  %5437 = vmatpush.msrb.mxu1 %v5273_v5  ;;  %v5246_v49 = vld [vmem:[%s10753_s7 + $0x208] sm:$0xff]  ;;  %v5263_v50 = vld [vmem:[%s10753_s7 + $0x290] sm:$0xff]  ;;  %v5277_v55 = vld [vmem:[%s10753_s7 + $0x300] sm:$0xff] }
 0x5ea   : > { %5459 = vmatpush.msrb.mxu2 %v5287_v53  ;;  %5478 = vmatpush.msrb.mxu3 %v5304_v6  ;;  %v5294_v56 = vld [vmem:[%s10753_s7 + $0x388] sm:$0xff]  ;;  %v5324_v10 = vld.sshfl [vmem:[#allocation1 + $0x30] sm:$0xff pattern:$0x73625140]  ;;  %v5245_v57 = vld [vmem:[%s10753_s7 + $0x200] sm:$0xff] }
 0x5eb   : > { %5419 = vmatpush.msrb.mxu0 %v5255_v7  ;;  %5438 = vmatpush.msrb.mxu1 %v5272_v9  ;;  %v5262_v59 = vld [vmem:[%s10753_s7 + $0x288] sm:$0xff]  ;;  %v5293_v46 = vld [vmem:[%s10753_s7 + $0x380] sm:$0xff]  ;;  %v5325_v1 = vld.sshfl [vmem:[#allocation1 + $0x38] sm:$0xff pattern:$0x73625140] }
 0x5ec   : > { %5460 = vmatpush.msrb.mxu2 %v5286_v58  ;;  %5479 = vmatpush.msrb.mxu3 %v5303_v51  ;;  %v5322_v62 = vld.sshfl [vmem:[#allocation1 + $0x20] sm:$0xff pattern:$0x73625140]  ;;  %v5323_v2 = vld.sshfl [vmem:[#allocation1 + $0x28] sm:$0xff pattern:$0x73625140] }
 0x5ed   : > { %5420 = vmatpush.msrb.mxu0 %v5254_v12  ;;  %5439 = vmatpush.msrb.mxu1 %v5271_v0  ;;  %v5261_v52 = vld [vmem:[%s10753_s7 + $0x280] sm:$0xff]  ;;  %v8307_v22 = vld [vmem:[#allocation5] ss:$0 sm:$0xff] }
 0x5ee   : > { %5461 = vmatpush.msrb.mxu2 %v5285_v13  ;;  %5480 = vmatpush.msrb.mxu3 %v5302_v14 }
 0x5ef   : > { %5421 = vmatpush.msrb.mxu0 %v5253_v15  ;;  %5440 = vmatpush.msrb.mxu1 %v5270_v16 }
 0x5f0   : > { %5462 = vmatpush.msrb.mxu2 %v5284_v17  ;;  %5481 = vmatpush.msrb.mxu3 %v5301_v32 }
 0x5f1   : > { %5422 = vmatpush.msrb.mxu0 %v5252_v19  ;;  %5441 = vmatpush.msrb.mxu1 %v5269_v20 }
 0x5f2   : > { %5463 = vmatpush.msrb.mxu2 %v5283_v21  ;;  %5482 = vmatpush.msrb.mxu3 %v5300_v24 }
 0x5f3   : > { %5423 = vmatpush.msrb.mxu0 %v5251_v25  ;;  %5442 = vmatpush.msrb.mxu1 %v5268_v27 }
 0x5f4   : > { %5464 = vmatpush.msrb.mxu2 %v5282_v28  ;;  %5483 = vmatpush.msrb.mxu3 %v5299_v26 }
 0x5f5   : > { %5424 = vmatpush.msrb.mxu0 %v5250_v29  ;;  %5443 = vmatpush.msrb.mxu1 %v5267_v30 }
 0x5f6   : > { %5465 = vmatpush.msrb.mxu2 %v5281_v33  ;;  %5484 = vmatpush.msrb.mxu3 %v5298_v60 }
 0x5f7   : > { %5390 = vmatmul.f32.vlgmr.msra.gmra.mxu2 %v5320_v63  ;;  %5425 = vmatpush.msrb.mxu0 %v5249_v54 }
 0x5f8   : > { %5444 = vmatpush.msrb.mxu1 %v5266_v34  ;;  %5466 = vmatpush.msrb.mxu2 %v5280_v61 }
 0x5f9   : > { %5485 = vmatpush.msrb.mxu3 %v5297_v35  ;;  %5350 = vmatmul.f32.vlgmr.msra.gmra.mxu0 %v5318_v36 }
 0x5fa   : > { %5410 = vmatmul.f32.vlgmr.msra.gmra.mxu3 %v5321_v37  ;;  %5426 = vmatpush.msrb.mxu0 %v5248_v38 }
 0x5fb   : > { %5445 = vmatpush.msrb.mxu1 %v5265_v40  ;;  %5467 = vmatpush.msrb.mxu2 %v5279_v41 }
 0x5fc   : > { %5486 = vmatpush.msrb.mxu3 %v5296_v42  ;;  %5370 = vmatmul.f32.vlgmr.msra.gmra.mxu1 %v5319_v43 }
 0x5fd   : > { %5427 = vmatpush.msrb.mxu0 %v5247_v44  ;;  %5446 = vmatpush.msrb.mxu1 %v5264_v45 }
 0x5fe   : > { %5468 = vmatpush.msrb.mxu2 %v5278_v8  ;;  %5487 = vmatpush.msrb.mxu3 %v5295_v48 }
 0x5ff   : > { %5428 = vmatpush.msrb.mxu0 %v5246_v49  ;;  %5447 = vmatpush.msrb.mxu1 %v5263_v50 }
 0x600   : > { %5469 = vmatpush.msrb.mxu2 %v5277_v55  ;;  %5488 = vmatpush.msrb.mxu3 %v5294_v56 }
 0x601   : > { %5470 = vmatmul.f32.vlgmr.msrb.gmra.mxu2 %v5324_v10  ;;  %5429 = vmatpush.msrb.mxu0 %v5245_v57 }
 0x602   : > { %5448 = vmatpush.msrb.mxu1 %v5262_v59  ;;  %5489 = vmatpush.msrb.mxu3 %v5293_v46 }
 0x603   : > { %5430 = vmatmul.f32.vlgmr.msrb.gmra.mxu0 %v5322_v62  ;;  %5490 = vmatmul.f32.vlgmr.msrb.gmra.mxu3 %v5325_v1 }
 0x604   : > { %5449 = vmatpush.msrb.mxu1 %v5261_v52 }
 0x605   : > { %5450 = vmatmul.f32.vlgmr.msrb.gmra.mxu1 %v5323_v2 }
 0x676   : > { %v5351_v23 = vpop.f32.mrf.mxu0 }
 0x677   : > { %v5352_v31 = vadd.f32 %v8307_v22, %v5351_v23 }
 0x679   : > { %v5371_v47 = vpop.f32.mrf.mxu1 }
 0x67a   : > { %v5372_v39 = vadd.f32 %v5371_v47, %v5352_v31  ;;  %v5391_v18 = vpop.f32.mrf.mxu2 }
 0x67c   : > { %v5392_v3 = vadd.f32 %v5391_v18, %v5372_v39 }
 0x67d   : > { %v5411_v4 = vpop.f32.mrf.mxu3 }
 0x67e   : > { %v5412_v5 = vadd.f32 %v5411_v4, %v5392_v3 }
 0x680   : > { %v5431_v53 = vpop.f32.mrf.mxu0 }
 0x681   : > { %v5432_v6 = vadd.f32 %v5431_v53, %v5412_v5 }
 0x682   : > { %v5451_v7 = vpop.f32.mrf.mxu1 }
 0x683   : > { %v5452_v9 = vadd.f32 %v5451_v7, %v5432_v6 }
 0x684   : > { %v5471_v58 = vpop.f32.mrf.mxu2 }
 0x685   : > { %v5472_v51 = vadd.f32 %v5471_v58, %v5452_v9 }
 0x686   : > { %v5491_v11 = vpop.f32.mrf.mxu3 }
 0x687   : > { %v5492_v12 = vadd.f32 %v5491_v11, %v5472_v51 }
 0x689   : > { %5495 = vst.msk [vmem:[%s10756_s10] sm:$0x3] %vm5494_vm11, %v5492_v12 }
 0x68a PF: > { %p8262_p7 = scmp.eq.s32.totalorder %s8623_s8, 9  ;;  %s8545_s3 = smov [#allocation14]  }
 0x68b   : > { %s5502_s2 = sshll.u32 %s8545_s3, 4  ;;  %s5504_s24 = sshll.u32 %s10755_s9, 4  ;;  %s5503_s2 = int_to_ptr.vmem [resolvable:$true] %s5502_s2  ;;  %s5505_s24 = int_to_ptr.hbm [resolvable:$true] %s5504_s24 }
 0x68c   : > { %8235 = dma.vmem_to_hbm [thread:$0]  (%p8262_p7), %s5503_s2, 32, %s5505_s24, [#allocation8]  }
 0x68d   : > { %8519 = dma.done.wait (%p8262_p7), [#allocation8], 32  }
 0x68e   : > { %8521 = vsyncadd (%p8262_p7), [#allocation8], 4294967264 }
 0x68f PF: > { %s10775_s18 = sld [smem:[#allocation20_spill]]  ;;  %s10777_s15 = smov %s8528_s16 }
 0x690   : > { %s10776_s20 = sld [smem:[#allocation21_spill]]  ;;  %s10778_s16 = smov %s8532_s17 }
 0x695   : > { %p23_p9 = scmp.ge.s32.totalorder %s10775_s18, 12  }
 0x696   : > { %s10779_s17 = smov %s10776_s20 }
 0x697   :  { %25 = sbr.rel (!%p23_p9) target bundleno = 9 (0x9), region = 159 }
 0x69c   :  { %5524 = vsyncpa [#allocation7], 1 }
 0x69d   :  { %5526 = vsyncpa [#allocation7 + $0x1], 1 }
 0x69e   :  { %5527 = vsyncpa [#allocation10], 1 }
 0x69f   :  { %5528 = vsyncpa [#allocation8], 1 }
 0x6a0   :  { %5530 = vsyncpa [#allocation8 + $0x1], 1 }

</bundles_post_ra>
